<compile_context>
chip_gen: v5e
topology: v5e:2x2
jax: 0.10.0
libtpu: 0.0.40
codegen_flags: <defaults>
</compile_context>

<pallas_src>
import jax
import jax.numpy as jnp
from jax.experimental import pallas as pl
from jax.experimental.pallas import tpu as pltpu


# ---------------------------------------------------------------------------
# Fused forward kernel factory.
# ---------------------------------------------------------------------------
def _make_net_kernel(n_layers, S, B, H):
    G = 4 * H  # per-direction gate width (PyTorch order i, f, g, o)

    def kernel(*args):
        # ---- unpack refs ---------------------------------------------------
        idx = 0
        x0_ref = args[idx]; idx += 1                     # (S*B, E) time-major
        layer_w = []
        for _ in range(n_layers):
            layer_w.append(tuple(args[idx:idx + 3])); idx += 3   # wih, whh_bd, b
        wt_ref, u_ref, fcw_ref, fcb_ref = args[idx:idx + 4]; idx += 4
        out_ref = args[idx]; idx += 1                    # (B, C)
        xproj_sc = args[idx]; idx += 1                   # (S*B, 8H) scratch
        hseq = []
        for _ in range(n_layers):
            hseq.append(tuple(args[idx:idx + 2])); idx += 2      # hf_sc, hb_sc
        h_st, c_st = args[idx:idx + 2]                   # (B, 2H) packed [fwd|bwd]

        # ---- one bidirectional LSTM layer ----------------------------------
        def run_layer(x2d, wih_ref, whh_ref, b_ref, hf_sc, hb_sc):
            # hoisted input projection, both directions packed: (S*B, 8H)
            xproj_sc[...] = (
                jnp.dot(x2d, wih_ref[...], preferred_element_type=jnp.float32)
                + b_ref[...])

            h_st[...] = jnp.zeros_like(h_st)
            c_st[...] = jnp.zeros_like(c_st)

            @pl.loop(0, S, unroll=True)
            def _(t):
                tb = S - 1 - t
                # one wide recurrent matmul for both directions (block-diag W_hh)
                rec = jnp.dot(h_st[...], whh_ref[...],
                              preferred_element_type=jnp.float32)          # (B, 8H)
                xp = jnp.concatenate(
                    [xproj_sc[pl.ds(t * B, B), pl.ds(0, G)],               # fwd @ t
                     xproj_sc[pl.ds(tb * B, B), pl.ds(G, G)]], axis=1)     # bwd @ tb
                gates = rec + xp                                           # (B, 8H)

                # two full-width EUP passes (vreg-granularity anyway for small B),
                # then static lane slices
                sig = jax.nn.sigmoid(gates)
                tah = jnp.tanh(gates)
                c_prev = c_st[...]

                # forward direction (gate order i, f, g, o)
                c_f = (sig[:, H:2 * H] * c_prev[:, 0:H]
                       + sig[:, 0:H] * tah[:, 2 * H:3 * H])
                h_f = sig[:, 3 * H:G] * jnp.tanh(c_f)
                # backward direction
                c_b = (sig[:, G + H:G + 2 * H] * c_prev[:, H:2 * H]
                       + sig[:, G:G + H] * tah[:, G + 2 * H:G + 3 * H])
                h_b = sig[:, G + 3 * H:2 * G] * jnp.tanh(c_b)

                # packed state writes (static masked stores, no concat needed)
                c_st[pl.ds(0, B), pl.ds(0, H)] = c_f
                c_st[pl.ds(0, B), pl.ds(H, H)] = c_b
                h_st[pl.ds(0, B), pl.ds(0, H)] = h_f
                h_st[pl.ds(0, B), pl.ds(H, H)] = h_b
                # time-major storage: row f = s*B + b
                hf_sc[pl.ds(t * B, B), :] = h_f
                hb_sc[pl.ds(tb * B, B), :] = h_b

            return jnp.concatenate([hf_sc[...], hb_sc[...]], axis=1)       # (S*B, 2H)

        x = x0_ref[...]
        for li in range(n_layers):
            wih_ref, whh_ref, b_ref = layer_w[li]
            hf_sc, hb_sc = hseq[li]
            # TODO(synk): inter-layer dropout (training only) skipped.
            x = run_layer(x, wih_ref, whh_ref, b_ref, hf_sc, hb_sc)

        # ---- attention (faithful to the quirky torch reshapes) -------------
        attn_tanh = jnp.tanh(jnp.dot(x, wt_ref[...],
                                     preferred_element_type=jnp.float32))  # (S*B, A)
        scores = jnp.dot(attn_tanh, u_ref[...],
                         preferred_element_type=jnp.float32)               # (S*B, 1)

        hf_sc, hb_sc = hseq[-1]
        rows = []
        for b in range(B):
            # torch: exps.reshape(-1, S) row b == exp(scores[b*S:(b+1)*S])
            sc_b = scores[b * S:(b + 1) * S, :]                            # (S, 1)
            m_b = jnp.max(sc_b, axis=0, keepdims=True)
            e_b = jnp.exp(sc_b - m_b)            # stable; alphas unchanged
            w_b = e_b / jnp.sum(e_b, axis=0, keepdims=True)                # (S, 1)
            # state[b, s, :] == lstm_out[s, b, :] == time-major rows s*B + b
            x_b = jnp.concatenate(
                [hf_sc[pl.ds(b, S, stride=B), :],
                 hb_sc[pl.ds(b, S, stride=B), :]], axis=1)                 # (S, 2H)
            rows.append(jnp.sum(w_b * x_b, axis=0, keepdims=True))         # (1, 2H)
        attn = jnp.concatenate(rows, axis=0)                               # (B, 2H)

        # TODO(synk): post-attention dropout is eval-mode identity.
        out_ref[...] = (jnp.dot(attn, fcw_ref[...],
                                preferred_element_type=jnp.float32)
                        + fcb_ref[...])                                    # (B, C)

    return kernel


def _full_spec(shape):
    nd = len(shape)
    return pl.BlockSpec(shape, lambda i, _nd=nd: (0,) * _nd)


# ---------------------------------------------------------------------------
# Forward pass wrapper (single pallas_call).
# ---------------------------------------------------------------------------
@jax.jit
def net_forward(params, s):
    emb = jnp.take(params["embedding"], s, axis=0)            # (B, S, E)  XLA gather
    B, S, E = emb.shape
    # time-major flattening (torch seq-first): row f = t*B + b
    x0 = jnp.transpose(emb, (1, 0, 2)).reshape(S * B, E)

    H = params["lstm"][0]["whh_bd"].shape[0] // 2
    C = params["fc_w_t"].shape[1]
    n_layers = len(params["lstm"])

    inputs = [x0]
    for lp in params["lstm"]:
        inputs += [lp["wih"], lp["whh_bd"], lp["b"]]
    inputs += [params["w_t"], params["u_col"], params["fc_w_t"], params["fc_b"]]

    scratch = [pltpu.VMEM((S * B, 8 * H), jnp.float32)]        # packed x-projection
    for _ in range(n_layers):
        scratch += [pltpu.VMEM((S * B, H), jnp.float32),       # per-layer fwd outputs
                    pltpu.VMEM((S * B, H), jnp.float32)]       # per-layer bwd outputs
    scratch += [pltpu.VMEM((B, 2 * H), jnp.float32),           # packed h state [fwd|bwd]
                pltpu.VMEM((B, 2 * H), jnp.float32)]           # packed c state [fwd|bwd]

    kernel = _make_net_kernel(n_layers, S, B, H)
    return pl.pallas_call(
        kernel,
        out_shape=jax.ShapeDtypeStruct((B, C), jnp.float32),
        grid=(1,),
        in_specs=[_full_spec(a.shape) for a in inputs],
        out_specs=_full_spec((B, C)),
        scratch_shapes=scratch,
        compiler_params=pltpu.CompilerParams(
            dimension_semantics=("arbitrary",)),
    )(*inputs)


# ---------------------------------------------------------------------------
# Parameter init (deterministic, mimics PyTorch U(-1/sqrt(H), 1/sqrt(H))),
# pre-packed for the fused kernel.
# ---------------------------------------------------------------------------
def init_params(key, *, vocab_size, embedding_dim, hidden, n_layers,
                attention_size, num_classes):
    keys = iter(jax.random.split(key, 128))

    def unif(shape, scale):
        return jax.random.uniform(next(keys), shape, jnp.float32,
                                  minval=-scale, maxval=scale)

    H = hidden
    k = 1.0 / float(H) ** 0.5
    params = {
        "embedding": jax.random.normal(next(keys), (vocab_size, embedding_dim),
                                       jnp.float32),
        "lstm": [],
        # attention: w: Linear(2H -> A, no bias) stored as W^T; u: Linear(A -> 1, no bias)
        "w_t": unif((2 * H, attention_size), 1.0 / (2.0 * H) ** 0.5),
        "u_col": unif((attention_size, 1), 1.0 / float(attention_size) ** 0.5),
        # fc: Linear(2H -> num_classes)
        "fc_w_t": unif((2 * H, num_classes), 1.0 / (2.0 * H) ** 0.5),
        "fc_b": unif((1, num_classes), 1.0 / (2.0 * H) ** 0.5),
    }
    for layer in range(n_layers):
        in_dim = embedding_dim if layer == 0 else 2 * H
        wih_f = unif((in_dim, 4 * H), k)                     # W_ih^T (fwd)
        wih_b = unif((in_dim, 4 * H), k)                     # W_ih^T (bwd)
        whh_f = unif((H, 4 * H), k)                          # W_hh^T (fwd)
        whh_b = unif((H, 4 * H), k)                          # W_hh^T (bwd)
        bias_f = unif((1, 4 * H), k) + unif((1, 4 * H), k)   # b_ih + b_hh
        bias_b = unif((1, 4 * H), k) + unif((1, 4 * H), k)
        # direction-packed input projection / bias: [fwd 4H | bwd 4H]
        wih = jnp.concatenate([wih_f, wih_b], axis=1)        # (in_dim, 8H)
        b = jnp.concatenate([bias_f, bias_b], axis=1)        # (1, 8H)
        # block-diagonal recurrent weight: [h_f | h_b] @ whh_bd
        #   == [h_f @ whh_f | h_b @ whh_b]
        whh_bd = jnp.zeros((2 * H, 8 * H), jnp.float32)
        whh_bd = whh_bd.at[:H, :4 * H].set(whh_f)
        whh_bd = whh_bd.at[H:, 4 * H:].set(whh_b)
        params["lstm"].append({"wih": wih, "whh_bd": whh_bd, "b": b})
    return params


if __name__ == "__main__":
    # config consistent with the module: n_layers must be 2 so that
    # lstm_hidden_dim * n_layers == 2 * lstm_hidden_dim (attention reshape).
    VOCAB, EMB, HIDDEN, NLAYERS = 20, 32, 32, 2
    ATTN_SIZE, NUM_CLASSES = 512, 5
    BATCH, SEQ = 2, 8

    root = jax.random.PRNGKey(0)
    k_params, k_tokens = jax.random.split(root)
    params = init_params(k_params, vocab_size=VOCAB, embedding_dim=EMB,
                         hidden=HIDDEN, n_layers=NLAYERS,
                         attention_size=ATTN_SIZE, num_classes=NUM_CLASSES)
    s = jax.random.randint(k_tokens, (BATCH, SEQ), 0, VOCAB, dtype=jnp.int32)

    logits = net_forward(params, s)
    logits = jax.block_until_ready(logits)

    assert logits.shape == (BATCH, NUM_CLASSES)
    assert bool(jnp.all(jnp.isfinite(logits)))
    print("KERNEL_OK")
</pallas_src>

<mosaic_0001>
module attributes {stable_mosaic.version = 11 : i64} {
  func.func @kernel(%arg0: i32, %arg1: memref<16x32xf32, #tpu.memory_space<vmem>>, %arg2: memref<32x256xf32, #tpu.memory_space<vmem>>, %arg3: memref<64x256xf32, #tpu.memory_space<vmem>>, %arg4: memref<1x256xf32, #tpu.memory_space<vmem>>, %arg5: memref<64x256xf32, #tpu.memory_space<vmem>>, %arg6: memref<64x256xf32, #tpu.memory_space<vmem>>, %arg7: memref<1x256xf32, #tpu.memory_space<vmem>>, %arg8: memref<64x512xf32, #tpu.memory_space<vmem>>, %arg9: memref<512x1xf32, #tpu.memory_space<vmem>>, %arg10: memref<64x5xf32, #tpu.memory_space<vmem>>, %arg11: memref<1x5xf32, #tpu.memory_space<vmem>>, %arg12: memref<2x5xf32, #tpu.memory_space<vmem>>, %arg13: memref<16x256xf32, #tpu.memory_space<vmem>>, %arg14: memref<16x32xf32, #tpu.memory_space<vmem>>, %arg15: memref<16x32xf32, #tpu.memory_space<vmem>>, %arg16: memref<16x32xf32, #tpu.memory_space<vmem>>, %arg17: memref<16x32xf32, #tpu.memory_space<vmem>>, %arg18: memref<2x64xf32, #tpu.memory_space<vmem>>, %arg19: memref<2x64xf32, #tpu.memory_space<vmem>>) attributes {dimension_semantics = [#tpu.dimension_semantics<arbitrary>], iteration_bounds = array<i64: 1>, scalar_prefetch = 0 : i64, scratch_operands = 7 : i64, tpu.core_type = #tpu.core_type<tc>, window_params = [{pipeline_mode = #tpu.pipeline_mode<synchronous>, transform_indices = @transform_0, window_bounds = array<i64: 16, 32>}, {pipeline_mode = #tpu.pipeline_mode<synchronous>, transform_indices = @transform_1, window_bounds = array<i64: 32, 256>}, {pipeline_mode = #tpu.pipeline_mode<synchronous>, transform_indices = @transform_2, window_bounds = array<i64: 64, 256>}, {pipeline_mode = #tpu.pipeline_mode<synchronous>, transform_indices = @transform_3, window_bounds = array<i64: 1, 256>}, {pipeline_mode = #tpu.pipeline_mode<synchronous>, transform_indices = @transform_4, window_bounds = array<i64: 64, 256>}, {pipeline_mode = #tpu.pipeline_mode<synchronous>, transform_indices = @transform_5, window_bounds = array<i64: 64, 256>}, {pipeline_mode = #tpu.pipeline_mode<synchronous>, transform_indices = @transform_6, window_bounds = array<i64: 1, 256>}, {pipeline_mode = #tpu.pipeline_mode<synchronous>, transform_indices = @transform_7, window_bounds = array<i64: 64, 512>}, {pipeline_mode = #tpu.pipeline_mode<synchronous>, transform_indices = @transform_8, window_bounds = array<i64: 512, 1>}, {pipeline_mode = #tpu.pipeline_mode<synchronous>, transform_indices = @transform_9, window_bounds = array<i64: 64, 5>}, {pipeline_mode = #tpu.pipeline_mode<synchronous>, transform_indices = @transform_10, window_bounds = array<i64: 1, 5>}, {pipeline_mode = #tpu.pipeline_mode<synchronous>, transform_indices = @transform_11, window_bounds = array<i64: 2, 5>}]} {
    %c0 = arith.constant 0 : index
    %c0_0 = arith.constant 0 : index
    %0 = vector.load %arg1[%c0, %c0_0] : memref<16x32xf32, #tpu.memory_space<vmem>>, vector<16x32xf32>
    %c0_1 = arith.constant 0 : index
    %c0_2 = arith.constant 0 : index
    %1 = vector.load %arg2[%c0_1, %c0_2] : memref<32x256xf32, #tpu.memory_space<vmem>>, vector<32x256xf32>
    %cst = arith.constant dense<0.000000e+00> : vector<16x256xf32>
    %2 = tpu.matmul %0, %1, %cst {dimension_numbers = #tpu.dot_dimension_numbers<[1], [0], [0], [1], [0, 0, 1, 1], [], []>} : vector<16x32xf32>, vector<32x256xf32>, vector<16x256xf32> -> vector<16x256xf32>
    %c0_3 = arith.constant 0 : index
    %c0_4 = arith.constant 0 : index
    %3 = vector.load %arg4[%c0_3, %c0_4] : memref<1x256xf32, #tpu.memory_space<vmem>>, vector<1x256xf32>
    %4 = vector.broadcast %3 : vector<1x256xf32> to vector<16x256xf32>
    %5 = arith.addf %2, %4 : vector<16x256xf32>
    %c0_5 = arith.constant 0 : index
    %c0_6 = arith.constant 0 : index
    %6 = vector.load %arg13[%c0_5, %c0_6] : memref<16x256xf32, #tpu.memory_space<vmem>>, vector<16x256xf32>
    tpu.vector_store %arg13[%c0_5, %c0_6], %5 {strides = array<i32>} : memref<16x256xf32, #tpu.memory_space<vmem>>, vector<16x256xf32>,
    %cst_7 = arith.constant 0.000000e+00 : f32
    %7 = vector.broadcast %cst_7 : f32 to vector<2x64xf32>
    %c0_8 = arith.constant 0 : index
    %c0_9 = arith.constant 0 : index
    %8 = vector.load %arg18[%c0_8, %c0_9] : memref<2x64xf32, #tpu.memory_space<vmem>>, vector<2x64xf32>
    tpu.vector_store %arg18[%c0_8, %c0_9], %7 {strides = array<i32>} : memref<2x64xf32, #tpu.memory_space<vmem>>, vector<2x64xf32>,
    %cst_10 = arith.constant 0.000000e+00 : f32
    %9 = vector.broadcast %cst_10 : f32 to vector<2x64xf32>
    %c0_11 = arith.constant 0 : index
    %c0_12 = arith.constant 0 : index
    %10 = vector.load %arg19[%c0_11, %c0_12] : memref<2x64xf32, #tpu.memory_space<vmem>>, vector<2x64xf32>
    tpu.vector_store %arg19[%c0_11, %c0_12], %9 {strides = array<i32>} : memref<2x64xf32, #tpu.memory_space<vmem>>, vector<2x64xf32>,
    %c0_i32 = arith.constant 0 : i32
    %c1_i32 = arith.constant 1 : i32
    %11 = arith.muli %c0_i32, %c1_i32 : i32
    %c0_i32_13 = arith.constant 0 : i32
    %12 = arith.addi %c0_i32_13, %11 : i32
    %c7_i32 = arith.constant 7 : i32
    %13 = arith.subi %c7_i32, %12 : i32
    %c0_14 = arith.constant 0 : index
    %c0_15 = arith.constant 0 : index
    %14 = vector.load %arg18[%c0_14, %c0_15] : memref<2x64xf32, #tpu.memory_space<vmem>>, vector<2x64xf32>
    %c0_16 = arith.constant 0 : index
    %c0_17 = arith.constant 0 : index
    %15 = vector.load %arg3[%c0_16, %c0_17] : memref<64x256xf32, #tpu.memory_space<vmem>>, vector<64x256xf32>
    %cst_18 = arith.constant dense<0.000000e+00> : vector<2x256xf32>
    %16 = tpu.matmul %14, %15, %cst_18 {dimension_numbers = #tpu.dot_dimension_numbers<[1], [0], [0], [1], [0, 0, 1, 1], [], []>} : vector<2x64xf32>, vector<64x256xf32>, vector<2x256xf32> -> vector<2x256xf32>
    %c2_i32 = arith.constant 2 : i32
    %17 = arith.muli %12, %c2_i32 : i32
    %18 = arith.index_cast %17 : i32 to index
    %c0_19 = arith.constant 0 : index
    %19 = vector.load %arg13[%18, %c0_19] : memref<16x256xf32, #tpu.memory_space<vmem>>, vector<2x128xf32>
    %c2_i32_20 = arith.constant 2 : i32
    %20 = arith.muli %13, %c2_i32_20 : i32
    %21 = arith.index_cast %20 : i32 to index
    %c128 = arith.constant 128 : index
    %22 = vector.load %arg13[%21, %c128] : memref<16x256xf32, #tpu.memory_space<vmem>>, vector<2x128xf32>
    %23 = tpu.concatenate %19, %22 in 1 : vector<2x128xf32>, vector<2x128xf32> -> vector<2x256xf32>
    %24 = arith.addf %16, %23 : vector<2x256xf32>
    %25 = arith.negf %24 : vector<2x256xf32>
    %26 = math.exp %25 : vector<2x256xf32>
    %cst_21 = arith.constant 1.000000e+00 : f32
    %27 = vector.broadcast %cst_21 : f32 to vector<2x256xf32>
    %28 = arith.addf %27, %26 : vector<2x256xf32>
    %29 = arith.divf %27, %28 : vector<2x256xf32>
    %30 = math.tanh %24 : vector<2x256xf32>
    %c0_22 = arith.constant 0 : index
    %c0_23 = arith.constant 0 : index
    %31 = vector.load %arg19[%c0_22, %c0_23] : memref<2x64xf32, #tpu.memory_space<vmem>>, vector<2x64xf32>
    %32 = vector.extract_strided_slice %29 {offsets = [0, 32], sizes = [2, 32], strides = [1, 1]} : vector<2x256xf32> to vector<2x32xf32>
    %33 = vector.extract_strided_slice %31 {offsets = [0, 0], sizes = [2, 32], strides = [1, 1]} : vector<2x64xf32> to vector<2x32xf32>
    %34 = arith.mulf %32, %33 : vector<2x32xf32>
    %35 = vector.extract_strided_slice %29 {offsets = [0, 0], sizes = [2, 32], strides = [1, 1]} : vector<2x256xf32> to vector<2x32xf32>
    %36 = vector.extract_strided_slice %30 {offsets = [0, 64], sizes = [2, 32], strides = [1, 1]} : vector<2x256xf32> to vector<2x32xf32>
    %37 = arith.mulf %35, %36 : vector<2x32xf32>
    %38 = arith.addf %34, %37 : vector<2x32xf32>
    %39 = vector.extract_strided_slice %29 {offsets = [0, 96], sizes = [2, 32], strides = [1, 1]} : vector<2x256xf32> to vector<2x32xf32>
    %40 = math.tanh %38 : vector<2x32xf32>
    %41 = arith.mulf %39, %40 : vector<2x32xf32>
    %42 = vector.extract_strided_slice %29 {offsets = [0, 160], sizes = [2, 32], strides = [1, 1]} : vector<2x256xf32> to vector<2x32xf32>
    %43 = vector.extract_strided_slice %31 {offsets = [0, 32], sizes = [2, 32], strides = [1, 1]} : vector<2x64xf32> to vector<2x32xf32>
    %44 = arith.mulf %42, %43 : vector<2x32xf32>
    %45 = vector.extract_strided_slice %29 {offsets = [0, 128], sizes = [2, 32], strides = [1, 1]} : vector<2x256xf32> to vector<2x32xf32>
    %46 = vector.extract_strided_slice %30 {offsets = [0, 192], sizes = [2, 32], strides = [1, 1]} : vector<2x256xf32> to vector<2x32xf32>
    %47 = arith.mulf %45, %46 : vector<2x32xf32>
    %48 = arith.addf %44, %47 : vector<2x32xf32>
    %49 = vector.extract_strided_slice %29 {offsets = [0, 224], sizes = [2, 32], strides = [1, 1]} : vector<2x256xf32> to vector<2x32xf32>
    %50 = math.tanh %48 : vector<2x32xf32>
    %51 = arith.mulf %49, %50 : vector<2x32xf32>
    %c0_24 = arith.constant 0 : index
    %c0_25 = arith.constant 0 : index
    %52 = vector.load %arg19[%c0_24, %c0_25] : memref<2x64xf32, #tpu.memory_space<vmem>>, vector<2x32xf32>
    tpu.vector_store %arg19[%c0_24, %c0_25], %38 {strides = array<i32>} : memref<2x64xf32, #tpu.memory_space<vmem>>, vector<2x32xf32>,
    %c0_26 = arith.constant 0 : index
    %c32 = arith.constant 32 : index
    %53 = vector.load %arg19[%c0_26, %c32] : memref<2x64xf32, #tpu.memory_space<vmem>>, vector<2x32xf32>
    tpu.vector_store %arg19[%c0_26, %c32], %48 {strides = array<i32>} : memref<2x64xf32, #tpu.memory_space<vmem>>, vector<2x32xf32>,
    %c0_27 = arith.constant 0 : index
    %c0_28 = arith.constant 0 : index
    %54 = vector.load %arg18[%c0_27, %c0_28] : memref<2x64xf32, #tpu.memory_space<vmem>>, vector<2x32xf32>
    tpu.vector_store %arg18[%c0_27, %c0_28], %41 {strides = array<i32>} : memref<2x64xf32, #tpu.memory_space<vmem>>, vector<2x32xf32>,
    %c0_29 = arith.constant 0 : index
    %c32_30 = arith.constant 32 : index
    %55 = vector.load %arg18[%c0_29, %c32_30] : memref<2x64xf32, #tpu.memory_space<vmem>>, vector<2x32xf32>
    tpu.vector_store %arg18[%c0_29, %c32_30], %51 {strides = array<i32>} : memref<2x64xf32, #tpu.memory_space<vmem>>, vector<2x32xf32>,
    %c2_i32_31 = arith.constant 2 : i32
    %56 = arith.muli %12, %c2_i32_31 : i32
    %57 = arith.index_cast %56 : i32 to index
    %c0_32 = arith.constant 0 : index
    %58 = vector.load %arg14[%57, %c0_32] : memref<16x32xf32, #tpu.memory_space<vmem>>, vector<2x32xf32>
    tpu.vector_store %arg14[%57, %c0_32], %41 {strides = array<i32>} : memref<16x32xf32, #tpu.memory_space<vmem>>, vector<2x32xf32>,
    %c2_i32_33 = arith.constant 2 : i32
    %59 = arith.muli %13, %c2_i32_33 : i32
    %60 = arith.index_cast %59 : i32 to index
    %c0_34 = arith.constant 0 : index
    %61 = vector.load %arg15[%60, %c0_34] : memref<16x32xf32, #tpu.memory_space<vmem>>, vector<2x32xf32>
    tpu.vector_store %arg15[%60, %c0_34], %51 {strides = array<i32>} : memref<16x32xf32, #tpu.memory_space<vmem>>, vector<2x32xf32>,
    %c1_i32_35 = arith.constant 1 : i32
    %c1_i32_36 = arith.constant 1 : i32
    %62 = arith.muli %c1_i32_35, %c1_i32_36 : i32
    %c0_i32_37 = arith.constant 0 : i32
    %63 = arith.addi %c0_i32_37, %62 : i32
    %c7_i32_38 = arith.constant 7 : i32
    %64 = arith.subi %c7_i32_38, %63 : i32
    %c0_39 = arith.constant 0 : index
    %c0_40 = arith.constant 0 : index
    %65 = vector.load %arg18[%c0_39, %c0_40] : memref<2x64xf32, #tpu.memory_space<vmem>>, vector<2x64xf32>
    %c0_41 = arith.constant 0 : index
    %c0_42 = arith.constant 0 : index
    %66 = vector.load %arg3[%c0_41, %c0_42] : memref<64x256xf32, #tpu.memory_space<vmem>>, vector<64x256xf32>
    %cst_43 = arith.constant dense<0.000000e+00> : vector<2x256xf32>
    %67 = tpu.matmul %65, %66, %cst_43 {dimension_numbers = #tpu.dot_dimension_numbers<[1], [0], [0], [1], [0, 0, 1, 1], [], []>} : vector<2x64xf32>, vector<64x256xf32>, vector<2x256xf32> -> vector<2x256xf32>
    %c2_i32_44 = arith.constant 2 : i32
    %68 = arith.muli %63, %c2_i32_44 : i32
    %69 = arith.index_cast %68 : i32 to index
    %c0_45 = arith.constant 0 : index
    %70 = vector.load %arg13[%69, %c0_45] : memref<16x256xf32, #tpu.memory_space<vmem>>, vector<2x128xf32>
    %c2_i32_46 = arith.constant 2 : i32
    %71 = arith.muli %64, %c2_i32_46 : i32
    %72 = arith.index_cast %71 : i32 to index
    %c128_47 = arith.constant 128 : index
    %73 = vector.load %arg13[%72, %c128_47] : memref<16x256xf32, #tpu.memory_space<vmem>>, vector<2x128xf32>
    %74 = tpu.concatenate %70, %73 in 1 : vector<2x128xf32>, vector<2x128xf32> -> vector<2x256xf32>
    %75 = arith.addf %67, %74 : vector<2x256xf32>
    %76 = arith.negf %75 : vector<2x256xf32>
    %77 = math.exp %76 : vector<2x256xf32>
    %cst_48 = arith.constant 1.000000e+00 : f32
    %78 = vector.broadcast %cst_48 : f32 to vector<2x256xf32>
    %79 = arith.addf %78, %77 : vector<2x256xf32>
    %80 = arith.divf %78, %79 : vector<2x256xf32>
    %81 = math.tanh %75 : vector<2x256xf32>
    %c0_49 = arith.constant 0 : index
    %c0_50 = arith.constant 0 : index
    %82 = vector.load %arg19[%c0_49, %c0_50] : memref<2x64xf32, #tpu.memory_space<vmem>>, vector<2x64xf32>
    %83 = vector.extract_strided_slice %80 {offsets = [0, 32], sizes = [2, 32], strides = [1, 1]} : vector<2x256xf32> to vector<2x32xf32>
    %84 = vector.extract_strided_slice %82 {offsets = [0, 0], sizes = [2, 32], strides = [1, 1]} : vector<2x64xf32> to vector<2x32xf32>
    %85 = arith.mulf %83, %84 : vector<2x32xf32>
    %86 = vector.extract_strided_slice %80 {offsets = [0, 0], sizes = [2, 32], strides = [1, 1]} : vector<2x256xf32> to vector<2x32xf32>
    %87 = vector.extract_strided_slice %81 {offsets = [0, 64], sizes = [2, 32], strides = [1, 1]} : vector<2x256xf32> to vector<2x32xf32>
    %88 = arith.mulf %86, %87 : vector<2x32xf32>
    %89 = arith.addf %85, %88 : vector<2x32xf32>
    %90 = vector.extract_strided_slice %80 {offsets = [0, 96], sizes = [2, 32], strides = [1, 1]} : vector<2x256xf32> to vector<2x32xf32>
    %91 = math.tanh %89 : vector<2x32xf32>
    %92 = arith.mulf %90, %91 : vector<2x32xf32>
    %93 = vector.extract_strided_slice %80 {offsets = [0, 160], sizes = [2, 32], strides = [1, 1]} : vector<2x256xf32> to vector<2x32xf32>
    %94 = vector.extract_strided_slice %82 {offsets = [0, 32], sizes = [2, 32], strides = [1, 1]} : vector<2x64xf32> to vector<2x32xf32>
    %95 = arith.mulf %93, %94 : vector<2x32xf32>
    %96 = vector.extract_strided_slice %80 {offsets = [0, 128], sizes = [2, 32], strides = [1, 1]} : vector<2x256xf32> to vector<2x32xf32>
    %97 = vector.extract_strided_slice %81 {offsets = [0, 192], sizes = [2, 32], strides = [1, 1]} : vector<2x256xf32> to vector<2x32xf32>
    %98 = arith.mulf %96, %97 : vector<2x32xf32>
    %99 = arith.addf %95, %98 : vector<2x32xf32>
    %100 = vector.extract_strided_slice %80 {offsets = [0, 224], sizes = [2, 32], strides = [1, 1]} : vector<2x256xf32> to vector<2x32xf32>
    %101 = math.tanh %99 : vector<2x32xf32>
    %102 = arith.mulf %100, %101 : vector<2x32xf32>
    %c0_51 = arith.constant 0 : index
    %c0_52 = arith.constant 0 : index
    %103 = vector.load %arg19[%c0_51, %c0_52] : memref<2x64xf32, #tpu.memory_space<vmem>>, vector<2x32xf32>
    tpu.vector_store %arg19[%c0_51, %c0_52], %89 {strides = array<i32>} : memref<2x64xf32, #tpu.memory_space<vmem>>, vector<2x32xf32>,
    %c0_53 = arith.constant 0 : index
    %c32_54 = arith.constant 32 : index
    %104 = vector.load %arg19[%c0_53, %c32_54] : memref<2x64xf32, #tpu.memory_space<vmem>>, vector<2x32xf32>
    tpu.vector_store %arg19[%c0_53, %c32_54], %99 {strides = array<i32>} : memref<2x64xf32, #tpu.memory_space<vmem>>, vector<2x32xf32>,
    %c0_55 = arith.constant 0 : index
    %c0_56 = arith.constant 0 : index
    %105 = vector.load %arg18[%c0_55, %c0_56] : memref<2x64xf32, #tpu.memory_space<vmem>>, vector<2x32xf32>
    tpu.vector_store %arg18[%c0_55, %c0_56], %92 {strides = array<i32>} : memref<2x64xf32, #tpu.memory_space<vmem>>, vector<2x32xf32>,
    %c0_57 = arith.constant 0 : index
    %c32_58 = arith.constant 32 : index
    %106 = vector.load %arg18[%c0_57, %c32_58] : memref<2x64xf32, #tpu.memory_space<vmem>>, vector<2x32xf32>
    tpu.vector_store %arg18[%c0_57, %c32_58], %102 {strides = array<i32>} : memref<2x64xf32, #tpu.memory_space<vmem>>, vector<2x32xf32>,
    %c2_i32_59 = arith.constant 2 : i32
    %107 = arith.muli %63, %c2_i32_59 : i32
    %108 = arith.index_cast %107 : i32 to index
    %c0_60 = arith.constant 0 : index
    %109 = vector.load %arg14[%108, %c0_60] : memref<16x32xf32, #tpu.memory_space<vmem>>, vector<2x32xf32>
    tpu.vector_store %arg14[%108, %c0_60], %92 {strides = array<i32>} : memref<16x32xf32, #tpu.memory_space<vmem>>, vector<2x32xf32>,
    %c2_i32_61 = arith.constant 2 : i32
    %110 = arith.muli %64, %c2_i32_61 : i32
    %111 = arith.index_cast %110 : i32 to index
    %c0_62 = arith.constant 0 : index
    %112 = vector.load %arg15[%111, %c0_62] : memref<16x32xf32, #tpu.memory_space<vmem>>, vector<2x32xf32>
    tpu.vector_store %arg15[%111, %c0_62], %102 {strides = array<i32>} : memref<16x32xf32, #tpu.memory_space<vmem>>, vector<2x32xf32>,
    %c2_i32_63 = arith.constant 2 : i32
    %c1_i32_64 = arith.constant 1 : i32
    %113 = arith.muli %c2_i32_63, %c1_i32_64 : i32
    %c0_i32_65 = arith.constant 0 : i32
    %114 = arith.addi %c0_i32_65, %113 : i32
    %c7_i32_66 = arith.constant 7 : i32
    %115 = arith.subi %c7_i32_66, %114 : i32
    %c0_67 = arith.constant 0 : index
    %c0_68 = arith.constant 0 : index
    %116 = vector.load %arg18[%c0_67, %c0_68] : memref<2x64xf32, #tpu.memory_space<vmem>>, vector<2x64xf32>
    %c0_69 = arith.constant 0 : index
    %c0_70 = arith.constant 0 : index
    %117 = vector.load %arg3[%c0_69, %c0_70] : memref<64x256xf32, #tpu.memory_space<vmem>>, vector<64x256xf32>
    %cst_71 = arith.constant dense<0.000000e+00> : vector<2x256xf32>
    %118 = tpu.matmul %116, %117, %cst_71 {dimension_numbers = #tpu.dot_dimension_numbers<[1], [0], [0], [1], [0, 0, 1, 1], [], []>} : vector<2x64xf32>, vector<64x256xf32>, vector<2x256xf32> -> vector<2x256xf32>
    %c2_i32_72 = arith.constant 2 : i32
    %119 = arith.muli %114, %c2_i32_72 : i32
    %120 = arith.index_cast %119 : i32 to index
    %c0_73 = arith.constant 0 : index
    %121 = vector.load %arg13[%120, %c0_73] : memref<16x256xf32, #tpu.memory_space<vmem>>, vector<2x128xf32>
    %c2_i32_74 = arith.constant 2 : i32
    %122 = arith.muli %115, %c2_i32_74 : i32
    %123 = arith.index_cast %122 : i32 to index
    %c128_75 = arith.constant 128 : index
    %124 = vector.load %arg13[%123, %c128_75] : memref<16x256xf32, #tpu.memory_space<vmem>>, vector<2x128xf32>
    %125 = tpu.concatenate %121, %124 in 1 : vector<2x128xf32>, vector<2x128xf32> -> vector<2x256xf32>
    %126 = arith.addf %118, %125 : vector<2x256xf32>
    %127 = arith.negf %126 : vector<2x256xf32>
    %128 = math.exp %127 : vector<2x256xf32>
    %cst_76 = arith.constant 1.000000e+00 : f32
    %129 = vector.broadcast %cst_76 : f32 to vector<2x256xf32>
    %130 = arith.addf %129, %128 : vector<2x256xf32>
    %131 = arith.divf %129, %130 : vector<2x256xf32>
    %132 = math.tanh %126 : vector<2x256xf32>
    %c0_77 = arith.constant 0 : index
    %c0_78 = arith.constant 0 : index
    %133 = vector.load %arg19[%c0_77, %c0_78] : memref<2x64xf32, #tpu.memory_space<vmem>>, vector<2x64xf32>
    %134 = vector.extract_strided_slice %131 {offsets = [0, 32], sizes = [2, 32], strides = [1, 1]} : vector<2x256xf32> to vector<2x32xf32>
    %135 = vector.extract_strided_slice %133 {offsets = [0, 0], sizes = [2, 32], strides = [1, 1]} : vector<2x64xf32> to vector<2x32xf32>
    %136 = arith.mulf %134, %135 : vector<2x32xf32>
    %137 = vector.extract_strided_slice %131 {offsets = [0, 0], sizes = [2, 32], strides = [1, 1]} : vector<2x256xf32> to vector<2x32xf32>
    %138 = vector.extract_strided_slice %132 {offsets = [0, 64], sizes = [2, 32], strides = [1, 1]} : vector<2x256xf32> to vector<2x32xf32>
    %139 = arith.mulf %137, %138 : vector<2x32xf32>
    %140 = arith.addf %136, %139 : vector<2x32xf32>
    %141 = vector.extract_strided_slice %131 {offsets = [0, 96], sizes = [2, 32], strides = [1, 1]} : vector<2x256xf32> to vector<2x32xf32>
    %142 = math.tanh %140 : vector<2x32xf32>
    %143 = arith.mulf %141, %142 : vector<2x32xf32>
    %144 = vector.extract_strided_slice %131 {offsets = [0, 160], sizes = [2, 32], strides = [1, 1]} : vector<2x256xf32> to vector<2x32xf32>
    %145 = vector.extract_strided_slice %133 {offsets = [0, 32], sizes = [2, 32], strides = [1, 1]} : vector<2x64xf32> to vector<2x32xf32>
    %146 = arith.mulf %144, %145 : vector<2x32xf32>
    %147 = vector.extract_strided_slice %131 {offsets = [0, 128], sizes = [2, 32], strides = [1, 1]} : vector<2x256xf32> to vector<2x32xf32>
    %148 = vector.extract_strided_slice %132 {offsets = [0, 192], sizes = [2, 32], strides = [1, 1]} : vector<2x256xf32> to vector<2x32xf32>
    %149 = arith.mulf %147, %148 : vector<2x32xf32>
    %150 = arith.addf %146, %149 : vector<2x32xf32>
    %151 = vector.extract_strided_slice %131 {offsets = [0, 224], sizes = [2, 32], strides = [1, 1]} : vector<2x256xf32> to vector<2x32xf32>
    %152 = math.tanh %150 : vector<2x32xf32>
    %153 = arith.mulf %151, %152 : vector<2x32xf32>
    %c0_79 = arith.constant 0 : index
    %c0_80 = arith.constant 0 : index
    %154 = vector.load %arg19[%c0_79, %c0_80] : memref<2x64xf32, #tpu.memory_space<vmem>>, vector<2x32xf32>
    tpu.vector_store %arg19[%c0_79, %c0_80], %140 {strides = array<i32>} : memref<2x64xf32, #tpu.memory_space<vmem>>, vector<2x32xf32>,
    %c0_81 = arith.constant 0 : index
    %c32_82 = arith.constant 32 : index
    %155 = vector.load %arg19[%c0_81, %c32_82] : memref<2x64xf32, #tpu.memory_space<vmem>>, vector<2x32xf32>
    tpu.vector_store %arg19[%c0_81, %c32_82], %150 {strides = array<i32>} : memref<2x64xf32, #tpu.memory_space<vmem>>, vector<2x32xf32>,
    %c0_83 = arith.constant 0 : index
    %c0_84 = arith.constant 0 : index
    %156 = vector.load %arg18[%c0_83, %c0_84] : memref<2x64xf32, #tpu.memory_space<vmem>>, vector<2x32xf32>
    tpu.vector_store %arg18[%c0_83, %c0_84], %143 {strides = array<i32>} : memref<2x64xf32, #tpu.memory_space<vmem>>, vector<2x32xf32>,
    %c0_85 = arith.constant 0 : index
    %c32_86 = arith.constant 32 : index
    %157 = vector.load %arg18[%c0_85, %c32_86] : memref<2x64xf32, #tpu.memory_space<vmem>>, vector<2x32xf32>
    tpu.vector_store %arg18[%c0_85, %c32_86], %153 {strides = array<i32>} : memref<2x64xf32, #tpu.memory_space<vmem>>, vector<2x32xf32>,
    %c2_i32_87 = arith.constant 2 : i32
    %158 = arith.muli %114, %c2_i32_87 : i32
    %159 = arith.index_cast %158 : i32 to index
    %c0_88 = arith.constant 0 : index
    %160 = vector.load %arg14[%159, %c0_88] : memref<16x32xf32, #tpu.memory_space<vmem>>, vector<2x32xf32>
    tpu.vector_store %arg14[%159, %c0_88], %143 {strides = array<i32>} : memref<16x32xf32, #tpu.memory_space<vmem>>, vector<2x32xf32>,
    %c2_i32_89 = arith.constant 2 : i32
    %161 = arith.muli %115, %c2_i32_89 : i32
    %162 = arith.index_cast %161 : i32 to index
    %c0_90 = arith.constant 0 : index
    %163 = vector.load %arg15[%162, %c0_90] : memref<16x32xf32, #tpu.memory_space<vmem>>, vector<2x32xf32>
    tpu.vector_store %arg15[%162, %c0_90], %153 {strides = array<i32>} : memref<16x32xf32, #tpu.memory_space<vmem>>, vector<2x32xf32>,
    %c3_i32 = arith.constant 3 : i32
    %c1_i32_91 = arith.constant 1 : i32
    %164 = arith.muli %c3_i32, %c1_i32_91 : i32
    %c0_i32_92 = arith.constant 0 : i32
    %165 = arith.addi %c0_i32_92, %164 : i32
    %c7_i32_93 = arith.constant 7 : i32
    %166 = arith.subi %c7_i32_93, %165 : i32
    %c0_94 = arith.constant 0 : index
    %c0_95 = arith.constant 0 : index
    %167 = vector.load %arg18[%c0_94, %c0_95] : memref<2x64xf32, #tpu.memory_space<vmem>>, vector<2x64xf32>
    %c0_96 = arith.constant 0 : index
    %c0_97 = arith.constant 0 : index
    %168 = vector.load %arg3[%c0_96, %c0_97] : memref<64x256xf32, #tpu.memory_space<vmem>>, vector<64x256xf32>
    %cst_98 = arith.constant dense<0.000000e+00> : vector<2x256xf32>
    %169 = tpu.matmul %167, %168, %cst_98 {dimension_numbers = #tpu.dot_dimension_numbers<[1], [0], [0], [1], [0, 0, 1, 1], [], []>} : vector<2x64xf32>, vector<64x256xf32>, vector<2x256xf32> -> vector<2x256xf32>
    %c2_i32_99 = arith.constant 2 : i32
    %170 = arith.muli %165, %c2_i32_99 : i32
    %171 = arith.index_cast %170 : i32 to index
    %c0_100 = arith.constant 0 : index
    %172 = vector.load %arg13[%171, %c0_100] : memref<16x256xf32, #tpu.memory_space<vmem>>, vector<2x128xf32>
    %c2_i32_101 = arith.constant 2 : i32
    %173 = arith.muli %166, %c2_i32_101 : i32
    %174 = arith.index_cast %173 : i32 to index
    %c128_102 = arith.constant 128 : index
    %175 = vector.load %arg13[%174, %c128_102] : memref<16x256xf32, #tpu.memory_space<vmem>>, vector<2x128xf32>
    %176 = tpu.concatenate %172, %175 in 1 : vector<2x128xf32>, vector<2x128xf32> -> vector<2x256xf32>
    %177 = arith.addf %169, %176 : vector<2x256xf32>
    %178 = arith.negf %177 : vector<2x256xf32>
    %179 = math.exp %178 : vector<2x256xf32>
    %cst_103 = arith.constant 1.000000e+00 : f32
    %180 = vector.broadcast %cst_103 : f32 to vector<2x256xf32>
    %181 = arith.addf %180, %179 : vector<2x256xf32>
    %182 = arith.divf %180, %181 : vector<2x256xf32>
    %183 = math.tanh %177 : vector<2x256xf32>
    %c0_104 = arith.constant 0 : index
    %c0_105 = arith.constant 0 : index
    %184 = vector.load %arg19[%c0_104, %c0_105] : memref<2x64xf32, #tpu.memory_space<vmem>>, vector<2x64xf32>
    %185 = vector.extract_strided_slice %182 {offsets = [0, 32], sizes = [2, 32], strides = [1, 1]} : vector<2x256xf32> to vector<2x32xf32>
    %186 = vector.extract_strided_slice %184 {offsets = [0, 0], sizes = [2, 32], strides = [1, 1]} : vector<2x64xf32> to vector<2x32xf32>
    %187 = arith.mulf %185, %186 : vector<2x32xf32>
    %188 = vector.extract_strided_slice %182 {offsets = [0, 0], sizes = [2, 32], strides = [1, 1]} : vector<2x256xf32> to vector<2x32xf32>
    %189 = vector.extract_strided_slice %183 {offsets = [0, 64], sizes = [2, 32], strides = [1, 1]} : vector<2x256xf32> to vector<2x32xf32>
    %190 = arith.mulf %188, %189 : vector<2x32xf32>
    %191 = arith.addf %187, %190 : vector<2x32xf32>
    %192 = vector.extract_strided_slice %182 {offsets = [0, 96], sizes = [2, 32], strides = [1, 1]} : vector<2x256xf32> to vector<2x32xf32>
    %193 = math.tanh %191 : vector<2x32xf32>
    %194 = arith.mulf %192, %193 : vector<2x32xf32>
    %195 = vector.extract_strided_slice %182 {offsets = [0, 160], sizes = [2, 32], strides = [1, 1]} : vector<2x256xf32> to vector<2x32xf32>
    %196 = vector.extract_strided_slice %184 {offsets = [0, 32], sizes = [2, 32], strides = [1, 1]} : vector<2x64xf32> to vector<2x32xf32>
    %197 = arith.mulf %195, %196 : vector<2x32xf32>
    %198 = vector.extract_strided_slice %182 {offsets = [0, 128], sizes = [2, 32], strides = [1, 1]} : vector<2x256xf32> to vector<2x32xf32>
    %199 = vector.extract_strided_slice %183 {offsets = [0, 192], sizes = [2, 32], strides = [1, 1]} : vector<2x256xf32> to vector<2x32xf32>
    %200 = arith.mulf %198, %199 : vector<2x32xf32>
    %201 = arith.addf %197, %200 : vector<2x32xf32>
    %202 = vector.extract_strided_slice %182 {offsets = [0, 224], sizes = [2, 32], strides = [1, 1]} : vector<2x256xf32> to vector<2x32xf32>
    %203 = math.tanh %201 : vector<2x32xf32>
    %204 = arith.mulf %202, %203 : vector<2x32xf32>
    %c0_106 = arith.constant 0 : index
    %c0_107 = arith.constant 0 : index
    %205 = vector.load %arg19[%c0_106, %c0_107] : memref<2x64xf32, #tpu.memory_space<vmem>>, vector<2x32xf32>
    tpu.vector_store %arg19[%c0_106, %c0_107], %191 {strides = array<i32>} : memref<2x64xf32, #tpu.memory_space<vmem>>, vector<2x32xf32>,
    %c0_108 = arith.constant 0 : index
    %c32_109 = arith.constant 32 : index
    %206 = vector.load %arg19[%c0_108, %c32_109] : memref<2x64xf32, #tpu.memory_space<vmem>>, vector<2x32xf32>
    tpu.vector_store %arg19[%c0_108, %c32_109], %201 {strides = array<i32>} : memref<2x64xf32, #tpu.memory_space<vmem>>, vector<2x32xf32>,
    %c0_110 = arith.constant 0 : index
    %c0_111 = arith.constant 0 : index
    %207 = vector.load %arg18[%c0_110, %c0_111] : memref<2x64xf32, #tpu.memory_space<vmem>>, vector<2x32xf32>
    tpu.vector_store %arg18[%c0_110, %c0_111], %194 {strides = array<i32>} : memref<2x64xf32, #tpu.memory_space<vmem>>, vector<2x32xf32>,
    %c0_112 = arith.constant 0 : index
    %c32_113 = arith.constant 32 : index
    %208 = vector.load %arg18[%c0_112, %c32_113] : memref<2x64xf32, #tpu.memory_space<vmem>>, vector<2x32xf32>
    tpu.vector_store %arg18[%c0_112, %c32_113], %204 {strides = array<i32>} : memref<2x64xf32, #tpu.memory_space<vmem>>, vector<2x32xf32>,
    %c2_i32_114 = arith.constant 2 : i32
    %209 = arith.muli %165, %c2_i32_114 : i32
    %210 = arith.index_cast %209 : i32 to index
    %c0_115 = arith.constant 0 : index
    %211 = vector.load %arg14[%210, %c0_115] : memref<16x32xf32, #tpu.memory_space<vmem>>, vector<2x32xf32>
    tpu.vector_store %arg14[%210, %c0_115], %194 {strides = array<i32>} : memref<16x32xf32, #tpu.memory_space<vmem>>, vector<2x32xf32>,
    %c2_i32_116 = arith.constant 2 : i32
    %212 = arith.muli %166, %c2_i32_116 : i32
    %213 = arith.index_cast %212 : i32 to index
    %c0_117 = arith.constant 0 : index
    %214 = vector.load %arg15[%213, %c0_117] : memref<16x32xf32, #tpu.memory_space<vmem>>, vector<2x32xf32>
    tpu.vector_store %arg15[%213, %c0_117], %204 {strides = array<i32>} : memref<16x32xf32, #tpu.memory_space<vmem>>, vector<2x32xf32>,
    %c4_i32 = arith.constant 4 : i32
    %c1_i32_118 = arith.constant 1 : i32
    %215 = arith.muli %c4_i32, %c1_i32_118 : i32
    %c0_i32_119 = arith.constant 0 : i32
    %216 = arith.addi %c0_i32_119, %215 : i32
    %c7_i32_120 = arith.constant 7 : i32
    %217 = arith.subi %c7_i32_120, %216 : i32
    %c0_121 = arith.constant 0 : index
    %c0_122 = arith.constant 0 : index
    %218 = vector.load %arg18[%c0_121, %c0_122] : memref<2x64xf32, #tpu.memory_space<vmem>>, vector<2x64xf32>
    %c0_123 = arith.constant 0 : index
    %c0_124 = arith.constant 0 : index
    %219 = vector.load %arg3[%c0_123, %c0_124] : memref<64x256xf32, #tpu.memory_space<vmem>>, vector<64x256xf32>
    %cst_125 = arith.constant dense<0.000000e+00> : vector<2x256xf32>
    %220 = tpu.matmul %218, %219, %cst_125 {dimension_numbers = #tpu.dot_dimension_numbers<[1], [0], [0], [1], [0, 0, 1, 1], [], []>} : vector<2x64xf32>, vector<64x256xf32>, vector<2x256xf32> -> vector<2x256xf32>
    %c2_i32_126 = arith.constant 2 : i32
    %221 = arith.muli %216, %c2_i32_126 : i32
    %222 = arith.index_cast %221 : i32 to index
    %c0_127 = arith.constant 0 : index
    %223 = vector.load %arg13[%222, %c0_127] : memref<16x256xf32, #tpu.memory_space<vmem>>, vector<2x128xf32>
    %c2_i32_128 = arith.constant 2 : i32
    %224 = arith.muli %217, %c2_i32_128 : i32
    %225 = arith.index_cast %224 : i32 to index
    %c128_129 = arith.constant 128 : index
    %226 = vector.load %arg13[%225, %c128_129] : memref<16x256xf32, #tpu.memory_space<vmem>>, vector<2x128xf32>
    %227 = tpu.concatenate %223, %226 in 1 : vector<2x128xf32>, vector<2x128xf32> -> vector<2x256xf32>
    %228 = arith.addf %220, %227 : vector<2x256xf32>
    %229 = arith.negf %228 : vector<2x256xf32>
    %230 = math.exp %229 : vector<2x256xf32>
    %cst_130 = arith.constant 1.000000e+00 : f32
    %231 = vector.broadcast %cst_130 : f32 to vector<2x256xf32>
    %232 = arith.addf %231, %230 : vector<2x256xf32>
    %233 = arith.divf %231, %232 : vector<2x256xf32>
    %234 = math.tanh %228 : vector<2x256xf32>
    %c0_131 = arith.constant 0 : index
    %c0_132 = arith.constant 0 : index
    %235 = vector.load %arg19[%c0_131, %c0_132] : memref<2x64xf32, #tpu.memory_space<vmem>>, vector<2x64xf32>
    %236 = vector.extract_strided_slice %233 {offsets = [0, 32], sizes = [2, 32], strides = [1, 1]} : vector<2x256xf32> to vector<2x32xf32>
    %237 = vector.extract_strided_slice %235 {offsets = [0, 0], sizes = [2, 32], strides = [1, 1]} : vector<2x64xf32> to vector<2x32xf32>
    %238 = arith.mulf %236, %237 : vector<2x32xf32>
    %239 = vector.extract_strided_slice %233 {offsets = [0, 0], sizes = [2, 32], strides = [1, 1]} : vector<2x256xf32> to vector<2x32xf32>
    %240 = vector.extract_strided_slice %234 {offsets = [0, 64], sizes = [2, 32], strides = [1, 1]} : vector<2x256xf32> to vector<2x32xf32>
    %241 = arith.mulf %239, %240 : vector<2x32xf32>
    %242 = arith.addf %238, %241 : vector<2x32xf32>
    %243 = vector.extract_strided_slice %233 {offsets = [0, 96], sizes = [2, 32], strides = [1, 1]} : vector<2x256xf32> to vector<2x32xf32>
    %244 = math.tanh %242 : vector<2x32xf32>
    %245 = arith.mulf %243, %244 : vector<2x32xf32>
    %246 = vector.extract_strided_slice %233 {offsets = [0, 160], sizes = [2, 32], strides = [1, 1]} : vector<2x256xf32> to vector<2x32xf32>
    %247 = vector.extract_strided_slice %235 {offsets = [0, 32], sizes = [2, 32], strides = [1, 1]} : vector<2x64xf32> to vector<2x32xf32>
    %248 = arith.mulf %246, %247 : vector<2x32xf32>
    %249 = vector.extract_strided_slice %233 {offsets = [0, 128], sizes = [2, 32], strides = [1, 1]} : vector<2x256xf32> to vector<2x32xf32>
    %250 = vector.extract_strided_slice %234 {offsets = [0, 192], sizes = [2, 32], strides = [1, 1]} : vector<2x256xf32> to vector<2x32xf32>
    %251 = arith.mulf %249, %250 : vector<2x32xf32>
    %252 = arith.addf %248, %251 : vector<2x32xf32>
    %253 = vector.extract_strided_slice %233 {offsets = [0, 224], sizes = [2, 32], strides = [1, 1]} : vector<2x256xf32> to vector<2x32xf32>
    %254 = math.tanh %252 : vector<2x32xf32>
    %255 = arith.mulf %253, %254 : vector<2x32xf32>
    %c0_133 = arith.constant 0 : index
    %c0_134 = arith.constant 0 : index
    %256 = vector.load %arg19[%c0_133, %c0_134] : memref<2x64xf32, #tpu.memory_space<vmem>>, vector<2x32xf32>
    tpu.vector_store %arg19[%c0_133, %c0_134], %242 {strides = array<i32>} : memref<2x64xf32, #tpu.memory_space<vmem>>, vector<2x32xf32>,
    %c0_135 = arith.constant 0 : index
    %c32_136 = arith.constant 32 : index
    %257 = vector.load %arg19[%c0_135, %c32_136] : memref<2x64xf32, #tpu.memory_space<vmem>>, vector<2x32xf32>
    tpu.vector_store %arg19[%c0_135, %c32_136], %252 {strides = array<i32>} : memref<2x64xf32, #tpu.memory_space<vmem>>, vector<2x32xf32>,
    %c0_137 = arith.constant 0 : index
    %c0_138 = arith.constant 0 : index
    %258 = vector.load %arg18[%c0_137, %c0_138] : memref<2x64xf32, #tpu.memory_space<vmem>>, vector<2x32xf32>
    tpu.vector_store %arg18[%c0_137, %c0_138], %245 {strides = array<i32>} : memref<2x64xf32, #tpu.memory_space<vmem>>, vector<2x32xf32>,
    %c0_139 = arith.constant 0 : index
    %c32_140 = arith.constant 32 : index
    %259 = vector.load %arg18[%c0_139, %c32_140] : memref<2x64xf32, #tpu.memory_space<vmem>>, vector<2x32xf32>
    tpu.vector_store %arg18[%c0_139, %c32_140], %255 {strides = array<i32>} : memref<2x64xf32, #tpu.memory_space<vmem>>, vector<2x32xf32>,
    %c2_i32_141 = arith.constant 2 : i32
    %260 = arith.muli %216, %c2_i32_141 : i32
    %261 = arith.index_cast %260 : i32 to index
    %c0_142 = arith.constant 0 : index
    %262 = vector.load %arg14[%261, %c0_142] : memref<16x32xf32, #tpu.memory_space<vmem>>, vector<2x32xf32>
    tpu.vector_store %arg14[%261, %c0_142], %245 {strides = array<i32>} : memref<16x32xf32, #tpu.memory_space<vmem>>, vector<2x32xf32>,
    %c2_i32_143 = arith.constant 2 : i32
    %263 = arith.muli %217, %c2_i32_143 : i32
    %264 = arith.index_cast %263 : i32 to index
    %c0_144 = arith.constant 0 : index
    %265 = vector.load %arg15[%264, %c0_144] : memref<16x32xf32, #tpu.memory_space<vmem>>, vector<2x32xf32>
    tpu.vector_store %arg15[%264, %c0_144], %255 {strides = array<i32>} : memref<16x32xf32, #tpu.memory_space<vmem>>, vector<2x32xf32>,
    %c5_i32 = arith.constant 5 : i32
    %c1_i32_145 = arith.constant 1 : i32
    %266 = arith.muli %c5_i32, %c1_i32_145 : i32
    %c0_i32_146 = arith.constant 0 : i32
    %267 = arith.addi %c0_i32_146, %266 : i32
    %c7_i32_147 = arith.constant 7 : i32
    %268 = arith.subi %c7_i32_147, %267 : i32
    %c0_148 = arith.constant 0 : index
    %c0_149 = arith.constant 0 : index
    %269 = vector.load %arg18[%c0_148, %c0_149] : memref<2x64xf32, #tpu.memory_space<vmem>>, vector<2x64xf32>
    %c0_150 = arith.constant 0 : index
    %c0_151 = arith.constant 0 : index
    %270 = vector.load %arg3[%c0_150, %c0_151] : memref<64x256xf32, #tpu.memory_space<vmem>>, vector<64x256xf32>
    %cst_152 = arith.constant dense<0.000000e+00> : vector<2x256xf32>
    %271 = tpu.matmul %269, %270, %cst_152 {dimension_numbers = #tpu.dot_dimension_numbers<[1], [0], [0], [1], [0, 0, 1, 1], [], []>} : vector<2x64xf32>, vector<64x256xf32>, vector<2x256xf32> -> vector<2x256xf32>
    %c2_i32_153 = arith.constant 2 : i32
    %272 = arith.muli %267, %c2_i32_153 : i32
    %273 = arith.index_cast %272 : i32 to index
    %c0_154 = arith.constant 0 : index
    %274 = vector.load %arg13[%273, %c0_154] : memref<16x256xf32, #tpu.memory_space<vmem>>, vector<2x128xf32>
    %c2_i32_155 = arith.constant 2 : i32
    %275 = arith.muli %268, %c2_i32_155 : i32
    %276 = arith.index_cast %275 : i32 to index
    %c128_156 = arith.constant 128 : index
    %277 = vector.load %arg13[%276, %c128_156] : memref<16x256xf32, #tpu.memory_space<vmem>>, vector<2x128xf32>
    %278 = tpu.concatenate %274, %277 in 1 : vector<2x128xf32>, vector<2x128xf32> -> vector<2x256xf32>
    %279 = arith.addf %271, %278 : vector<2x256xf32>
    %280 = arith.negf %279 : vector<2x256xf32>
    %281 = math.exp %280 : vector<2x256xf32>
    %cst_157 = arith.constant 1.000000e+00 : f32
    %282 = vector.broadcast %cst_157 : f32 to vector<2x256xf32>
    %283 = arith.addf %282, %281 : vector<2x256xf32>
    %284 = arith.divf %282, %283 : vector<2x256xf32>
    %285 = math.tanh %279 : vector<2x256xf32>
    %c0_158 = arith.constant 0 : index
    %c0_159 = arith.constant 0 : index
    %286 = vector.load %arg19[%c0_158, %c0_159] : memref<2x64xf32, #tpu.memory_space<vmem>>, vector<2x64xf32>
    %287 = vector.extract_strided_slice %284 {offsets = [0, 32], sizes = [2, 32], strides = [1, 1]} : vector<2x256xf32> to vector<2x32xf32>
    %288 = vector.extract_strided_slice %286 {offsets = [0, 0], sizes = [2, 32], strides = [1, 1]} : vector<2x64xf32> to vector<2x32xf32>
    %289 = arith.mulf %287, %288 : vector<2x32xf32>
    %290 = vector.extract_strided_slice %284 {offsets = [0, 0], sizes = [2, 32], strides = [1, 1]} : vector<2x256xf32> to vector<2x32xf32>
    %291 = vector.extract_strided_slice %285 {offsets = [0, 64], sizes = [2, 32], strides = [1, 1]} : vector<2x256xf32> to vector<2x32xf32>
    %292 = arith.mulf %290, %291 : vector<2x32xf32>
    %293 = arith.addf %289, %292 : vector<2x32xf32>
    %294 = vector.extract_strided_slice %284 {offsets = [0, 96], sizes = [2, 32], strides = [1, 1]} : vector<2x256xf32> to vector<2x32xf32>
    %295 = math.tanh %293 : vector<2x32xf32>
    %296 = arith.mulf %294, %295 : vector<2x32xf32>
    %297 = vector.extract_strided_slice %284 {offsets = [0, 160], sizes = [2, 32], strides = [1, 1]} : vector<2x256xf32> to vector<2x32xf32>
    %298 = vector.extract_strided_slice %286 {offsets = [0, 32], sizes = [2, 32], strides = [1, 1]} : vector<2x64xf32> to vector<2x32xf32>
    %299 = arith.mulf %297, %298 : vector<2x32xf32>
    %300 = vector.extract_strided_slice %284 {offsets = [0, 128], sizes = [2, 32], strides = [1, 1]} : vector<2x256xf32> to vector<2x32xf32>
    %301 = vector.extract_strided_slice %285 {offsets = [0, 192], sizes = [2, 32], strides = [1, 1]} : vector<2x256xf32> to vector<2x32xf32>
    %302 = arith.mulf %300, %301 : vector<2x32xf32>
    %303 = arith.addf %299, %302 : vector<2x32xf32>
    %304 = vector.extract_strided_slice %284 {offsets = [0, 224], sizes = [2, 32], strides = [1, 1]} : vector<2x256xf32> to vector<2x32xf32>
    %305 = math.tanh %303 : vector<2x32xf32>
    %306 = arith.mulf %304, %305 : vector<2x32xf32>
    %c0_160 = arith.constant 0 : index
    %c0_161 = arith.constant 0 : index
    %307 = vector.load %arg19[%c0_160, %c0_161] : memref<2x64xf32, #tpu.memory_space<vmem>>, vector<2x32xf32>
    tpu.vector_store %arg19[%c0_160, %c0_161], %293 {strides = array<i32>} : memref<2x64xf32, #tpu.memory_space<vmem>>, vector<2x32xf32>,
    %c0_162 = arith.constant 0 : index
    %c32_163 = arith.constant 32 : index
    %308 = vector.load %arg19[%c0_162, %c32_163] : memref<2x64xf32, #tpu.memory_space<vmem>>, vector<2x32xf32>
    tpu.vector_store %arg19[%c0_162, %c32_163], %303 {strides = array<i32>} : memref<2x64xf32, #tpu.memory_space<vmem>>, vector<2x32xf32>,
    %c0_164 = arith.constant 0 : index
    %c0_165 = arith.constant 0 : index
    %309 = vector.load %arg18[%c0_164, %c0_165] : memref<2x64xf32, #tpu.memory_space<vmem>>, vector<2x32xf32>
    tpu.vector_store %arg18[%c0_164, %c0_165], %296 {strides = array<i32>} : memref<2x64xf32, #tpu.memory_space<vmem>>, vector<2x32xf32>,
    %c0_166 = arith.constant 0 : index
    %c32_167 = arith.constant 32 : index
    %310 = vector.load %arg18[%c0_166, %c32_167] : memref<2x64xf32, #tpu.memory_space<vmem>>, vector<2x32xf32>
    tpu.vector_store %arg18[%c0_166, %c32_167], %306 {strides = array<i32>} : memref<2x64xf32, #tpu.memory_space<vmem>>, vector<2x32xf32>,
    %c2_i32_168 = arith.constant 2 : i32
    %311 = arith.muli %267, %c2_i32_168 : i32
    %312 = arith.index_cast %311 : i32 to index
    %c0_169 = arith.constant 0 : index
    %313 = vector.load %arg14[%312, %c0_169] : memref<16x32xf32, #tpu.memory_space<vmem>>, vector<2x32xf32>
    tpu.vector_store %arg14[%312, %c0_169], %296 {strides = array<i32>} : memref<16x32xf32, #tpu.memory_space<vmem>>, vector<2x32xf32>,
    %c2_i32_170 = arith.constant 2 : i32
    %314 = arith.muli %268, %c2_i32_170 : i32
    %315 = arith.index_cast %314 : i32 to index
    %c0_171 = arith.constant 0 : index
    %316 = vector.load %arg15[%315, %c0_171] : memref<16x32xf32, #tpu.memory_space<vmem>>, vector<2x32xf32>
    tpu.vector_store %arg15[%315, %c0_171], %306 {strides = array<i32>} : memref<16x32xf32, #tpu.memory_space<vmem>>, vector<2x32xf32>,
    %c6_i32 = arith.constant 6 : i32
    %c1_i32_172 = arith.constant 1 : i32
    %317 = arith.muli %c6_i32, %c1_i32_172 : i32
    %c0_i32_173 = arith.constant 0 : i32
    %318 = arith.addi %c0_i32_173, %317 : i32
    %c7_i32_174 = arith.constant 7 : i32
    %319 = arith.subi %c7_i32_174, %318 : i32
    %c0_175 = arith.constant 0 : index
    %c0_176 = arith.constant 0 : index
    %320 = vector.load %arg18[%c0_175, %c0_176] : memref<2x64xf32, #tpu.memory_space<vmem>>, vector<2x64xf32>
    %c0_177 = arith.constant 0 : index
    %c0_178 = arith.constant 0 : index
    %321 = vector.load %arg3[%c0_177, %c0_178] : memref<64x256xf32, #tpu.memory_space<vmem>>, vector<64x256xf32>
    %cst_179 = arith.constant dense<0.000000e+00> : vector<2x256xf32>
    %322 = tpu.matmul %320, %321, %cst_179 {dimension_numbers = #tpu.dot_dimension_numbers<[1], [0], [0], [1], [0, 0, 1, 1], [], []>} : vector<2x64xf32>, vector<64x256xf32>, vector<2x256xf32> -> vector<2x256xf32>
    %c2_i32_180 = arith.constant 2 : i32
    %323 = arith.muli %318, %c2_i32_180 : i32
    %324 = arith.index_cast %323 : i32 to index
    %c0_181 = arith.constant 0 : index
    %325 = vector.load %arg13[%324, %c0_181] : memref<16x256xf32, #tpu.memory_space<vmem>>, vector<2x128xf32>
    %c2_i32_182 = arith.constant 2 : i32
    %326 = arith.muli %319, %c2_i32_182 : i32
    %327 = arith.index_cast %326 : i32 to index
    %c128_183 = arith.constant 128 : index
    %328 = vector.load %arg13[%327, %c128_183] : memref<16x256xf32, #tpu.memory_space<vmem>>, vector<2x128xf32>
    %329 = tpu.concatenate %325, %328 in 1 : vector<2x128xf32>, vector<2x128xf32> -> vector<2x256xf32>
    %330 = arith.addf %322, %329 : vector<2x256xf32>
    %331 = arith.negf %330 : vector<2x256xf32>
    %332 = math.exp %331 : vector<2x256xf32>
    %cst_184 = arith.constant 1.000000e+00 : f32
    %333 = vector.broadcast %cst_184 : f32 to vector<2x256xf32>
    %334 = arith.addf %333, %332 : vector<2x256xf32>
    %335 = arith.divf %333, %334 : vector<2x256xf32>
    %336 = math.tanh %330 : vector<2x256xf32>
    %c0_185 = arith.constant 0 : index
    %c0_186 = arith.constant 0 : index
    %337 = vector.load %arg19[%c0_185, %c0_186] : memref<2x64xf32, #tpu.memory_space<vmem>>, vector<2x64xf32>
    %338 = vector.extract_strided_slice %335 {offsets = [0, 32], sizes = [2, 32], strides = [1, 1]} : vector<2x256xf32> to vector<2x32xf32>
    %339 = vector.extract_strided_slice %337 {offsets = [0, 0], sizes = [2, 32], strides = [1, 1]} : vector<2x64xf32> to vector<2x32xf32>
    %340 = arith.mulf %338, %339 : vector<2x32xf32>
    %341 = vector.extract_strided_slice %335 {offsets = [0, 0], sizes = [2, 32], strides = [1, 1]} : vector<2x256xf32> to vector<2x32xf32>
    %342 = vector.extract_strided_slice %336 {offsets = [0, 64], sizes = [2, 32], strides = [1, 1]} : vector<2x256xf32> to vector<2x32xf32>
    %343 = arith.mulf %341, %342 : vector<2x32xf32>
    %344 = arith.addf %340, %343 : vector<2x32xf32>
    %345 = vector.extract_strided_slice %335 {offsets = [0, 96], sizes = [2, 32], strides = [1, 1]} : vector<2x256xf32> to vector<2x32xf32>
    %346 = math.tanh %344 : vector<2x32xf32>
    %347 = arith.mulf %345, %346 : vector<2x32xf32>
    %348 = vector.extract_strided_slice %335 {offsets = [0, 160], sizes = [2, 32], strides = [1, 1]} : vector<2x256xf32> to vector<2x32xf32>
    %349 = vector.extract_strided_slice %337 {offsets = [0, 32], sizes = [2, 32], strides = [1, 1]} : vector<2x64xf32> to vector<2x32xf32>
    %350 = arith.mulf %348, %349 : vector<2x32xf32>
    %351 = vector.extract_strided_slice %335 {offsets = [0, 128], sizes = [2, 32], strides = [1, 1]} : vector<2x256xf32> to vector<2x32xf32>
    %352 = vector.extract_strided_slice %336 {offsets = [0, 192], sizes = [2, 32], strides = [1, 1]} : vector<2x256xf32> to vector<2x32xf32>
    %353 = arith.mulf %351, %352 : vector<2x32xf32>
    %354 = arith.addf %350, %353 : vector<2x32xf32>
    %355 = vector.extract_strided_slice %335 {offsets = [0, 224], sizes = [2, 32], strides = [1, 1]} : vector<2x256xf32> to vector<2x32xf32>
    %356 = math.tanh %354 : vector<2x32xf32>
    %357 = arith.mulf %355, %356 : vector<2x32xf32>
    %c0_187 = arith.constant 0 : index
    %c0_188 = arith.constant 0 : index
    %358 = vector.load %arg19[%c0_187, %c0_188] : memref<2x64xf32, #tpu.memory_space<vmem>>, vector<2x32xf32>
    tpu.vector_store %arg19[%c0_187, %c0_188], %344 {strides = array<i32>} : memref<2x64xf32, #tpu.memory_space<vmem>>, vector<2x32xf32>,
    %c0_189 = arith.constant 0 : index
    %c32_190 = arith.constant 32 : index
    %359 = vector.load %arg19[%c0_189, %c32_190] : memref<2x64xf32, #tpu.memory_space<vmem>>, vector<2x32xf32>
    tpu.vector_store %arg19[%c0_189, %c32_190], %354 {strides = array<i32>} : memref<2x64xf32, #tpu.memory_space<vmem>>, vector<2x32xf32>,
    %c0_191 = arith.constant 0 : index
    %c0_192 = arith.constant 0 : index
    %360 = vector.load %arg18[%c0_191, %c0_192] : memref<2x64xf32, #tpu.memory_space<vmem>>, vector<2x32xf32>
    tpu.vector_store %arg18[%c0_191, %c0_192], %347 {strides = array<i32>} : memref<2x64xf32, #tpu.memory_space<vmem>>, vector<2x32xf32>,
    %c0_193 = arith.constant 0 : index
    %c32_194 = arith.constant 32 : index
    %361 = vector.load %arg18[%c0_193, %c32_194] : memref<2x64xf32, #tpu.memory_space<vmem>>, vector<2x32xf32>
    tpu.vector_store %arg18[%c0_193, %c32_194], %357 {strides = array<i32>} : memref<2x64xf32, #tpu.memory_space<vmem>>, vector<2x32xf32>,
    %c2_i32_195 = arith.constant 2 : i32
    %362 = arith.muli %318, %c2_i32_195 : i32
    %363 = arith.index_cast %362 : i32 to index
    %c0_196 = arith.constant 0 : index
    %364 = vector.load %arg14[%363, %c0_196] : memref<16x32xf32, #tpu.memory_space<vmem>>, vector<2x32xf32>
    tpu.vector_store %arg14[%363, %c0_196], %347 {strides = array<i32>} : memref<16x32xf32, #tpu.memory_space<vmem>>, vector<2x32xf32>,
    %c2_i32_197 = arith.constant 2 : i32
    %365 = arith.muli %319, %c2_i32_197 : i32
    %366 = arith.index_cast %365 : i32 to index
    %c0_198 = arith.constant 0 : index
    %367 = vector.load %arg15[%366, %c0_198] : memref<16x32xf32, #tpu.memory_space<vmem>>, vector<2x32xf32>
    tpu.vector_store %arg15[%366, %c0_198], %357 {strides = array<i32>} : memref<16x32xf32, #tpu.memory_space<vmem>>, vector<2x32xf32>,
    %c7_i32_199 = arith.constant 7 : i32
    %c1_i32_200 = arith.constant 1 : i32
    %368 = arith.muli %c7_i32_199, %c1_i32_200 : i32
    %c0_i32_201 = arith.constant 0 : i32
    %369 = arith.addi %c0_i32_201, %368 : i32
    %c7_i32_202 = arith.constant 7 : i32
    %370 = arith.subi %c7_i32_202, %369 : i32
    %c0_203 = arith.constant 0 : index
    %c0_204 = arith.constant 0 : index
    %371 = vector.load %arg18[%c0_203, %c0_204] : memref<2x64xf32, #tpu.memory_space<vmem>>, vector<2x64xf32>
    %c0_205 = arith.constant 0 : index
    %c0_206 = arith.constant 0 : index
    %372 = vector.load %arg3[%c0_205, %c0_206] : memref<64x256xf32, #tpu.memory_space<vmem>>, vector<64x256xf32>
    %cst_207 = arith.constant dense<0.000000e+00> : vector<2x256xf32>
    %373 = tpu.matmul %371, %372, %cst_207 {dimension_numbers = #tpu.dot_dimension_numbers<[1], [0], [0], [1], [0, 0, 1, 1], [], []>} : vector<2x64xf32>, vector<64x256xf32>, vector<2x256xf32> -> vector<2x256xf32>
    %c2_i32_208 = arith.constant 2 : i32
    %374 = arith.muli %369, %c2_i32_208 : i32
    %375 = arith.index_cast %374 : i32 to index
    %c0_209 = arith.constant 0 : index
    %376 = vector.load %arg13[%375, %c0_209] : memref<16x256xf32, #tpu.memory_space<vmem>>, vector<2x128xf32>
    %c2_i32_210 = arith.constant 2 : i32
    %377 = arith.muli %370, %c2_i32_210 : i32
    %378 = arith.index_cast %377 : i32 to index
    %c128_211 = arith.constant 128 : index
    %379 = vector.load %arg13[%378, %c128_211] : memref<16x256xf32, #tpu.memory_space<vmem>>, vector<2x128xf32>
    %380 = tpu.concatenate %376, %379 in 1 : vector<2x128xf32>, vector<2x128xf32> -> vector<2x256xf32>
    %381 = arith.addf %373, %380 : vector<2x256xf32>
    %382 = arith.negf %381 : vector<2x256xf32>
    %383 = math.exp %382 : vector<2x256xf32>
    %cst_212 = arith.constant 1.000000e+00 : f32
    %384 = vector.broadcast %cst_212 : f32 to vector<2x256xf32>
    %385 = arith.addf %384, %383 : vector<2x256xf32>
    %386 = arith.divf %384, %385 : vector<2x256xf32>
    %387 = math.tanh %381 : vector<2x256xf32>
    %c0_213 = arith.constant 0 : index
    %c0_214 = arith.constant 0 : index
    %388 = vector.load %arg19[%c0_213, %c0_214] : memref<2x64xf32, #tpu.memory_space<vmem>>, vector<2x64xf32>
    %389 = vector.extract_strided_slice %386 {offsets = [0, 32], sizes = [2, 32], strides = [1, 1]} : vector<2x256xf32> to vector<2x32xf32>
    %390 = vector.extract_strided_slice %388 {offsets = [0, 0], sizes = [2, 32], strides = [1, 1]} : vector<2x64xf32> to vector<2x32xf32>
    %391 = arith.mulf %389, %390 : vector<2x32xf32>
    %392 = vector.extract_strided_slice %386 {offsets = [0, 0], sizes = [2, 32], strides = [1, 1]} : vector<2x256xf32> to vector<2x32xf32>
    %393 = vector.extract_strided_slice %387 {offsets = [0, 64], sizes = [2, 32], strides = [1, 1]} : vector<2x256xf32> to vector<2x32xf32>
    %394 = arith.mulf %392, %393 : vector<2x32xf32>
    %395 = arith.addf %391, %394 : vector<2x32xf32>
    %396 = vector.extract_strided_slice %386 {offsets = [0, 96], sizes = [2, 32], strides = [1, 1]} : vector<2x256xf32> to vector<2x32xf32>
    %397 = math.tanh %395 : vector<2x32xf32>
    %398 = arith.mulf %396, %397 : vector<2x32xf32>
    %399 = vector.extract_strided_slice %386 {offsets = [0, 160], sizes = [2, 32], strides = [1, 1]} : vector<2x256xf32> to vector<2x32xf32>
    %400 = vector.extract_strided_slice %388 {offsets = [0, 32], sizes = [2, 32], strides = [1, 1]} : vector<2x64xf32> to vector<2x32xf32>
    %401 = arith.mulf %399, %400 : vector<2x32xf32>
    %402 = vector.extract_strided_slice %386 {offsets = [0, 128], sizes = [2, 32], strides = [1, 1]} : vector<2x256xf32> to vector<2x32xf32>
    %403 = vector.extract_strided_slice %387 {offsets = [0, 192], sizes = [2, 32], strides = [1, 1]} : vector<2x256xf32> to vector<2x32xf32>
    %404 = arith.mulf %402, %403 : vector<2x32xf32>
    %405 = arith.addf %401, %404 : vector<2x32xf32>
    %406 = vector.extract_strided_slice %386 {offsets = [0, 224], sizes = [2, 32], strides = [1, 1]} : vector<2x256xf32> to vector<2x32xf32>
    %407 = math.tanh %405 : vector<2x32xf32>
    %408 = arith.mulf %406, %407 : vector<2x32xf32>
    %c0_215 = arith.constant 0 : index
    %c0_216 = arith.constant 0 : index
    %409 = vector.load %arg19[%c0_215, %c0_216] : memref<2x64xf32, #tpu.memory_space<vmem>>, vector<2x32xf32>
    tpu.vector_store %arg19[%c0_215, %c0_216], %395 {strides = array<i32>} : memref<2x64xf32, #tpu.memory_space<vmem>>, vector<2x32xf32>,
    %c0_217 = arith.constant 0 : index
    %c32_218 = arith.constant 32 : index
    %410 = vector.load %arg19[%c0_217, %c32_218] : memref<2x64xf32, #tpu.memory_space<vmem>>, vector<2x32xf32>
    tpu.vector_store %arg19[%c0_217, %c32_218], %405 {strides = array<i32>} : memref<2x64xf32, #tpu.memory_space<vmem>>, vector<2x32xf32>,
    %c0_219 = arith.constant 0 : index
    %c0_220 = arith.constant 0 : index
    %411 = vector.load %arg18[%c0_219, %c0_220] : memref<2x64xf32, #tpu.memory_space<vmem>>, vector<2x32xf32>
    tpu.vector_store %arg18[%c0_219, %c0_220], %398 {strides = array<i32>} : memref<2x64xf32, #tpu.memory_space<vmem>>, vector<2x32xf32>,
    %c0_221 = arith.constant 0 : index
    %c32_222 = arith.constant 32 : index
    %412 = vector.load %arg18[%c0_221, %c32_222] : memref<2x64xf32, #tpu.memory_space<vmem>>, vector<2x32xf32>
    tpu.vector_store %arg18[%c0_221, %c32_222], %408 {strides = array<i32>} : memref<2x64xf32, #tpu.memory_space<vmem>>, vector<2x32xf32>,
    %c2_i32_223 = arith.constant 2 : i32
    %413 = arith.muli %369, %c2_i32_223 : i32
    %414 = arith.index_cast %413 : i32 to index
    %c0_224 = arith.constant 0 : index
    %415 = vector.load %arg14[%414, %c0_224] : memref<16x32xf32, #tpu.memory_space<vmem>>, vector<2x32xf32>
    tpu.vector_store %arg14[%414, %c0_224], %398 {strides = array<i32>} : memref<16x32xf32, #tpu.memory_space<vmem>>, vector<2x32xf32>,
    %c2_i32_225 = arith.constant 2 : i32
    %416 = arith.muli %370, %c2_i32_225 : i32
    %417 = arith.index_cast %416 : i32 to index
    %c0_226 = arith.constant 0 : index
    %418 = vector.load %arg15[%417, %c0_226] : memref<16x32xf32, #tpu.memory_space<vmem>>, vector<2x32xf32>
    tpu.vector_store %arg15[%417, %c0_226], %408 {strides = array<i32>} : memref<16x32xf32, #tpu.memory_space<vmem>>, vector<2x32xf32>,
    %c8_i32 = arith.constant 8 : i32
    %c0_227 = arith.constant 0 : index
    %c0_228 = arith.constant 0 : index
    %419 = vector.load %arg14[%c0_227, %c0_228] : memref<16x32xf32, #tpu.memory_space<vmem>>, vector<16x32xf32>
    %c0_229 = arith.constant 0 : index
    %c0_230 = arith.constant 0 : index
    %420 = vector.load %arg15[%c0_229, %c0_230] : memref<16x32xf32, #tpu.memory_space<vmem>>, vector<16x32xf32>
    %421 = tpu.concatenate %419, %420 in 1 : vector<16x32xf32>, vector<16x32xf32> -> vector<16x64xf32>
    %c0_231 = arith.constant 0 : index
    %c0_232 = arith.constant 0 : index
    %422 = vector.load %arg5[%c0_231, %c0_232] : memref<64x256xf32, #tpu.memory_space<vmem>>, vector<64x256xf32>
    %cst_233 = arith.constant dense<0.000000e+00> : vector<16x256xf32>
    %423 = tpu.matmul %421, %422, %cst_233 {dimension_numbers = #tpu.dot_dimension_numbers<[1], [0], [0], [1], [0, 0, 1, 1], [], []>} : vector<16x64xf32>, vector<64x256xf32>, vector<16x256xf32> -> vector<16x256xf32>
    %c0_234 = arith.constant 0 : index
    %c0_235 = arith.constant 0 : index
    %424 = vector.load %arg7[%c0_234, %c0_235] : memref<1x256xf32, #tpu.memory_space<vmem>>, vector<1x256xf32>
    %425 = vector.broadcast %424 : vector<1x256xf32> to vector<16x256xf32>
    %426 = arith.addf %423, %425 : vector<16x256xf32>
    %c0_236 = arith.constant 0 : index
    %c0_237 = arith.constant 0 : index
    %427 = vector.load %arg13[%c0_236, %c0_237] : memref<16x256xf32, #tpu.memory_space<vmem>>, vector<16x256xf32>
    tpu.vector_store %arg13[%c0_236, %c0_237], %426 {strides = array<i32>} : memref<16x256xf32, #tpu.memory_space<vmem>>, vector<16x256xf32>,
    %cst_238 = arith.constant 0.000000e+00 : f32
    %428 = vector.broadcast %cst_238 : f32 to vector<2x64xf32>
    %c0_239 = arith.constant 0 : index
    %c0_240 = arith.constant 0 : index
    %429 = vector.load %arg18[%c0_239, %c0_240] : memref<2x64xf32, #tpu.memory_space<vmem>>, vector<2x64xf32>
    tpu.vector_store %arg18[%c0_239, %c0_240], %428 {strides = array<i32>} : memref<2x64xf32, #tpu.memory_space<vmem>>, vector<2x64xf32>,
    %cst_241 = arith.constant 0.000000e+00 : f32
    %430 = vector.broadcast %cst_241 : f32 to vector<2x64xf32>
    %c0_242 = arith.constant 0 : index
    %c0_243 = arith.constant 0 : index
    %431 = vector.load %arg19[%c0_242, %c0_243] : memref<2x64xf32, #tpu.memory_space<vmem>>, vector<2x64xf32>
    tpu.vector_store %arg19[%c0_242, %c0_243], %430 {strides = array<i32>} : memref<2x64xf32, #tpu.memory_space<vmem>>, vector<2x64xf32>,
    %c0_i32_244 = arith.constant 0 : i32
    %c1_i32_245 = arith.constant 1 : i32
    %432 = arith.muli %c0_i32_244, %c1_i32_245 : i32
    %c0_i32_246 = arith.constant 0 : i32
    %433 = arith.addi %c0_i32_246, %432 : i32
    %c7_i32_247 = arith.constant 7 : i32
    %434 = arith.subi %c7_i32_247, %433 : i32
    %c0_248 = arith.constant 0 : index
    %c0_249 = arith.constant 0 : index
    %435 = vector.load %arg18[%c0_248, %c0_249] : memref<2x64xf32, #tpu.memory_space<vmem>>, vector<2x64xf32>
    %c0_250 = arith.constant 0 : index
    %c0_251 = arith.constant 0 : index
    %436 = vector.load %arg6[%c0_250, %c0_251] : memref<64x256xf32, #tpu.memory_space<vmem>>, vector<64x256xf32>
    %cst_252 = arith.constant dense<0.000000e+00> : vector<2x256xf32>
    %437 = tpu.matmul %435, %436, %cst_252 {dimension_numbers = #tpu.dot_dimension_numbers<[1], [0], [0], [1], [0, 0, 1, 1], [], []>} : vector<2x64xf32>, vector<64x256xf32>, vector<2x256xf32> -> vector<2x256xf32>
    %c2_i32_253 = arith.constant 2 : i32
    %438 = arith.muli %433, %c2_i32_253 : i32
    %439 = arith.index_cast %438 : i32 to index
    %c0_254 = arith.constant 0 : index
    %440 = vector.load %arg13[%439, %c0_254] : memref<16x256xf32, #tpu.memory_space<vmem>>, vector<2x128xf32>
    %c2_i32_255 = arith.constant 2 : i32
    %441 = arith.muli %434, %c2_i32_255 : i32
    %442 = arith.index_cast %441 : i32 to index
    %c128_256 = arith.constant 128 : index
    %443 = vector.load %arg13[%442, %c128_256] : memref<16x256xf32, #tpu.memory_space<vmem>>, vector<2x128xf32>
    %444 = tpu.concatenate %440, %443 in 1 : vector<2x128xf32>, vector<2x128xf32> -> vector<2x256xf32>
    %445 = arith.addf %437, %444 : vector<2x256xf32>
    %446 = arith.negf %445 : vector<2x256xf32>
    %447 = math.exp %446 : vector<2x256xf32>
    %cst_257 = arith.constant 1.000000e+00 : f32
    %448 = vector.broadcast %cst_257 : f32 to vector<2x256xf32>
    %449 = arith.addf %448, %447 : vector<2x256xf32>
    %450 = arith.divf %448, %449 : vector<2x256xf32>
    %451 = math.tanh %445 : vector<2x256xf32>
    %c0_258 = arith.constant 0 : index
    %c0_259 = arith.constant 0 : index
    %452 = vector.load %arg19[%c0_258, %c0_259] : memref<2x64xf32, #tpu.memory_space<vmem>>, vector<2x64xf32>
    %453 = vector.extract_strided_slice %450 {offsets = [0, 32], sizes = [2, 32], strides = [1, 1]} : vector<2x256xf32> to vector<2x32xf32>
    %454 = vector.extract_strided_slice %452 {offsets = [0, 0], sizes = [2, 32], strides = [1, 1]} : vector<2x64xf32> to vector<2x32xf32>
    %455 = arith.mulf %453, %454 : vector<2x32xf32>
    %456 = vector.extract_strided_slice %450 {offsets = [0, 0], sizes = [2, 32], strides = [1, 1]} : vector<2x256xf32> to vector<2x32xf32>
    %457 = vector.extract_strided_slice %451 {offsets = [0, 64], sizes = [2, 32], strides = [1, 1]} : vector<2x256xf32> to vector<2x32xf32>
    %458 = arith.mulf %456, %457 : vector<2x32xf32>
    %459 = arith.addf %455, %458 : vector<2x32xf32>
    %460 = vector.extract_strided_slice %450 {offsets = [0, 96], sizes = [2, 32], strides = [1, 1]} : vector<2x256xf32> to vector<2x32xf32>
    %461 = math.tanh %459 : vector<2x32xf32>
    %462 = arith.mulf %460, %461 : vector<2x32xf32>
    %463 = vector.extract_strided_slice %450 {offsets = [0, 160], sizes = [2, 32], strides = [1, 1]} : vector<2x256xf32> to vector<2x32xf32>
    %464 = vector.extract_strided_slice %452 {offsets = [0, 32], sizes = [2, 32], strides = [1, 1]} : vector<2x64xf32> to vector<2x32xf32>
    %465 = arith.mulf %463, %464 : vector<2x32xf32>
    %466 = vector.extract_strided_slice %450 {offsets = [0, 128], sizes = [2, 32], strides = [1, 1]} : vector<2x256xf32> to vector<2x32xf32>
    %467 = vector.extract_strided_slice %451 {offsets = [0, 192], sizes = [2, 32], strides = [1, 1]} : vector<2x256xf32> to vector<2x32xf32>
    %468 = arith.mulf %466, %467 : vector<2x32xf32>
    %469 = arith.addf %465, %468 : vector<2x32xf32>
    %470 = vector.extract_strided_slice %450 {offsets = [0, 224], sizes = [2, 32], strides = [1, 1]} : vector<2x256xf32> to vector<2x32xf32>
    %471 = math.tanh %469 : vector<2x32xf32>
    %472 = arith.mulf %470, %471 : vector<2x32xf32>
    %c0_260 = arith.constant 0 : index
    %c0_261 = arith.constant 0 : index
    %473 = vector.load %arg19[%c0_260, %c0_261] : memref<2x64xf32, #tpu.memory_space<vmem>>, vector<2x32xf32>
    tpu.vector_store %arg19[%c0_260, %c0_261], %459 {strides = array<i32>} : memref<2x64xf32, #tpu.memory_space<vmem>>, vector<2x32xf32>,
    %c0_262 = arith.constant 0 : index
    %c32_263 = arith.constant 32 : index
    %474 = vector.load %arg19[%c0_262, %c32_263] : memref<2x64xf32, #tpu.memory_space<vmem>>, vector<2x32xf32>
    tpu.vector_store %arg19[%c0_262, %c32_263], %469 {strides = array<i32>} : memref<2x64xf32, #tpu.memory_space<vmem>>, vector<2x32xf32>,
    %c0_264 = arith.constant 0 : index
    %c0_265 = arith.constant 0 : index
    %475 = vector.load %arg18[%c0_264, %c0_265] : memref<2x64xf32, #tpu.memory_space<vmem>>, vector<2x32xf32>
    tpu.vector_store %arg18[%c0_264, %c0_265], %462 {strides = array<i32>} : memref<2x64xf32, #tpu.memory_space<vmem>>, vector<2x32xf32>,
    %c0_266 = arith.constant 0 : index
    %c32_267 = arith.constant 32 : index
    %476 = vector.load %arg18[%c0_266, %c32_267] : memref<2x64xf32, #tpu.memory_space<vmem>>, vector<2x32xf32>
    tpu.vector_store %arg18[%c0_266, %c32_267], %472 {strides = array<i32>} : memref<2x64xf32, #tpu.memory_space<vmem>>, vector<2x32xf32>,
    %c2_i32_268 = arith.constant 2 : i32
    %477 = arith.muli %433, %c2_i32_268 : i32
    %478 = arith.index_cast %477 : i32 to index
    %c0_269 = arith.constant 0 : index
    %479 = vector.load %arg16[%478, %c0_269] : memref<16x32xf32, #tpu.memory_space<vmem>>, vector<2x32xf32>
    tpu.vector_store %arg16[%478, %c0_269], %462 {strides = array<i32>} : memref<16x32xf32, #tpu.memory_space<vmem>>, vector<2x32xf32>,
    %c2_i32_270 = arith.constant 2 : i32
    %480 = arith.muli %434, %c2_i32_270 : i32
    %481 = arith.index_cast %480 : i32 to index
    %c0_271 = arith.constant 0 : index
    %482 = vector.load %arg17[%481, %c0_271] : memref<16x32xf32, #tpu.memory_space<vmem>>, vector<2x32xf32>
    tpu.vector_store %arg17[%481, %c0_271], %472 {strides = array<i32>} : memref<16x32xf32, #tpu.memory_space<vmem>>, vector<2x32xf32>,
    %c1_i32_272 = arith.constant 1 : i32
    %c1_i32_273 = arith.constant 1 : i32
    %483 = arith.muli %c1_i32_272, %c1_i32_273 : i32
    %c0_i32_274 = arith.constant 0 : i32
    %484 = arith.addi %c0_i32_274, %483 : i32
    %c7_i32_275 = arith.constant 7 : i32
    %485 = arith.subi %c7_i32_275, %484 : i32
    %c0_276 = arith.constant 0 : index
    %c0_277 = arith.constant 0 : index
    %486 = vector.load %arg18[%c0_276, %c0_277] : memref<2x64xf32, #tpu.memory_space<vmem>>, vector<2x64xf32>
    %c0_278 = arith.constant 0 : index
    %c0_279 = arith.constant 0 : index
    %487 = vector.load %arg6[%c0_278, %c0_279] : memref<64x256xf32, #tpu.memory_space<vmem>>, vector<64x256xf32>
    %cst_280 = arith.constant dense<0.000000e+00> : vector<2x256xf32>
    %488 = tpu.matmul %486, %487, %cst_280 {dimension_numbers = #tpu.dot_dimension_numbers<[1], [0], [0], [1], [0, 0, 1, 1], [], []>} : vector<2x64xf32>, vector<64x256xf32>, vector<2x256xf32> -> vector<2x256xf32>
    %c2_i32_281 = arith.constant 2 : i32
    %489 = arith.muli %484, %c2_i32_281 : i32
    %490 = arith.index_cast %489 : i32 to index
    %c0_282 = arith.constant 0 : index
    %491 = vector.load %arg13[%490, %c0_282] : memref<16x256xf32, #tpu.memory_space<vmem>>, vector<2x128xf32>
    %c2_i32_283 = arith.constant 2 : i32
    %492 = arith.muli %485, %c2_i32_283 : i32
    %493 = arith.index_cast %492 : i32 to index
    %c128_284 = arith.constant 128 : index
    %494 = vector.load %arg13[%493, %c128_284] : memref<16x256xf32, #tpu.memory_space<vmem>>, vector<2x128xf32>
    %495 = tpu.concatenate %491, %494 in 1 : vector<2x128xf32>, vector<2x128xf32> -> vector<2x256xf32>
    %496 = arith.addf %488, %495 : vector<2x256xf32>
    %497 = arith.negf %496 : vector<2x256xf32>
    %498 = math.exp %497 : vector<2x256xf32>
    %cst_285 = arith.constant 1.000000e+00 : f32
    %499 = vector.broadcast %cst_285 : f32 to vector<2x256xf32>
    %500 = arith.addf %499, %498 : vector<2x256xf32>
    %501 = arith.divf %499, %500 : vector<2x256xf32>
    %502 = math.tanh %496 : vector<2x256xf32>
    %c0_286 = arith.constant 0 : index
    %c0_287 = arith.constant 0 : index
    %503 = vector.load %arg19[%c0_286, %c0_287] : memref<2x64xf32, #tpu.memory_space<vmem>>, vector<2x64xf32>
    %504 = vector.extract_strided_slice %501 {offsets = [0, 32], sizes = [2, 32], strides = [1, 1]} : vector<2x256xf32> to vector<2x32xf32>
    %505 = vector.extract_strided_slice %503 {offsets = [0, 0], sizes = [2, 32], strides = [1, 1]} : vector<2x64xf32> to vector<2x32xf32>
    %506 = arith.mulf %504, %505 : vector<2x32xf32>
    %507 = vector.extract_strided_slice %501 {offsets = [0, 0], sizes = [2, 32], strides = [1, 1]} : vector<2x256xf32> to vector<2x32xf32>
    %508 = vector.extract_strided_slice %502 {offsets = [0, 64], sizes = [2, 32], strides = [1, 1]} : vector<2x256xf32> to vector<2x32xf32>
    %509 = arith.mulf %507, %508 : vector<2x32xf32>
    %510 = arith.addf %506, %509 : vector<2x32xf32>
    %511 = vector.extract_strided_slice %501 {offsets = [0, 96], sizes = [2, 32], strides = [1, 1]} : vector<2x256xf32> to vector<2x32xf32>
    %512 = math.tanh %510 : vector<2x32xf32>
    %513 = arith.mulf %511, %512 : vector<2x32xf32>
    %514 = vector.extract_strided_slice %501 {offsets = [0, 160], sizes = [2, 32], strides = [1, 1]} : vector<2x256xf32> to vector<2x32xf32>
    %515 = vector.extract_strided_slice %503 {offsets = [0, 32], sizes = [2, 32], strides = [1, 1]} : vector<2x64xf32> to vector<2x32xf32>
    %516 = arith.mulf %514, %515 : vector<2x32xf32>
    %517 = vector.extract_strided_slice %501 {offsets = [0, 128], sizes = [2, 32], strides = [1, 1]} : vector<2x256xf32> to vector<2x32xf32>
    %518 = vector.extract_strided_slice %502 {offsets = [0, 192], sizes = [2, 32], strides = [1, 1]} : vector<2x256xf32> to vector<2x32xf32>
    %519 = arith.mulf %517, %518 : vector<2x32xf32>
    %520 = arith.addf %516, %519 : vector<2x32xf32>
    %521 = vector.extract_strided_slice %501 {offsets = [0, 224], sizes = [2, 32], strides = [1, 1]} : vector<2x256xf32> to vector<2x32xf32>
    %522 = math.tanh %520 : vector<2x32xf32>
    %523 = arith.mulf %521, %522 : vector<2x32xf32>
    %c0_288 = arith.constant 0 : index
    %c0_289 = arith.constant 0 : index
    %524 = vector.load %arg19[%c0_288, %c0_289] : memref<2x64xf32, #tpu.memory_space<vmem>>, vector<2x32xf32>
    tpu.vector_store %arg19[%c0_288, %c0_289], %510 {strides = array<i32>} : memref<2x64xf32, #tpu.memory_space<vmem>>, vector<2x32xf32>,
    %c0_290 = arith.constant 0 : index
    %c32_291 = arith.constant 32 : index
    %525 = vector.load %arg19[%c0_290, %c32_291] : memref<2x64xf32, #tpu.memory_space<vmem>>, vector<2x32xf32>
    tpu.vector_store %arg19[%c0_290, %c32_291], %520 {strides = array<i32>} : memref<2x64xf32, #tpu.memory_space<vmem>>, vector<2x32xf32>,
    %c0_292 = arith.constant 0 : index
    %c0_293 = arith.constant 0 : index
    %526 = vector.load %arg18[%c0_292, %c0_293] : memref<2x64xf32, #tpu.memory_space<vmem>>, vector<2x32xf32>
    tpu.vector_store %arg18[%c0_292, %c0_293], %513 {strides = array<i32>} : memref<2x64xf32, #tpu.memory_space<vmem>>, vector<2x32xf32>,
    %c0_294 = arith.constant 0 : index
    %c32_295 = arith.constant 32 : index
    %527 = vector.load %arg18[%c0_294, %c32_295] : memref<2x64xf32, #tpu.memory_space<vmem>>, vector<2x32xf32>
    tpu.vector_store %arg18[%c0_294, %c32_295], %523 {strides = array<i32>} : memref<2x64xf32, #tpu.memory_space<vmem>>, vector<2x32xf32>,
    %c2_i32_296 = arith.constant 2 : i32
    %528 = arith.muli %484, %c2_i32_296 : i32
    %529 = arith.index_cast %528 : i32 to index
    %c0_297 = arith.constant 0 : index
    %530 = vector.load %arg16[%529, %c0_297] : memref<16x32xf32, #tpu.memory_space<vmem>>, vector<2x32xf32>
    tpu.vector_store %arg16[%529, %c0_297], %513 {strides = array<i32>} : memref<16x32xf32, #tpu.memory_space<vmem>>, vector<2x32xf32>,
    %c2_i32_298 = arith.constant 2 : i32
    %531 = arith.muli %485, %c2_i32_298 : i32
    %532 = arith.index_cast %531 : i32 to index
    %c0_299 = arith.constant 0 : index
    %533 = vector.load %arg17[%532, %c0_299] : memref<16x32xf32, #tpu.memory_space<vmem>>, vector<2x32xf32>
    tpu.vector_store %arg17[%532, %c0_299], %523 {strides = array<i32>} : memref<16x32xf32, #tpu.memory_space<vmem>>, vector<2x32xf32>,
    %c2_i32_300 = arith.constant 2 : i32
    %c1_i32_301 = arith.constant 1 : i32
    %534 = arith.muli %c2_i32_300, %c1_i32_301 : i32
    %c0_i32_302 = arith.constant 0 : i32
    %535 = arith.addi %c0_i32_302, %534 : i32
    %c7_i32_303 = arith.constant 7 : i32
    %536 = arith.subi %c7_i32_303, %535 : i32
    %c0_304 = arith.constant 0 : index
    %c0_305 = arith.constant 0 : index
    %537 = vector.load %arg18[%c0_304, %c0_305] : memref<2x64xf32, #tpu.memory_space<vmem>>, vector<2x64xf32>
    %c0_306 = arith.constant 0 : index
    %c0_307 = arith.constant 0 : index
    %538 = vector.load %arg6[%c0_306, %c0_307] : memref<64x256xf32, #tpu.memory_space<vmem>>, vector<64x256xf32>
    %cst_308 = arith.constant dense<0.000000e+00> : vector<2x256xf32>
    %539 = tpu.matmul %537, %538, %cst_308 {dimension_numbers = #tpu.dot_dimension_numbers<[1], [0], [0], [1], [0, 0, 1, 1], [], []>} : vector<2x64xf32>, vector<64x256xf32>, vector<2x256xf32> -> vector<2x256xf32>
    %c2_i32_309 = arith.constant 2 : i32
    %540 = arith.muli %535, %c2_i32_309 : i32
    %541 = arith.index_cast %540 : i32 to index
    %c0_310 = arith.constant 0 : index
    %542 = vector.load %arg13[%541, %c0_310] : memref<16x256xf32, #tpu.memory_space<vmem>>, vector<2x128xf32>
    %c2_i32_311 = arith.constant 2 : i32
    %543 = arith.muli %536, %c2_i32_311 : i32
    %544 = arith.index_cast %543 : i32 to index
    %c128_312 = arith.constant 128 : index
    %545 = vector.load %arg13[%544, %c128_312] : memref<16x256xf32, #tpu.memory_space<vmem>>, vector<2x128xf32>
    %546 = tpu.concatenate %542, %545 in 1 : vector<2x128xf32>, vector<2x128xf32> -> vector<2x256xf32>
    %547 = arith.addf %539, %546 : vector<2x256xf32>
    %548 = arith.negf %547 : vector<2x256xf32>
    %549 = math.exp %548 : vector<2x256xf32>
    %cst_313 = arith.constant 1.000000e+00 : f32
    %550 = vector.broadcast %cst_313 : f32 to vector<2x256xf32>
    %551 = arith.addf %550, %549 : vector<2x256xf32>
    %552 = arith.divf %550, %551 : vector<2x256xf32>
    %553 = math.tanh %547 : vector<2x256xf32>
    %c0_314 = arith.constant 0 : index
    %c0_315 = arith.constant 0 : index
    %554 = vector.load %arg19[%c0_314, %c0_315] : memref<2x64xf32, #tpu.memory_space<vmem>>, vector<2x64xf32>
    %555 = vector.extract_strided_slice %552 {offsets = [0, 32], sizes = [2, 32], strides = [1, 1]} : vector<2x256xf32> to vector<2x32xf32>
    %556 = vector.extract_strided_slice %554 {offsets = [0, 0], sizes = [2, 32], strides = [1, 1]} : vector<2x64xf32> to vector<2x32xf32>
    %557 = arith.mulf %555, %556 : vector<2x32xf32>
    %558 = vector.extract_strided_slice %552 {offsets = [0, 0], sizes = [2, 32], strides = [1, 1]} : vector<2x256xf32> to vector<2x32xf32>
    %559 = vector.extract_strided_slice %553 {offsets = [0, 64], sizes = [2, 32], strides = [1, 1]} : vector<2x256xf32> to vector<2x32xf32>
    %560 = arith.mulf %558, %559 : vector<2x32xf32>
    %561 = arith.addf %557, %560 : vector<2x32xf32>
    %562 = vector.extract_strided_slice %552 {offsets = [0, 96], sizes = [2, 32], strides = [1, 1]} : vector<2x256xf32> to vector<2x32xf32>
    %563 = math.tanh %561 : vector<2x32xf32>
    %564 = arith.mulf %562, %563 : vector<2x32xf32>
    %565 = vector.extract_strided_slice %552 {offsets = [0, 160], sizes = [2, 32], strides = [1, 1]} : vector<2x256xf32> to vector<2x32xf32>
    %566 = vector.extract_strided_slice %554 {offsets = [0, 32], sizes = [2, 32], strides = [1, 1]} : vector<2x64xf32> to vector<2x32xf32>
    %567 = arith.mulf %565, %566 : vector<2x32xf32>
    %568 = vector.extract_strided_slice %552 {offsets = [0, 128], sizes = [2, 32], strides = [1, 1]} : vector<2x256xf32> to vector<2x32xf32>
    %569 = vector.extract_strided_slice %553 {offsets = [0, 192], sizes = [2, 32], strides = [1, 1]} : vector<2x256xf32> to vector<2x32xf32>
    %570 = arith.mulf %568, %569 : vector<2x32xf32>
    %571 = arith.addf %567, %570 : vector<2x32xf32>
    %572 = vector.extract_strided_slice %552 {offsets = [0, 224], sizes = [2, 32], strides = [1, 1]} : vector<2x256xf32> to vector<2x32xf32>
    %573 = math.tanh %571 : vector<2x32xf32>
    %574 = arith.mulf %572, %573 : vector<2x32xf32>
    %c0_316 = arith.constant 0 : index
    %c0_317 = arith.constant 0 : index
    %575 = vector.load %arg19[%c0_316, %c0_317] : memref<2x64xf32, #tpu.memory_space<vmem>>, vector<2x32xf32>
    tpu.vector_store %arg19[%c0_316, %c0_317], %561 {strides = array<i32>} : memref<2x64xf32, #tpu.memory_space<vmem>>, vector<2x32xf32>,
    %c0_318 = arith.constant 0 : index
    %c32_319 = arith.constant 32 : index
    %576 = vector.load %arg19[%c0_318, %c32_319] : memref<2x64xf32, #tpu.memory_space<vmem>>, vector<2x32xf32>
    tpu.vector_store %arg19[%c0_318, %c32_319], %571 {strides = array<i32>} : memref<2x64xf32, #tpu.memory_space<vmem>>, vector<2x32xf32>,
    %c0_320 = arith.constant 0 : index
    %c0_321 = arith.constant 0 : index
    %577 = vector.load %arg18[%c0_320, %c0_321] : memref<2x64xf32, #tpu.memory_space<vmem>>, vector<2x32xf32>
    tpu.vector_store %arg18[%c0_320, %c0_321], %564 {strides = array<i32>} : memref<2x64xf32, #tpu.memory_space<vmem>>, vector<2x32xf32>,
    %c0_322 = arith.constant 0 : index
    %c32_323 = arith.constant 32 : index
    %578 = vector.load %arg18[%c0_322, %c32_323] : memref<2x64xf32, #tpu.memory_space<vmem>>, vector<2x32xf32>
    tpu.vector_store %arg18[%c0_322, %c32_323], %574 {strides = array<i32>} : memref<2x64xf32, #tpu.memory_space<vmem>>, vector<2x32xf32>,
    %c2_i32_324 = arith.constant 2 : i32
    %579 = arith.muli %535, %c2_i32_324 : i32
    %580 = arith.index_cast %579 : i32 to index
    %c0_325 = arith.constant 0 : index
    %581 = vector.load %arg16[%580, %c0_325] : memref<16x32xf32, #tpu.memory_space<vmem>>, vector<2x32xf32>
    tpu.vector_store %arg16[%580, %c0_325], %564 {strides = array<i32>} : memref<16x32xf32, #tpu.memory_space<vmem>>, vector<2x32xf32>,
    %c2_i32_326 = arith.constant 2 : i32
    %582 = arith.muli %536, %c2_i32_326 : i32
    %583 = arith.index_cast %582 : i32 to index
    %c0_327 = arith.constant 0 : index
    %584 = vector.load %arg17[%583, %c0_327] : memref<16x32xf32, #tpu.memory_space<vmem>>, vector<2x32xf32>
    tpu.vector_store %arg17[%583, %c0_327], %574 {strides = array<i32>} : memref<16x32xf32, #tpu.memory_space<vmem>>, vector<2x32xf32>,
    %c3_i32_328 = arith.constant 3 : i32
    %c1_i32_329 = arith.constant 1 : i32
    %585 = arith.muli %c3_i32_328, %c1_i32_329 : i32
    %c0_i32_330 = arith.constant 0 : i32
    %586 = arith.addi %c0_i32_330, %585 : i32
    %c7_i32_331 = arith.constant 7 : i32
    %587 = arith.subi %c7_i32_331, %586 : i32
    %c0_332 = arith.constant 0 : index
    %c0_333 = arith.constant 0 : index
    %588 = vector.load %arg18[%c0_332, %c0_333] : memref<2x64xf32, #tpu.memory_space<vmem>>, vector<2x64xf32>
    %c0_334 = arith.constant 0 : index
    %c0_335 = arith.constant 0 : index
    %589 = vector.load %arg6[%c0_334, %c0_335] : memref<64x256xf32, #tpu.memory_space<vmem>>, vector<64x256xf32>
    %cst_336 = arith.constant dense<0.000000e+00> : vector<2x256xf32>
    %590 = tpu.matmul %588, %589, %cst_336 {dimension_numbers = #tpu.dot_dimension_numbers<[1], [0], [0], [1], [0, 0, 1, 1], [], []>} : vector<2x64xf32>, vector<64x256xf32>, vector<2x256xf32> -> vector<2x256xf32>
    %c2_i32_337 = arith.constant 2 : i32
    %591 = arith.muli %586, %c2_i32_337 : i32
    %592 = arith.index_cast %591 : i32 to index
    %c0_338 = arith.constant 0 : index
    %593 = vector.load %arg13[%592, %c0_338] : memref<16x256xf32, #tpu.memory_space<vmem>>, vector<2x128xf32>
    %c2_i32_339 = arith.constant 2 : i32
    %594 = arith.muli %587, %c2_i32_339 : i32
    %595 = arith.index_cast %594 : i32 to index
    %c128_340 = arith.constant 128 : index
    %596 = vector.load %arg13[%595, %c128_340] : memref<16x256xf32, #tpu.memory_space<vmem>>, vector<2x128xf32>
    %597 = tpu.concatenate %593, %596 in 1 : vector<2x128xf32>, vector<2x128xf32> -> vector<2x256xf32>
    %598 = arith.addf %590, %597 : vector<2x256xf32>
    %599 = arith.negf %598 : vector<2x256xf32>
    %600 = math.exp %599 : vector<2x256xf32>
    %cst_341 = arith.constant 1.000000e+00 : f32
    %601 = vector.broadcast %cst_341 : f32 to vector<2x256xf32>
    %602 = arith.addf %601, %600 : vector<2x256xf32>
    %603 = arith.divf %601, %602 : vector<2x256xf32>
    %604 = math.tanh %598 : vector<2x256xf32>
    %c0_342 = arith.constant 0 : index
    %c0_343 = arith.constant 0 : index
    %605 = vector.load %arg19[%c0_342, %c0_343] : memref<2x64xf32, #tpu.memory_space<vmem>>, vector<2x64xf32>
    %606 = vector.extract_strided_slice %603 {offsets = [0, 32], sizes = [2, 32], strides = [1, 1]} : vector<2x256xf32> to vector<2x32xf32>
    %607 = vector.extract_strided_slice %605 {offsets = [0, 0], sizes = [2, 32], strides = [1, 1]} : vector<2x64xf32> to vector<2x32xf32>
    %608 = arith.mulf %606, %607 : vector<2x32xf32>
    %609 = vector.extract_strided_slice %603 {offsets = [0, 0], sizes = [2, 32], strides = [1, 1]} : vector<2x256xf32> to vector<2x32xf32>
    %610 = vector.extract_strided_slice %604 {offsets = [0, 64], sizes = [2, 32], strides = [1, 1]} : vector<2x256xf32> to vector<2x32xf32>
    %611 = arith.mulf %609, %610 : vector<2x32xf32>
    %612 = arith.addf %608, %611 : vector<2x32xf32>
    %613 = vector.extract_strided_slice %603 {offsets = [0, 96], sizes = [2, 32], strides = [1, 1]} : vector<2x256xf32> to vector<2x32xf32>
    %614 = math.tanh %612 : vector<2x32xf32>
    %615 = arith.mulf %613, %614 : vector<2x32xf32>
    %616 = vector.extract_strided_slice %603 {offsets = [0, 160], sizes = [2, 32], strides = [1, 1]} : vector<2x256xf32> to vector<2x32xf32>
    %617 = vector.extract_strided_slice %605 {offsets = [0, 32], sizes = [2, 32], strides = [1, 1]} : vector<2x64xf32> to vector<2x32xf32>
    %618 = arith.mulf %616, %617 : vector<2x32xf32>
    %619 = vector.extract_strided_slice %603 {offsets = [0, 128], sizes = [2, 32], strides = [1, 1]} : vector<2x256xf32> to vector<2x32xf32>
    %620 = vector.extract_strided_slice %604 {offsets = [0, 192], sizes = [2, 32], strides = [1, 1]} : vector<2x256xf32> to vector<2x32xf32>
    %621 = arith.mulf %619, %620 : vector<2x32xf32>
    %622 = arith.addf %618, %621 : vector<2x32xf32>
    %623 = vector.extract_strided_slice %603 {offsets = [0, 224], sizes = [2, 32], strides = [1, 1]} : vector<2x256xf32> to vector<2x32xf32>
    %624 = math.tanh %622 : vector<2x32xf32>
    %625 = arith.mulf %623, %624 : vector<2x32xf32>
    %c0_344 = arith.constant 0 : index
    %c0_345 = arith.constant 0 : index
    %626 = vector.load %arg19[%c0_344, %c0_345] : memref<2x64xf32, #tpu.memory_space<vmem>>, vector<2x32xf32>
    tpu.vector_store %arg19[%c0_344, %c0_345], %612 {strides = array<i32>} : memref<2x64xf32, #tpu.memory_space<vmem>>, vector<2x32xf32>,
    %c0_346 = arith.constant 0 : index
    %c32_347 = arith.constant 32 : index
    %627 = vector.load %arg19[%c0_346, %c32_347] : memref<2x64xf32, #tpu.memory_space<vmem>>, vector<2x32xf32>
    tpu.vector_store %arg19[%c0_346, %c32_347], %622 {strides = array<i32>} : memref<2x64xf32, #tpu.memory_space<vmem>>, vector<2x32xf32>,
    %c0_348 = arith.constant 0 : index
    %c0_349 = arith.constant 0 : index
    %628 = vector.load %arg18[%c0_348, %c0_349] : memref<2x64xf32, #tpu.memory_space<vmem>>, vector<2x32xf32>
    tpu.vector_store %arg18[%c0_348, %c0_349], %615 {strides = array<i32>} : memref<2x64xf32, #tpu.memory_space<vmem>>, vector<2x32xf32>,
    %c0_350 = arith.constant 0 : index
    %c32_351 = arith.constant 32 : index
    %629 = vector.load %arg18[%c0_350, %c32_351] : memref<2x64xf32, #tpu.memory_space<vmem>>, vector<2x32xf32>
    tpu.vector_store %arg18[%c0_350, %c32_351], %625 {strides = array<i32>} : memref<2x64xf32, #tpu.memory_space<vmem>>, vector<2x32xf32>,
    %c2_i32_352 = arith.constant 2 : i32
    %630 = arith.muli %586, %c2_i32_352 : i32
    %631 = arith.index_cast %630 : i32 to index
    %c0_353 = arith.constant 0 : index
    %632 = vector.load %arg16[%631, %c0_353] : memref<16x32xf32, #tpu.memory_space<vmem>>, vector<2x32xf32>
    tpu.vector_store %arg16[%631, %c0_353], %615 {strides = array<i32>} : memref<16x32xf32, #tpu.memory_space<vmem>>, vector<2x32xf32>,
    %c2_i32_354 = arith.constant 2 : i32
    %633 = arith.muli %587, %c2_i32_354 : i32
    %634 = arith.index_cast %633 : i32 to index
    %c0_355 = arith.constant 0 : index
    %635 = vector.load %arg17[%634, %c0_355] : memref<16x32xf32, #tpu.memory_space<vmem>>, vector<2x32xf32>
    tpu.vector_store %arg17[%634, %c0_355], %625 {strides = array<i32>} : memref<16x32xf32, #tpu.memory_space<vmem>>, vector<2x32xf32>,
    %c4_i32_356 = arith.constant 4 : i32
    %c1_i32_357 = arith.constant 1 : i32
    %636 = arith.muli %c4_i32_356, %c1_i32_357 : i32
    %c0_i32_358 = arith.constant 0 : i32
    %637 = arith.addi %c0_i32_358, %636 : i32
    %c7_i32_359 = arith.constant 7 : i32
    %638 = arith.subi %c7_i32_359, %637 : i32
    %c0_360 = arith.constant 0 : index
    %c0_361 = arith.constant 0 : index
    %639 = vector.load %arg18[%c0_360, %c0_361] : memref<2x64xf32, #tpu.memory_space<vmem>>, vector<2x64xf32>
    %c0_362 = arith.constant 0 : index
    %c0_363 = arith.constant 0 : index
    %640 = vector.load %arg6[%c0_362, %c0_363] : memref<64x256xf32, #tpu.memory_space<vmem>>, vector<64x256xf32>
    %cst_364 = arith.constant dense<0.000000e+00> : vector<2x256xf32>
    %641 = tpu.matmul %639, %640, %cst_364 {dimension_numbers = #tpu.dot_dimension_numbers<[1], [0], [0], [1], [0, 0, 1, 1], [], []>} : vector<2x64xf32>, vector<64x256xf32>, vector<2x256xf32> -> vector<2x256xf32>
    %c2_i32_365 = arith.constant 2 : i32
    %642 = arith.muli %637, %c2_i32_365 : i32
    %643 = arith.index_cast %642 : i32 to index
    %c0_366 = arith.constant 0 : index
    %644 = vector.load %arg13[%643, %c0_366] : memref<16x256xf32, #tpu.memory_space<vmem>>, vector<2x128xf32>
    %c2_i32_367 = arith.constant 2 : i32
    %645 = arith.muli %638, %c2_i32_367 : i32
    %646 = arith.index_cast %645 : i32 to index
    %c128_368 = arith.constant 128 : index
    %647 = vector.load %arg13[%646, %c128_368] : memref<16x256xf32, #tpu.memory_space<vmem>>, vector<2x128xf32>
    %648 = tpu.concatenate %644, %647 in 1 : vector<2x128xf32>, vector<2x128xf32> -> vector<2x256xf32>
    %649 = arith.addf %641, %648 : vector<2x256xf32>
    %650 = arith.negf %649 : vector<2x256xf32>
    %651 = math.exp %650 : vector<2x256xf32>
    %cst_369 = arith.constant 1.000000e+00 : f32
    %652 = vector.broadcast %cst_369 : f32 to vector<2x256xf32>
    %653 = arith.addf %652, %651 : vector<2x256xf32>
    %654 = arith.divf %652, %653 : vector<2x256xf32>
    %655 = math.tanh %649 : vector<2x256xf32>
    %c0_370 = arith.constant 0 : index
    %c0_371 = arith.constant 0 : index
    %656 = vector.load %arg19[%c0_370, %c0_371] : memref<2x64xf32, #tpu.memory_space<vmem>>, vector<2x64xf32>
    %657 = vector.extract_strided_slice %654 {offsets = [0, 32], sizes = [2, 32], strides = [1, 1]} : vector<2x256xf32> to vector<2x32xf32>
    %658 = vector.extract_strided_slice %656 {offsets = [0, 0], sizes = [2, 32], strides = [1, 1]} : vector<2x64xf32> to vector<2x32xf32>
    %659 = arith.mulf %657, %658 : vector<2x32xf32>
    %660 = vector.extract_strided_slice %654 {offsets = [0, 0], sizes = [2, 32], strides = [1, 1]} : vector<2x256xf32> to vector<2x32xf32>
    %661 = vector.extract_strided_slice %655 {offsets = [0, 64], sizes = [2, 32], strides = [1, 1]} : vector<2x256xf32> to vector<2x32xf32>
    %662 = arith.mulf %660, %661 : vector<2x32xf32>
    %663 = arith.addf %659, %662 : vector<2x32xf32>
    %664 = vector.extract_strided_slice %654 {offsets = [0, 96], sizes = [2, 32], strides = [1, 1]} : vector<2x256xf32> to vector<2x32xf32>
    %665 = math.tanh %663 : vector<2x32xf32>
    %666 = arith.mulf %664, %665 : vector<2x32xf32>
    %667 = vector.extract_strided_slice %654 {offsets = [0, 160], sizes = [2, 32], strides = [1, 1]} : vector<2x256xf32> to vector<2x32xf32>
    %668 = vector.extract_strided_slice %656 {offsets = [0, 32], sizes = [2, 32], strides = [1, 1]} : vector<2x64xf32> to vector<2x32xf32>
    %669 = arith.mulf %667, %668 : vector<2x32xf32>
    %670 = vector.extract_strided_slice %654 {offsets = [0, 128], sizes = [2, 32], strides = [1, 1]} : vector<2x256xf32> to vector<2x32xf32>
    %671 = vector.extract_strided_slice %655 {offsets = [0, 192], sizes = [2, 32], strides = [1, 1]} : vector<2x256xf32> to vector<2x32xf32>
    %672 = arith.mulf %670, %671 : vector<2x32xf32>
    %673 = arith.addf %669, %672 : vector<2x32xf32>
    %674 = vector.extract_strided_slice %654 {offsets = [0, 224], sizes = [2, 32], strides = [1, 1]} : vector<2x256xf32> to vector<2x32xf32>
    %675 = math.tanh %673 : vector<2x32xf32>
    %676 = arith.mulf %674, %675 : vector<2x32xf32>
    %c0_372 = arith.constant 0 : index
    %c0_373 = arith.constant 0 : index
    %677 = vector.load %arg19[%c0_372, %c0_373] : memref<2x64xf32, #tpu.memory_space<vmem>>, vector<2x32xf32>
    tpu.vector_store %arg19[%c0_372, %c0_373], %663 {strides = array<i32>} : memref<2x64xf32, #tpu.memory_space<vmem>>, vector<2x32xf32>,
    %c0_374 = arith.constant 0 : index
    %c32_375 = arith.constant 32 : index
    %678 = vector.load %arg19[%c0_374, %c32_375] : memref<2x64xf32, #tpu.memory_space<vmem>>, vector<2x32xf32>
    tpu.vector_store %arg19[%c0_374, %c32_375], %673 {strides = array<i32>} : memref<2x64xf32, #tpu.memory_space<vmem>>, vector<2x32xf32>,
    %c0_376 = arith.constant 0 : index
    %c0_377 = arith.constant 0 : index
    %679 = vector.load %arg18[%c0_376, %c0_377] : memref<2x64xf32, #tpu.memory_space<vmem>>, vector<2x32xf32>
    tpu.vector_store %arg18[%c0_376, %c0_377], %666 {strides = array<i32>} : memref<2x64xf32, #tpu.memory_space<vmem>>, vector<2x32xf32>,
    %c0_378 = arith.constant 0 : index
    %c32_379 = arith.constant 32 : index
    %680 = vector.load %arg18[%c0_378, %c32_379] : memref<2x64xf32, #tpu.memory_space<vmem>>, vector<2x32xf32>
    tpu.vector_store %arg18[%c0_378, %c32_379], %676 {strides = array<i32>} : memref<2x64xf32, #tpu.memory_space<vmem>>, vector<2x32xf32>,
    %c2_i32_380 = arith.constant 2 : i32
    %681 = arith.muli %637, %c2_i32_380 : i32
    %682 = arith.index_cast %681 : i32 to index
    %c0_381 = arith.constant 0 : index
    %683 = vector.load %arg16[%682, %c0_381] : memref<16x32xf32, #tpu.memory_space<vmem>>, vector<2x32xf32>
    tpu.vector_store %arg16[%682, %c0_381], %666 {strides = array<i32>} : memref<16x32xf32, #tpu.memory_space<vmem>>, vector<2x32xf32>,
    %c2_i32_382 = arith.constant 2 : i32
    %684 = arith.muli %638, %c2_i32_382 : i32
    %685 = arith.index_cast %684 : i32 to index
    %c0_383 = arith.constant 0 : index
    %686 = vector.load %arg17[%685, %c0_383] : memref<16x32xf32, #tpu.memory_space<vmem>>, vector<2x32xf32>
    tpu.vector_store %arg17[%685, %c0_383], %676 {strides = array<i32>} : memref<16x32xf32, #tpu.memory_space<vmem>>, vector<2x32xf32>,
    %c5_i32_384 = arith.constant 5 : i32
    %c1_i32_385 = arith.constant 1 : i32
    %687 = arith.muli %c5_i32_384, %c1_i32_385 : i32
    %c0_i32_386 = arith.constant 0 : i32
    %688 = arith.addi %c0_i32_386, %687 : i32
    %c7_i32_387 = arith.constant 7 : i32
    %689 = arith.subi %c7_i32_387, %688 : i32
    %c0_388 = arith.constant 0 : index
    %c0_389 = arith.constant 0 : index
    %690 = vector.load %arg18[%c0_388, %c0_389] : memref<2x64xf32, #tpu.memory_space<vmem>>, vector<2x64xf32>
    %c0_390 = arith.constant 0 : index
    %c0_391 = arith.constant 0 : index
    %691 = vector.load %arg6[%c0_390, %c0_391] : memref<64x256xf32, #tpu.memory_space<vmem>>, vector<64x256xf32>
    %cst_392 = arith.constant dense<0.000000e+00> : vector<2x256xf32>
    %692 = tpu.matmul %690, %691, %cst_392 {dimension_numbers = #tpu.dot_dimension_numbers<[1], [0], [0], [1], [0, 0, 1, 1], [], []>} : vector<2x64xf32>, vector<64x256xf32>, vector<2x256xf32> -> vector<2x256xf32>
    %c2_i32_393 = arith.constant 2 : i32
    %693 = arith.muli %688, %c2_i32_393 : i32
    %694 = arith.index_cast %693 : i32 to index
    %c0_394 = arith.constant 0 : index
    %695 = vector.load %arg13[%694, %c0_394] : memref<16x256xf32, #tpu.memory_space<vmem>>, vector<2x128xf32>
    %c2_i32_395 = arith.constant 2 : i32
    %696 = arith.muli %689, %c2_i32_395 : i32
    %697 = arith.index_cast %696 : i32 to index
    %c128_396 = arith.constant 128 : index
    %698 = vector.load %arg13[%697, %c128_396] : memref<16x256xf32, #tpu.memory_space<vmem>>, vector<2x128xf32>
    %699 = tpu.concatenate %695, %698 in 1 : vector<2x128xf32>, vector<2x128xf32> -> vector<2x256xf32>
    %700 = arith.addf %692, %699 : vector<2x256xf32>
    %701 = arith.negf %700 : vector<2x256xf32>
    %702 = math.exp %701 : vector<2x256xf32>
    %cst_397 = arith.constant 1.000000e+00 : f32
    %703 = vector.broadcast %cst_397 : f32 to vector<2x256xf32>
    %704 = arith.addf %703, %702 : vector<2x256xf32>
    %705 = arith.divf %703, %704 : vector<2x256xf32>
    %706 = math.tanh %700 : vector<2x256xf32>
    %c0_398 = arith.constant 0 : index
    %c0_399 = arith.constant 0 : index
    %707 = vector.load %arg19[%c0_398, %c0_399] : memref<2x64xf32, #tpu.memory_space<vmem>>, vector<2x64xf32>
    %708 = vector.extract_strided_slice %705 {offsets = [0, 32], sizes = [2, 32], strides = [1, 1]} : vector<2x256xf32> to vector<2x32xf32>
    %709 = vector.extract_strided_slice %707 {offsets = [0, 0], sizes = [2, 32], strides = [1, 1]} : vector<2x64xf32> to vector<2x32xf32>
    %710 = arith.mulf %708, %709 : vector<2x32xf32>
    %711 = vector.extract_strided_slice %705 {offsets = [0, 0], sizes = [2, 32], strides = [1, 1]} : vector<2x256xf32> to vector<2x32xf32>
    %712 = vector.extract_strided_slice %706 {offsets = [0, 64], sizes = [2, 32], strides = [1, 1]} : vector<2x256xf32> to vector<2x32xf32>
    %713 = arith.mulf %711, %712 : vector<2x32xf32>
    %714 = arith.addf %710, %713 : vector<2x32xf32>
    %715 = vector.extract_strided_slice %705 {offsets = [0, 96], sizes = [2, 32], strides = [1, 1]} : vector<2x256xf32> to vector<2x32xf32>
    %716 = math.tanh %714 : vector<2x32xf32>
    %717 = arith.mulf %715, %716 : vector<2x32xf32>
    %718 = vector.extract_strided_slice %705 {offsets = [0, 160], sizes = [2, 32], strides = [1, 1]} : vector<2x256xf32> to vector<2x32xf32>
    %719 = vector.extract_strided_slice %707 {offsets = [0, 32], sizes = [2, 32], strides = [1, 1]} : vector<2x64xf32> to vector<2x32xf32>
    %720 = arith.mulf %718, %719 : vector<2x32xf32>
    %721 = vector.extract_strided_slice %705 {offsets = [0, 128], sizes = [2, 32], strides = [1, 1]} : vector<2x256xf32> to vector<2x32xf32>
    %722 = vector.extract_strided_slice %706 {offsets = [0, 192], sizes = [2, 32], strides = [1, 1]} : vector<2x256xf32> to vector<2x32xf32>
    %723 = arith.mulf %721, %722 : vector<2x32xf32>
    %724 = arith.addf %720, %723 : vector<2x32xf32>
    %725 = vector.extract_strided_slice %705 {offsets = [0, 224], sizes = [2, 32], strides = [1, 1]} : vector<2x256xf32> to vector<2x32xf32>
    %726 = math.tanh %724 : vector<2x32xf32>
    %727 = arith.mulf %725, %726 : vector<2x32xf32>
    %c0_400 = arith.constant 0 : index
    %c0_401 = arith.constant 0 : index
    %728 = vector.load %arg19[%c0_400, %c0_401] : memref<2x64xf32, #tpu.memory_space<vmem>>, vector<2x32xf32>
    tpu.vector_store %arg19[%c0_400, %c0_401], %714 {strides = array<i32>} : memref<2x64xf32, #tpu.memory_space<vmem>>, vector<2x32xf32>,
    %c0_402 = arith.constant 0 : index
    %c32_403 = arith.constant 32 : index
    %729 = vector.load %arg19[%c0_402, %c32_403] : memref<2x64xf32, #tpu.memory_space<vmem>>, vector<2x32xf32>
    tpu.vector_store %arg19[%c0_402, %c32_403], %724 {strides = array<i32>} : memref<2x64xf32, #tpu.memory_space<vmem>>, vector<2x32xf32>,
    %c0_404 = arith.constant 0 : index
    %c0_405 = arith.constant 0 : index
    %730 = vector.load %arg18[%c0_404, %c0_405] : memref<2x64xf32, #tpu.memory_space<vmem>>, vector<2x32xf32>
    tpu.vector_store %arg18[%c0_404, %c0_405], %717 {strides = array<i32>} : memref<2x64xf32, #tpu.memory_space<vmem>>, vector<2x32xf32>,
    %c0_406 = arith.constant 0 : index
    %c32_407 = arith.constant 32 : index
    %731 = vector.load %arg18[%c0_406, %c32_407] : memref<2x64xf32, #tpu.memory_space<vmem>>, vector<2x32xf32>
    tpu.vector_store %arg18[%c0_406, %c32_407], %727 {strides = array<i32>} : memref<2x64xf32, #tpu.memory_space<vmem>>, vector<2x32xf32>,
    %c2_i32_408 = arith.constant 2 : i32
    %732 = arith.muli %688, %c2_i32_408 : i32
    %733 = arith.index_cast %732 : i32 to index
    %c0_409 = arith.constant 0 : index
    %734 = vector.load %arg16[%733, %c0_409] : memref<16x32xf32, #tpu.memory_space<vmem>>, vector<2x32xf32>
    tpu.vector_store %arg16[%733, %c0_409], %717 {strides = array<i32>} : memref<16x32xf32, #tpu.memory_space<vmem>>, vector<2x32xf32>,
    %c2_i32_410 = arith.constant 2 : i32
    %735 = arith.muli %689, %c2_i32_410 : i32
    %736 = arith.index_cast %735 : i32 to index
    %c0_411 = arith.constant 0 : index
    %737 = vector.load %arg17[%736, %c0_411] : memref<16x32xf32, #tpu.memory_space<vmem>>, vector<2x32xf32>
    tpu.vector_store %arg17[%736, %c0_411], %727 {strides = array<i32>} : memref<16x32xf32, #tpu.memory_space<vmem>>, vector<2x32xf32>,
    %c6_i32_412 = arith.constant 6 : i32
    %c1_i32_413 = arith.constant 1 : i32
    %738 = arith.muli %c6_i32_412, %c1_i32_413 : i32
    %c0_i32_414 = arith.constant 0 : i32
    %739 = arith.addi %c0_i32_414, %738 : i32
    %c7_i32_415 = arith.constant 7 : i32
    %740 = arith.subi %c7_i32_415, %739 : i32
    %c0_416 = arith.constant 0 : index
    %c0_417 = arith.constant 0 : index
    %741 = vector.load %arg18[%c0_416, %c0_417] : memref<2x64xf32, #tpu.memory_space<vmem>>, vector<2x64xf32>
    %c0_418 = arith.constant 0 : index
    %c0_419 = arith.constant 0 : index
    %742 = vector.load %arg6[%c0_418, %c0_419] : memref<64x256xf32, #tpu.memory_space<vmem>>, vector<64x256xf32>
    %cst_420 = arith.constant dense<0.000000e+00> : vector<2x256xf32>
    %743 = tpu.matmul %741, %742, %cst_420 {dimension_numbers = #tpu.dot_dimension_numbers<[1], [0], [0], [1], [0, 0, 1, 1], [], []>} : vector<2x64xf32>, vector<64x256xf32>, vector<2x256xf32> -> vector<2x256xf32>
    %c2_i32_421 = arith.constant 2 : i32
    %744 = arith.muli %739, %c2_i32_421 : i32
    %745 = arith.index_cast %744 : i32 to index
    %c0_422 = arith.constant 0 : index
    %746 = vector.load %arg13[%745, %c0_422] : memref<16x256xf32, #tpu.memory_space<vmem>>, vector<2x128xf32>
    %c2_i32_423 = arith.constant 2 : i32
    %747 = arith.muli %740, %c2_i32_423 : i32
    %748 = arith.index_cast %747 : i32 to index
    %c128_424 = arith.constant 128 : index
    %749 = vector.load %arg13[%748, %c128_424] : memref<16x256xf32, #tpu.memory_space<vmem>>, vector<2x128xf32>
    %750 = tpu.concatenate %746, %749 in 1 : vector<2x128xf32>, vector<2x128xf32> -> vector<2x256xf32>
    %751 = arith.addf %743, %750 : vector<2x256xf32>
    %752 = arith.negf %751 : vector<2x256xf32>
    %753 = math.exp %752 : vector<2x256xf32>
    %cst_425 = arith.constant 1.000000e+00 : f32
    %754 = vector.broadcast %cst_425 : f32 to vector<2x256xf32>
    %755 = arith.addf %754, %753 : vector<2x256xf32>
    %756 = arith.divf %754, %755 : vector<2x256xf32>
    %757 = math.tanh %751 : vector<2x256xf32>
    %c0_426 = arith.constant 0 : index
    %c0_427 = arith.constant 0 : index
    %758 = vector.load %arg19[%c0_426, %c0_427] : memref<2x64xf32, #tpu.memory_space<vmem>>, vector<2x64xf32>
    %759 = vector.extract_strided_slice %756 {offsets = [0, 32], sizes = [2, 32], strides = [1, 1]} : vector<2x256xf32> to vector<2x32xf32>
    %760 = vector.extract_strided_slice %758 {offsets = [0, 0], sizes = [2, 32], strides = [1, 1]} : vector<2x64xf32> to vector<2x32xf32>
    %761 = arith.mulf %759, %760 : vector<2x32xf32>
    %762 = vector.extract_strided_slice %756 {offsets = [0, 0], sizes = [2, 32], strides = [1, 1]} : vector<2x256xf32> to vector<2x32xf32>
    %763 = vector.extract_strided_slice %757 {offsets = [0, 64], sizes = [2, 32], strides = [1, 1]} : vector<2x256xf32> to vector<2x32xf32>
    %764 = arith.mulf %762, %763 : vector<2x32xf32>
    %765 = arith.addf %761, %764 : vector<2x32xf32>
    %766 = vector.extract_strided_slice %756 {offsets = [0, 96], sizes = [2, 32], strides = [1, 1]} : vector<2x256xf32> to vector<2x32xf32>
    %767 = math.tanh %765 : vector<2x32xf32>
    %768 = arith.mulf %766, %767 : vector<2x32xf32>
    %769 = vector.extract_strided_slice %756 {offsets = [0, 160], sizes = [2, 32], strides = [1, 1]} : vector<2x256xf32> to vector<2x32xf32>
    %770 = vector.extract_strided_slice %758 {offsets = [0, 32], sizes = [2, 32], strides = [1, 1]} : vector<2x64xf32> to vector<2x32xf32>
    %771 = arith.mulf %769, %770 : vector<2x32xf32>
    %772 = vector.extract_strided_slice %756 {offsets = [0, 128], sizes = [2, 32], strides = [1, 1]} : vector<2x256xf32> to vector<2x32xf32>
    %773 = vector.extract_strided_slice %757 {offsets = [0, 192], sizes = [2, 32], strides = [1, 1]} : vector<2x256xf32> to vector<2x32xf32>
    %774 = arith.mulf %772, %773 : vector<2x32xf32>
    %775 = arith.addf %771, %774 : vector<2x32xf32>
    %776 = vector.extract_strided_slice %756 {offsets = [0, 224], sizes = [2, 32], strides = [1, 1]} : vector<2x256xf32> to vector<2x32xf32>
    %777 = math.tanh %775 : vector<2x32xf32>
    %778 = arith.mulf %776, %777 : vector<2x32xf32>
    %c0_428 = arith.constant 0 : index
    %c0_429 = arith.constant 0 : index
    %779 = vector.load %arg19[%c0_428, %c0_429] : memref<2x64xf32, #tpu.memory_space<vmem>>, vector<2x32xf32>
    tpu.vector_store %arg19[%c0_428, %c0_429], %765 {strides = array<i32>} : memref<2x64xf32, #tpu.memory_space<vmem>>, vector<2x32xf32>,
    %c0_430 = arith.constant 0 : index
    %c32_431 = arith.constant 32 : index
    %780 = vector.load %arg19[%c0_430, %c32_431] : memref<2x64xf32, #tpu.memory_space<vmem>>, vector<2x32xf32>
    tpu.vector_store %arg19[%c0_430, %c32_431], %775 {strides = array<i32>} : memref<2x64xf32, #tpu.memory_space<vmem>>, vector<2x32xf32>,
    %c0_432 = arith.constant 0 : index
    %c0_433 = arith.constant 0 : index
    %781 = vector.load %arg18[%c0_432, %c0_433] : memref<2x64xf32, #tpu.memory_space<vmem>>, vector<2x32xf32>
    tpu.vector_store %arg18[%c0_432, %c0_433], %768 {strides = array<i32>} : memref<2x64xf32, #tpu.memory_space<vmem>>, vector<2x32xf32>,
    %c0_434 = arith.constant 0 : index
    %c32_435 = arith.constant 32 : index
    %782 = vector.load %arg18[%c0_434, %c32_435] : memref<2x64xf32, #tpu.memory_space<vmem>>, vector<2x32xf32>
    tpu.vector_store %arg18[%c0_434, %c32_435], %778 {strides = array<i32>} : memref<2x64xf32, #tpu.memory_space<vmem>>, vector<2x32xf32>,
    %c2_i32_436 = arith.constant 2 : i32
    %783 = arith.muli %739, %c2_i32_436 : i32
    %784 = arith.index_cast %783 : i32 to index
    %c0_437 = arith.constant 0 : index
    %785 = vector.load %arg16[%784, %c0_437] : memref<16x32xf32, #tpu.memory_space<vmem>>, vector<2x32xf32>
    tpu.vector_store %arg16[%784, %c0_437], %768 {strides = array<i32>} : memref<16x32xf32, #tpu.memory_space<vmem>>, vector<2x32xf32>,
    %c2_i32_438 = arith.constant 2 : i32
    %786 = arith.muli %740, %c2_i32_438 : i32
    %787 = arith.index_cast %786 : i32 to index
    %c0_439 = arith.constant 0 : index
    %788 = vector.load %arg17[%787, %c0_439] : memref<16x32xf32, #tpu.memory_space<vmem>>, vector<2x32xf32>
    tpu.vector_store %arg17[%787, %c0_439], %778 {strides = array<i32>} : memref<16x32xf32, #tpu.memory_space<vmem>>, vector<2x32xf32>,
    %c7_i32_440 = arith.constant 7 : i32
    %c1_i32_441 = arith.constant 1 : i32
    %789 = arith.muli %c7_i32_440, %c1_i32_441 : i32
    %c0_i32_442 = arith.constant 0 : i32
    %790 = arith.addi %c0_i32_442, %789 : i32
    %c7_i32_443 = arith.constant 7 : i32
    %791 = arith.subi %c7_i32_443, %790 : i32
    %c0_444 = arith.constant 0 : index
    %c0_445 = arith.constant 0 : index
    %792 = vector.load %arg18[%c0_444, %c0_445] : memref<2x64xf32, #tpu.memory_space<vmem>>, vector<2x64xf32>
    %c0_446 = arith.constant 0 : index
    %c0_447 = arith.constant 0 : index
    %793 = vector.load %arg6[%c0_446, %c0_447] : memref<64x256xf32, #tpu.memory_space<vmem>>, vector<64x256xf32>
    %cst_448 = arith.constant dense<0.000000e+00> : vector<2x256xf32>
    %794 = tpu.matmul %792, %793, %cst_448 {dimension_numbers = #tpu.dot_dimension_numbers<[1], [0], [0], [1], [0, 0, 1, 1], [], []>} : vector<2x64xf32>, vector<64x256xf32>, vector<2x256xf32> -> vector<2x256xf32>
    %c2_i32_449 = arith.constant 2 : i32
    %795 = arith.muli %790, %c2_i32_449 : i32
    %796 = arith.index_cast %795 : i32 to index
    %c0_450 = arith.constant 0 : index
    %797 = vector.load %arg13[%796, %c0_450] : memref<16x256xf32, #tpu.memory_space<vmem>>, vector<2x128xf32>
    %c2_i32_451 = arith.constant 2 : i32
    %798 = arith.muli %791, %c2_i32_451 : i32
    %799 = arith.index_cast %798 : i32 to index
    %c128_452 = arith.constant 128 : index
    %800 = vector.load %arg13[%799, %c128_452] : memref<16x256xf32, #tpu.memory_space<vmem>>, vector<2x128xf32>
    %801 = tpu.concatenate %797, %800 in 1 : vector<2x128xf32>, vector<2x128xf32> -> vector<2x256xf32>
    %802 = arith.addf %794, %801 : vector<2x256xf32>
    %803 = arith.negf %802 : vector<2x256xf32>
    %804 = math.exp %803 : vector<2x256xf32>
    %cst_453 = arith.constant 1.000000e+00 : f32
    %805 = vector.broadcast %cst_453 : f32 to vector<2x256xf32>
    %806 = arith.addf %805, %804 : vector<2x256xf32>
    %807 = arith.divf %805, %806 : vector<2x256xf32>
    %808 = math.tanh %802 : vector<2x256xf32>
    %c0_454 = arith.constant 0 : index
    %c0_455 = arith.constant 0 : index
    %809 = vector.load %arg19[%c0_454, %c0_455] : memref<2x64xf32, #tpu.memory_space<vmem>>, vector<2x64xf32>
    %810 = vector.extract_strided_slice %807 {offsets = [0, 32], sizes = [2, 32], strides = [1, 1]} : vector<2x256xf32> to vector<2x32xf32>
    %811 = vector.extract_strided_slice %809 {offsets = [0, 0], sizes = [2, 32], strides = [1, 1]} : vector<2x64xf32> to vector<2x32xf32>
    %812 = arith.mulf %810, %811 : vector<2x32xf32>
    %813 = vector.extract_strided_slice %807 {offsets = [0, 0], sizes = [2, 32], strides = [1, 1]} : vector<2x256xf32> to vector<2x32xf32>
    %814 = vector.extract_strided_slice %808 {offsets = [0, 64], sizes = [2, 32], strides = [1, 1]} : vector<2x256xf32> to vector<2x32xf32>
    %815 = arith.mulf %813, %814 : vector<2x32xf32>
    %816 = arith.addf %812, %815 : vector<2x32xf32>
    %817 = vector.extract_strided_slice %807 {offsets = [0, 96], sizes = [2, 32], strides = [1, 1]} : vector<2x256xf32> to vector<2x32xf32>
    %818 = math.tanh %816 : vector<2x32xf32>
    %819 = arith.mulf %817, %818 : vector<2x32xf32>
    %820 = vector.extract_strided_slice %807 {offsets = [0, 160], sizes = [2, 32], strides = [1, 1]} : vector<2x256xf32> to vector<2x32xf32>
    %821 = vector.extract_strided_slice %809 {offsets = [0, 32], sizes = [2, 32], strides = [1, 1]} : vector<2x64xf32> to vector<2x32xf32>
    %822 = arith.mulf %820, %821 : vector<2x32xf32>
    %823 = vector.extract_strided_slice %807 {offsets = [0, 128], sizes = [2, 32], strides = [1, 1]} : vector<2x256xf32> to vector<2x32xf32>
    %824 = vector.extract_strided_slice %808 {offsets = [0, 192], sizes = [2, 32], strides = [1, 1]} : vector<2x256xf32> to vector<2x32xf32>
    %825 = arith.mulf %823, %824 : vector<2x32xf32>
    %826 = arith.addf %822, %825 : vector<2x32xf32>
    %827 = vector.extract_strided_slice %807 {offsets = [0, 224], sizes = [2, 32], strides = [1, 1]} : vector<2x256xf32> to vector<2x32xf32>
    %828 = math.tanh %826 : vector<2x32xf32>
    %829 = arith.mulf %827, %828 : vector<2x32xf32>
    %c0_456 = arith.constant 0 : index
    %c0_457 = arith.constant 0 : index
    %830 = vector.load %arg19[%c0_456, %c0_457] : memref<2x64xf32, #tpu.memory_space<vmem>>, vector<2x32xf32>
    tpu.vector_store %arg19[%c0_456, %c0_457], %816 {strides = array<i32>} : memref<2x64xf32, #tpu.memory_space<vmem>>, vector<2x32xf32>,
    %c0_458 = arith.constant 0 : index
    %c32_459 = arith.constant 32 : index
    %831 = vector.load %arg19[%c0_458, %c32_459] : memref<2x64xf32, #tpu.memory_space<vmem>>, vector<2x32xf32>
    tpu.vector_store %arg19[%c0_458, %c32_459], %826 {strides = array<i32>} : memref<2x64xf32, #tpu.memory_space<vmem>>, vector<2x32xf32>,
    %c0_460 = arith.constant 0 : index
    %c0_461 = arith.constant 0 : index
    %832 = vector.load %arg18[%c0_460, %c0_461] : memref<2x64xf32, #tpu.memory_space<vmem>>, vector<2x32xf32>
    tpu.vector_store %arg18[%c0_460, %c0_461], %819 {strides = array<i32>} : memref<2x64xf32, #tpu.memory_space<vmem>>, vector<2x32xf32>,
    %c0_462 = arith.constant 0 : index
    %c32_463 = arith.constant 32 : index
    %833 = vector.load %arg18[%c0_462, %c32_463] : memref<2x64xf32, #tpu.memory_space<vmem>>, vector<2x32xf32>
    tpu.vector_store %arg18[%c0_462, %c32_463], %829 {strides = array<i32>} : memref<2x64xf32, #tpu.memory_space<vmem>>, vector<2x32xf32>,
    %c2_i32_464 = arith.constant 2 : i32
    %834 = arith.muli %790, %c2_i32_464 : i32
    %835 = arith.index_cast %834 : i32 to index
    %c0_465 = arith.constant 0 : index
    %836 = vector.load %arg16[%835, %c0_465] : memref<16x32xf32, #tpu.memory_space<vmem>>, vector<2x32xf32>
    tpu.vector_store %arg16[%835, %c0_465], %819 {strides = array<i32>} : memref<16x32xf32, #tpu.memory_space<vmem>>, vector<2x32xf32>,
    %c2_i32_466 = arith.constant 2 : i32
    %837 = arith.muli %791, %c2_i32_466 : i32
    %838 = arith.index_cast %837 : i32 to index
    %c0_467 = arith.constant 0 : index
    %839 = vector.load %arg17[%838, %c0_467] : memref<16x32xf32, #tpu.memory_space<vmem>>, vector<2x32xf32>
    tpu.vector_store %arg17[%838, %c0_467], %829 {strides = array<i32>} : memref<16x32xf32, #tpu.memory_space<vmem>>, vector<2x32xf32>,
    %c8_i32_468 = arith.constant 8 : i32
    %c0_469 = arith.constant 0 : index
    %c0_470 = arith.constant 0 : index
    %840 = vector.load %arg16[%c0_469, %c0_470] : memref<16x32xf32, #tpu.memory_space<vmem>>, vector<16x32xf32>
    %c0_471 = arith.constant 0 : index
    %c0_472 = arith.constant 0 : index
    %841 = vector.load %arg17[%c0_471, %c0_472] : memref<16x32xf32, #tpu.memory_space<vmem>>, vector<16x32xf32>
    %842 = tpu.concatenate %840, %841 in 1 : vector<16x32xf32>, vector<16x32xf32> -> vector<16x64xf32>
    %c0_473 = arith.constant 0 : index
    %c0_474 = arith.constant 0 : index
    %843 = vector.load %arg8[%c0_473, %c0_474] : memref<64x512xf32, #tpu.memory_space<vmem>>, vector<64x512xf32>
    %cst_475 = arith.constant dense<0.000000e+00> : vector<16x512xf32>
    %844 = tpu.matmul %842, %843, %cst_475 {dimension_numbers = #tpu.dot_dimension_numbers<[1], [0], [0], [1], [0, 0, 1, 1], [], []>} : vector<16x64xf32>, vector<64x512xf32>, vector<16x512xf32> -> vector<16x512xf32>
    %845 = math.tanh %844 : vector<16x512xf32>
    %c0_476 = arith.constant 0 : index
    %c0_477 = arith.constant 0 : index
    %846 = vector.load %arg9[%c0_476, %c0_477] : memref<512x1xf32, #tpu.memory_space<vmem>>, vector<512x1xf32>
    %cst_478 = arith.constant dense<0.000000e+00> : vector<16x1xf32>
    %847 = tpu.matmul %845, %846, %cst_478 {dimension_numbers = #tpu.dot_dimension_numbers<[1], [0], [0], [1], [0, 0, 1, 1], [], []>} : vector<16x512xf32>, vector<512x1xf32>, vector<16x1xf32> -> vector<16x1xf32>
    %848 = vector.extract_strided_slice %847 {offsets = [0, 0], sizes = [8, 1], strides = [1, 1]} : vector<16x1xf32> to vector<8x1xf32>
    %cst_479 = arith.constant dense<0xFF800000> : vector<1xf32>
    %849 = vector.multi_reduction <maximumf>, %848, %cst_479 [0] : vector<8x1xf32> to vector<1xf32>
    %850 = vector.shape_cast %849 : vector<1xf32> to vector<1x1xf32>
    %851 = vector.broadcast %850 : vector<1x1xf32> to vector<8x1xf32>
    %852 = arith.subf %848, %851 : vector<8x1xf32>
    %853 = math.exp %852 : vector<8x1xf32>
    %cst_480 = arith.constant dense<0.000000e+00> : vector<1xf32>
    %854 = vector.multi_reduction <add>, %853, %cst_480 [0] : vector<8x1xf32> to vector<1xf32>
    %855 = vector.shape_cast %854 : vector<1xf32> to vector<1x1xf32>
    %856 = vector.broadcast %855 : vector<1x1xf32> to vector<8x1xf32>
    %857 = arith.divf %853, %856 : vector<8x1xf32>
    %c0_481 = arith.constant 0 : index
    %c0_482 = arith.constant 0 : index
    %858 = tpu.strided_load %arg16[%c0_481, %c0_482] {strides = array<i32: 2, 1>} : memref<16x32xf32, #tpu.memory_space<vmem>>, vector<8x32xf32>
    %c0_483 = arith.constant 0 : index
    %c0_484 = arith.constant 0 : index
    %859 = tpu.strided_load %arg17[%c0_483, %c0_484] {strides = array<i32: 2, 1>} : memref<16x32xf32, #tpu.memory_space<vmem>>, vector<8x32xf32>
    %860 = tpu.concatenate %858, %859 in 1 : vector<8x32xf32>, vector<8x32xf32> -> vector<8x64xf32>
    %861 = vector.broadcast %857 : vector<8x1xf32> to vector<8x64xf32>
    %862 = arith.mulf %861, %860 : vector<8x64xf32>
    %cst_485 = arith.constant dense<0.000000e+00> : vector<64xf32>
    %863 = vector.multi_reduction <add>, %862, %cst_485 [0] : vector<8x64xf32> to vector<64xf32>
    %864 = vector.shape_cast %863 : vector<64xf32> to vector<1x64xf32>
    %865 = vector.extract_strided_slice %847 {offsets = [8, 0], sizes = [8, 1], strides = [1, 1]} : vector<16x1xf32> to vector<8x1xf32>
    %cst_486 = arith.constant dense<0xFF800000> : vector<1xf32>
    %866 = vector.multi_reduction <maximumf>, %865, %cst_486 [0] : vector<8x1xf32> to vector<1xf32>
    %867 = vector.shape_cast %866 : vector<1xf32> to vector<1x1xf32>
    %868 = vector.broadcast %867 : vector<1x1xf32> to vector<8x1xf32>
    %869 = arith.subf %865, %868 : vector<8x1xf32>
    %870 = math.exp %869 : vector<8x1xf32>
    %cst_487 = arith.constant dense<0.000000e+00> : vector<1xf32>
    %871 = vector.multi_reduction <add>, %870, %cst_487 [0] : vector<8x1xf32> to vector<1xf32>
    %872 = vector.shape_cast %871 : vector<1xf32> to vector<1x1xf32>
    %873 = vector.broadcast %872 : vector<1x1xf32> to vector<8x1xf32>
    %874 = arith.divf %870, %873 : vector<8x1xf32>
    %c1 = arith.constant 1 : index
    %c0_488 = arith.constant 0 : index
    %875 = tpu.strided_load %arg16[%c1, %c0_488] {strides = array<i32: 2, 1>} : memref<16x32xf32, #tpu.memory_space<vmem>>, vector<8x32xf32>
    %c1_489 = arith.constant 1 : index
    %c0_490 = arith.constant 0 : index
    %876 = tpu.strided_load %arg17[%c1_489, %c0_490] {strides = array<i32: 2, 1>} : memref<16x32xf32, #tpu.memory_space<vmem>>, vector<8x32xf32>
    %877 = tpu.concatenate %875, %876 in 1 : vector<8x32xf32>, vector<8x32xf32> -> vector<8x64xf32>
    %878 = vector.broadcast %874 : vector<8x1xf32> to vector<8x64xf32>
    %879 = arith.mulf %878, %877 : vector<8x64xf32>
    %cst_491 = arith.constant dense<0.000000e+00> : vector<64xf32>
    %880 = vector.multi_reduction <add>, %879, %cst_491 [0] : vector<8x64xf32> to vector<64xf32>
    %881 = vector.shape_cast %880 : vector<64xf32> to vector<1x64xf32>
    %882 = tpu.concatenate %864, %881 in 0 : vector<1x64xf32>, vector<1x64xf32> -> vector<2x64xf32>
    %c0_492 = arith.constant 0 : index
    %c0_493 = arith.constant 0 : index
    %883 = vector.load %arg10[%c0_492, %c0_493] : memref<64x5xf32, #tpu.memory_space<vmem>>, vector<64x5xf32>
    %cst_494 = arith.constant dense<0.000000e+00> : vector<2x5xf32>
    %884 = tpu.matmul %882, %883, %cst_494 {dimension_numbers = #tpu.dot_dimension_numbers<[1], [0], [0], [1], [0, 0, 1, 1], [], []>} : vector<2x64xf32>, vector<64x5xf32>, vector<2x5xf32> -> vector<2x5xf32>
    %c0_495 = arith.constant 0 : index
    %c0_496 = arith.constant 0 : index
    %885 = vector.load %arg11[%c0_495, %c0_496] : memref<1x5xf32, #tpu.memory_space<vmem>>, vector<1x5xf32>
    %886 = vector.broadcast %885 : vector<1x5xf32> to vector<2x5xf32>
    %887 = arith.addf %884, %886 : vector<2x5xf32>
    %c0_497 = arith.constant 0 : index
    %c0_498 = arith.constant 0 : index
    %888 = vector.load %arg12[%c0_497, %c0_498] : memref<2x5xf32, #tpu.memory_space<vmem>>, vector<2x5xf32>
    tpu.vector_store %arg12[%c0_497, %c0_498], %887 {strides = array<i32>} : memref<2x5xf32, #tpu.memory_space<vmem>>, vector<2x5xf32>,
    return
  }
  func.func @transform_0(%arg0: i32) -> (i32, i32) {
    %c0_i32 = arith.constant 0 : i32
    %c0_i32_0 = arith.constant 0 : i32
    %c0_i32_1 = arith.constant 0 : i32
    return %c0_i32, %c0_i32_0 : i32, i32
  }
  func.func @transform_1(%arg0: i32) -> (i32, i32) {
    %c0_i32 = arith.constant 0 : i32
    %c0_i32_0 = arith.constant 0 : i32
    %c0_i32_1 = arith.constant 0 : i32
    return %c0_i32, %c0_i32_0 : i32, i32
  }
  func.func @transform_2(%arg0: i32) -> (i32, i32) {
    %c0_i32 = arith.constant 0 : i32
    %c0_i32_0 = arith.constant 0 : i32
    %c0_i32_1 = arith.constant 0 : i32
    return %c0_i32, %c0_i32_0 : i32, i32
  }
  func.func @transform_3(%arg0: i32) -> (i32, i32) {
    %c0_i32 = arith.constant 0 : i32
    %c0_i32_0 = arith.constant 0 : i32
    %c0_i32_1 = arith.constant 0 : i32
    return %c0_i32, %c0_i32_0 : i32, i32
  }
  func.func @transform_4(%arg0: i32) -> (i32, i32) {
    %c0_i32 = arith.constant 0 : i32
    %c0_i32_0 = arith.constant 0 : i32
    %c0_i32_1 = arith.constant 0 : i32
    return %c0_i32, %c0_i32_0 : i32, i32
  }
  func.func @transform_5(%arg0: i32) -> (i32, i32) {
    %c0_i32 = arith.constant 0 : i32
    %c0_i32_0 = arith.constant 0 : i32
    %c0_i32_1 = arith.constant 0 : i32
    return %c0_i32, %c0_i32_0 : i32, i32
  }
  func.func @transform_6(%arg0: i32) -> (i32, i32) {
    %c0_i32 = arith.constant 0 : i32
    %c0_i32_0 = arith.constant 0 : i32
    %c0_i32_1 = arith.constant 0 : i32
    return %c0_i32, %c0_i32_0 : i32, i32
  }
  func.func @transform_7(%arg0: i32) -> (i32, i32) {
    %c0_i32 = arith.constant 0 : i32
    %c0_i32_0 = arith.constant 0 : i32
    %c0_i32_1 = arith.constant 0 : i32
    return %c0_i32, %c0_i32_0 : i32, i32
  }
  func.func @transform_8(%arg0: i32) -> (i32, i32) {
    %c0_i32 = arith.constant 0 : i32
    %c0_i32_0 = arith.constant 0 : i32
    %c0_i32_1 = arith.constant 0 : i32
    return %c0_i32, %c0_i32_0 : i32, i32
  }
  func.func @transform_9(%arg0: i32) -> (i32, i32) {
    %c0_i32 = arith.constant 0 : i32
    %c0_i32_0 = arith.constant 0 : i32
    %c0_i32_1 = arith.constant 0 : i32
    return %c0_i32, %c0_i32_0 : i32, i32
  }
  func.func @transform_10(%arg0: i32) -> (i32, i32) {
    %c0_i32 = arith.constant 0 : i32
    %c0_i32_0 = arith.constant 0 : i32
    %c0_i32_1 = arith.constant 0 : i32
    return %c0_i32, %c0_i32_0 : i32, i32
  }
  func.func @transform_11(%arg0: i32) -> (i32, i32) {
    %c0_i32 = arith.constant 0 : i32
    %c0_i32_0 = arith.constant 0 : i32
    %c0_i32_1 = arith.constant 0 : i32
    return %c0_i32, %c0_i32_0 : i32, i32
  }
}

</mosaic_0001>

<bundles_post_ra>
// kernel: net_forward.1
= control target key start
LH: loop header
LB: loop body
LE: loop exit
PB: predicated region body
PF: predicated region fallthrough
CT: control target
= control target key end

     0   :  { %vm112_vm0 = vcmask 517120   ;;  %v3778_v5 = vmov 0.0   ;;  %vm55_vm1 = vcmask 261120   ;;  %s3779_s18 = smov 32   ;;  %s5089_s0 = inlined_call_operand.vmem [shape: f32[16,32], index: 0, kind: input, shape index: {}]   ;;  %s5090_s1 = inlined_call_operand.vmem [shape: f32[32,256], index: 1, kind: input, shape index: {}]   ;;  %s5091_s2 = inlined_call_operand.vmem [shape: f32[64,256], index: 2, kind: input, shape index: {}]   ;;  %s5092_s3 = inlined_call_operand.vmem [shape: f32[1,256], index: 3, kind: input, shape index: {}]   ;;  %s5093_s4 = inlined_call_operand.vmem [shape: f32[64,256], index: 4, kind: input, shape index: {}]   ;;  %s5094_s5 = inlined_call_operand.vmem [shape: f32[64,256], index: 5, kind: input, shape index: {}]   ;;  %s5095_s6 = inlined_call_operand.vmem [shape: f32[1,256], index: 6, kind: input, shape index: {}]   ;;  %s5096_s7 = inlined_call_operand.vmem [shape: f32[64,512], index: 7, kind: input, shape index: {}]   ;;  %s5097_s8 = inlined_call_operand.vmem [shape: f32[512,1], index: 8, kind: input, shape index: {}]   ;;  %s5098_s9 = inlined_call_operand.vmem [shape: f32[64,5], index: 9, kind: input, shape index: {}]   ;;  %s5099_s10 = inlined_call_operand.vmem [shape: f32[1,5], index: 10, kind: input, shape index: {}]   ;;  %s5100_s11 = inlined_call_operand.hbm [shape: f32[2,5], index: 11, kind: output, shape index: {}]  }
   0x1   :  { %v3847_v0 = vld [vmem:[%s5091_s2 + $0x70] sm:$0xff]  ;;  %v48_v1 = vld [vmem:[%s5090_s1 + $0x38] sm:$0xff]  ;;  %v3855_v2 = vld [vmem:[%s5091_s2 + $0x60] sm:$0xff]  ;;  %113 = vst.msk [vmem:[#allocation7] sm:$0x3] %vm112_vm0, %v3778_v5 }
   0x2   :  { %149 = vmatpush.msra.mxu2 %v3847_v0  ;;  %97 = vmatpush.msra.mxu1 %v48_v1  ;;  %v47_v3 = vld [vmem:[%s5090_s1 + $0x30] sm:$0xff]  ;;  %v46_v4 = vld [vmem:[%s5090_s1 + $0x28] sm:$0xff]  ;;  %v45_v7 = vld [vmem:[%s5090_s1 + $0x20] sm:$0xff]  ;;  %114 = vst.msk [vmem:[#allocation8] sm:$0x3] %vm112_vm0, %v3778_v5 }
   0x3   :  { %74 = vmatpush.msra.mxu0 %v47_v3  ;;  %v3869_v6 = vld [vmem:[%s5091_s2 + $0x50] sm:$0xff]  ;;  %v44_v8 = vld [vmem:[%s5090_s1 + $0x18] sm:$0xff]  ;;  %v3886_v10 = vld [vmem:[%s5091_s2 + $0x40] sm:$0xff] }
   0x4   :  { %150 = vmatpush.msra.mxu2 %v3855_v2  ;;  %98 = vmatpush.msra.mxu1 %v46_v4  ;;  %v43_v9 = vld [vmem:[%s5090_s1 + $0x10] sm:$0xff]  ;;  %v42_v11 = vld [vmem:[%s5090_s1 + $0x8] sm:$0xff]  ;;  %v3894_v12 = vld [vmem:[%s5091_s2 + $0x78] sm:$0xff] }
   0x5   :  { %75 = vmatpush.msra.mxu0 %v45_v7  ;;  %v39_v13 = vld [vmem:[%s5089_s0] sm:$0xff]  ;;  %v3906_v15 = vld [vmem:[%s5091_s2 + $0x30] sm:$0xff]  ;;  %169 = vmatpush.msra.mxu3 %v3894_v12  ;;  %v3912_v16 = vld [vmem:[%s5091_s2 + $0x68] sm:$0xff] }
   0x6   :  { %151 = vmatpush.msra.mxu2 %v3869_v6  ;;  %99 = vmatpush.msra.mxu1 %v44_v8  ;;  %v41_v14 = vld [vmem:[%s5090_s1] sm:$0xff]  ;;  %v3924_v18 = vld [vmem:[%s5091_s2 + $0x58] sm:$0xff]  ;;  %v3934_v20 = vld [vmem:[%s5091_s2 + $0x10] sm:$0xff] }
   0x7   :  { %76 = vmatpush.msra.mxu0 %v43_v9  ;;  %v3919_v17 = vld [vmem:[%s5091_s2 + $0x20] sm:$0xff]  ;;  %170 = vmatpush.msra.mxu3 %v3912_v16  ;;  %v3939_v21 = vld [vmem:[%s5091_s2 + $0x48] sm:$0xff] }
   0x8   :  { %152 = vmatpush.msra.mxu2 %v3886_v10  ;;  %100 = vmatpush.msra.mxu1 %v42_v11 }
   0x9   :  { %3372 = vmatmul.msk.f32.vlgmr.msra.gmra.mxu1 %vm55_vm1, %v39_v13  ;;  %77 = vmatpush.msra.mxu0 %v41_v14  ;;  %v3928_v19 = vld [vmem:[#allocation8] sm:$0x3] }
   0xa   :  { %153 = vmatpush.msra.mxu2 %v3906_v15  ;;  %3370 = vmatmul.msk.f32.vlgmr.msra.gmra.mxu0 %vm55_vm1, %v39_v13 }
   0xb   :  { %223 = vrot.lane.b32.xlu1 %v3928_v19, %s3779_s18 }
   0xc   :  { %16 = vsyncpa [#allocation10], 0  ;;  %154 = vmatpush.msra.mxu2 %v3919_v17  ;;  %171 = vmatpush.msra.mxu3 %v3924_v18  ;;  %v3948_v22 = vld [vmem:[%s5091_s2] sm:$0xff]  ;;  %v3953_v23 = vld [vmem:[%s5091_s2 + $0x38] sm:$0xff]  ;;  %vm137_vm2 = vcmask 523264   ;;  %s3781_s12 = smov 96  }
   0xd   :  { %320 = vmatpush.msrb.mxu0 %v3847_v0  ;;  %340 = vmatpush.msrb.mxu1 %v3894_v12  ;;  %v115_v24 = vld [vmem:[#allocation7] sm:$0x3]  ;;  %v40_v25 = vld [vmem:[%s5089_s0 + $0x8] sm:$0xff]  ;;  %v3976_v27 = vld [vmem:[%s5091_s2 + $0x18] sm:$0xff]  ;;  %vm264_vm11 = vcmask 254976   ;;  %vm266_vm12 = vcmask 517376  }
   0xe   :  { %155 = vmatpush.msra.mxu2 %v3934_v20  ;;  %172 = vmatpush.msra.mxu3 %v3939_v21  ;;  %v3965_v26 = vld [vmem:[%s5091_s2 + $0x28] sm:$0xff]  ;;  %v4044_v29 = vld [vmem:[%s5092_s3] sm:$0x3]  ;;  %s3780_s3 = smov 64   ;;  %s3783_s24 = smov [#allocation9]  }
   0xf   :  { %321 = vmatpush.msrb.mxu0 %v3855_v2  ;;  %341 = vmatpush.msrb.mxu1 %v3912_v16  ;;  %v117_v28 = vld [vmem:[%s5091_s2 + $0x8] sm:$0xff]  ;;  %v52_v30 = vperm.slane %v4044_v29, 1  ;;  %v51_v31 = vperm.slane %v4044_v29, 0 }
  0x10   :  { %156 = vmatpush.msra.mxu2 %v3948_v22  ;;  %173 = vmatpush.msra.mxu3 %v3953_v23 }
  0x11   :  { %3374 = vmatmul.msk.f32.vlgmr.msra.gmra.mxu2 %vm137_vm2, %v115_v24  ;;  %3373 = vmatmul.msk.f32.gmra.mxu1 %vm55_vm1, %v40_v25 }
  0x12   :  { %174 = vmatpush.msra.mxu3 %v3965_v26  ;;  %322 = vmatpush.msrb.mxu0 %v3869_v6 }
  0x13   :  { %342 = vmatpush.msrb.mxu1 %v3924_v18  ;;  %3371 = vmatmul.msk.f32.gmra.mxu0 %vm55_vm1, %v40_v25 }
  0x14   :  { %175 = vmatpush.msra.mxu3 %v3976_v27  ;;  %323 = vmatpush.msrb.mxu0 %v3886_v10 }
  0x15   :  { %343 = vmatpush.msrb.mxu1 %v3939_v21  ;;  %489 = vmatpush.msrb.mxu2 %v3847_v0 }
  0x16   :  { %176 = vmatpush.msra.mxu3 %v117_v28  ;;  %324 = vmatpush.msrb.mxu0 %v3906_v15 }
  0x17   :  { %3375 = vmatmul.msk.f32.vlgmr.msra.gmra.mxu3 %vm137_vm2, %v115_v24  ;;  %344 = vmatpush.msrb.mxu1 %v3953_v23 }
  0x18   :  { %325 = vmatpush.msrb.mxu0 %v3919_v17  ;;  %509 = vmatpush.msrb.mxu3 %v3894_v12 }
  0x19   :  { %345 = vmatpush.msrb.mxu1 %v3965_v26  ;;  %490 = vmatpush.msrb.mxu2 %v3855_v2 }
  0x1a   :  { %326 = vmatpush.msrb.mxu0 %v3934_v20  ;;  %510 = vmatpush.msrb.mxu3 %v3912_v16 }
  0x1b   :  { %346 = vmatpush.msrb.mxu1 %v3976_v27  ;;  %491 = vmatpush.msrb.mxu2 %v3869_v6 }
  0x1c   :  { %327 = vmatpush.msrb.mxu0 %v3948_v22  ;;  %511 = vmatpush.msrb.mxu3 %v3924_v18 }
  0x1d   :  { %347 = vmatpush.msrb.mxu1 %v117_v28  ;;  %492 = vmatpush.msrb.mxu2 %v3886_v10 }
  0x1e   :  { %512 = vmatpush.msrb.mxu3 %v3939_v21  ;;  %658 = vmatpush.msra.mxu0 %v3847_v0 }
  0x1f   :  { %493 = vmatpush.msrb.mxu2 %v3906_v15  ;;  %678 = vmatpush.msra.mxu1 %v3894_v12 }
  0x20   :  { %513 = vmatpush.msrb.mxu3 %v3953_v23  ;;  %659 = vmatpush.msra.mxu0 %v3855_v2 }
  0x21   :  { %494 = vmatpush.msrb.mxu2 %v3919_v17  ;;  %679 = vmatpush.msra.mxu1 %v3912_v16 }
  0x22   :  { %514 = vmatpush.msrb.mxu3 %v3965_v26  ;;  %660 = vmatpush.msra.mxu0 %v3869_v6 }
  0x23   :  { %495 = vmatpush.msrb.mxu2 %v3934_v20  ;;  %680 = vmatpush.msra.mxu1 %v3924_v18 }
  0x24   :  { %515 = vmatpush.msrb.mxu3 %v3976_v27  ;;  %661 = vmatpush.msra.mxu0 %v3886_v10 }
  0x25   :  { %496 = vmatpush.msrb.mxu2 %v3948_v22  ;;  %681 = vmatpush.msra.mxu1 %v3939_v21 }
  0x26   :  { %516 = vmatpush.msrb.mxu3 %v117_v28  ;;  %662 = vmatpush.msra.mxu0 %v3906_v15 }
  0x27   :  { %682 = vmatpush.msra.mxu1 %v3953_v23  ;;  %823 = vmatpush.msra.mxu2 %v3847_v0 }
  0x28   :  { %663 = vmatpush.msra.mxu0 %v3919_v17  ;;  %843 = vmatpush.msra.mxu3 %v3894_v12 }
  0x29   :  { %683 = vmatpush.msra.mxu1 %v3965_v26  ;;  %824 = vmatpush.msra.mxu2 %v3855_v2 }
  0x2a   :  { %664 = vmatpush.msra.mxu0 %v3934_v20  ;;  %844 = vmatpush.msra.mxu3 %v3912_v16 }
  0x2b   :  { %684 = vmatpush.msra.mxu1 %v3976_v27  ;;  %825 = vmatpush.msra.mxu2 %v3869_v6 }
  0x2c   :  { %665 = vmatpush.msra.mxu0 %v3948_v22  ;;  %845 = vmatpush.msra.mxu3 %v3924_v18 }
  0x2d   :  { %685 = vmatpush.msra.mxu1 %v117_v28  ;;  %826 = vmatpush.msra.mxu2 %v3886_v10 }
  0x2e   :  { %846 = vmatpush.msra.mxu3 %v3939_v21 }
  0x2f   :  { %827 = vmatpush.msra.mxu2 %v3906_v15 }
  0x30   :  { %847 = vmatpush.msra.mxu3 %v3953_v23 }
  0x31   :  { %828 = vmatpush.msra.mxu2 %v3919_v17 }
  0x32   :  { %848 = vmatpush.msra.mxu3 %v3965_v26 }
  0x33   :  { %829 = vmatpush.msra.mxu2 %v3934_v20 }
  0x34   :  { %849 = vmatpush.msra.mxu3 %v3976_v27 }
  0x35   :  { %830 = vmatpush.msra.mxu2 %v3948_v22 }
  0x36   :  { %850 = vmatpush.msra.mxu3 %v117_v28 }
  0x7d   :  { %v224_v17 = vpop.permute.xlu1 %223 }
  0x86   :  { %v102_v32 = vpop.f32.mrf.mxu1 }
  0x87   :  { %v103_v33 = vadd.f32 %v102_v32, %v52_v30  ;;  %v79_v34 = vpop.f32.mrf.mxu0 }
  0x88   :  { %v80_v35 = vadd.f32 %v79_v34, %v51_v31 }
  0x89   :  { %109 = vst [vmem:[#allocation2] sm:$0xff] %v103_v33 }
  0x8a   :  { %108 = vst [vmem:[#allocation2 + $0x10] sm:$0xff] %v80_v35 }
  0x8e   :  { %v105_v36 = vpop.f32.mrf.mxu1 }
  0x8f   :  { %v106_v37 = vadd.f32 %v105_v36, %v52_v30 }
  0x90   :  { %v82_v30 = vpop.f32.mrf.mxu0 }
  0x91   :  { %111 = vst [vmem:[#allocation2 + $0x8] sm:$0xff] %v106_v37  ;;  %v132_v38 = vld [vmem:[#allocation2 + $0x10] sm:$0x3]  ;;  %v83_v32 = vadd.f32 %v82_v30, %v51_v31  ;;  %v300_v36 = vld [vmem:[#allocation2 + $0x10] sm:$0xc] }
  0x93   :  { %110 = vst [vmem:[#allocation2 + $0x18] sm:$0xff] %v83_v32  ;;  %v469_v32 = vld [vmem:[#allocation2 + $0x10] sm:$0x30] }
  0x94   :  { %v158_v39 = vpop.f32.mrf.mxu2 }
  0x95   :  { %v159_v40 = vadd.f32 %v158_v39, %v132_v38  ;;  %v305_v38 = vrot.slane %v300_v36, 2 }
  0x97   :  { %3472 = vtanh.f32 %v159_v40  ;;  %v3376_v47 = vmul.f32 -1.442695, %v159_v40 }
  0x98   :  { %v133_v41 = vld [vmem:[#allocation2 + $0x8] sm:$0xc0]  ;;  %v301_v37 = vld [vmem:[#allocation2 + $0x8] sm:$0x30] }
  0x99   :  { %v135_v42 = vrot.slane %v133_v41, 6  ;;  %v3378_v39 = vrot.slane %v301_v37, 4 }
  0x9a   :  { %v178_v43 = vpop.f32.mrf.mxu3 }
  0x9b   :  { %v179_v44 = vadd.f32 %v178_v43, %v135_v42 }
  0x9d   :  { %v3473_v45 = vpop.eup %3472  ;;  %3474 = vtanh.f32 %v179_v44  ;;  %v3377_v48 = vmul.f32 -1.442695, %v179_v44 }
  0x9e   :  { %228 = vrot.lane.b32.xlu0 %v3473_v45, %s3780_s3  ;;  %3476 = vpow2.f32 %v3376_v47 }
  0x9f   :  { %3478 = vpow2.f32 %v3377_v48 }
  0xa3   :  { %v3475_v46 = vpop.eup %3474 }
  0xa4   :  { %v3477_v49 = vpop.eup %3476 }
  0xa5   :  { %v187_v50 = vadd.f32 1.0, %v3477_v49  ;;  %v3479_v51 = vpop.eup %3478 }
  0xa6   :  { %245 = vrot.lane.b32.xlu0 %v3475_v46, %s3780_s3  ;;  %v188_v52 = vadd.f32 1.0, %v3479_v51 }
  0xa7   :  { %3480 = vrcp.f32 %v187_v50  ;;  %v200_v61 = vand.u32 2147483648, %v187_v50  ;;  %vm194_vm4 = vweird.f32 %v187_v50  ;;  %v198_v62 = vand.u32 2147483647, %v187_v50 }
  0xa8   :  { %3482 = vrcp.f32 %v188_v52  ;;  %vm209_vm7 = vweird.f32 %v188_v52  ;;  %v215_v4 = vand.u32 2147483648, %v188_v52  ;;  %v213_v8 = vand.u32 2147483647, %v188_v52 }
  0xa9   :  { %v201_v1 = vor.u32 1.1754944e-38, %v200_v61  ;;  %vm199_vm6 = vcmp.eq.f32.partialorder %v198_v62, 8.507059e+37 }
  0xaa   :  { %v216_v9 = vor.u32 1.1754944e-38, %v215_v4  ;;  %vm214_vm10 = vcmp.eq.f32.partialorder %v213_v8, 8.507059e+37 }
  0xad   :  { %v3481_v53 = vpop.eup %3480 }
  0xae   :  { %v190_v54 = vmul.f32 %v3481_v53, %v187_v50  ;;  %v3483_v56 = vpop.eup %3482  ;;  %vm195_vm3 = vweird.f32 %v3481_v53 }
  0xaf   :  { %v205_v58 = vmul.f32 %v3483_v56, %v188_v52  ;;  %vm196_vm5 = vmor %vm194_vm4, %vm195_vm3  ;;  %vm210_vm8 = vweird.f32 %v3483_v56 }
  0xb0   :  { %v191_v55 = vsub.f32 1.0, %v190_v54  ;;  %vm211_vm9 = vmor %vm209_vm7, %vm210_vm8 }
  0xb1   :  { %v206_v60 = vsub.f32 1.0, %v205_v58 }
  0xb2   :  { %v192_v57 = vmul.f32 %v3481_v53, %v191_v55 }
  0xb3   :  { %v207_v0 = vmul.f32 %v3483_v56, %v206_v60 }
  0xb4   :  { %v193_v59 = vadd.f32 %v3481_v53, %v192_v57 }
  0xb5   :  { %v208_v7 = vadd.f32 %v3483_v56, %v207_v0 }
  0xb6   :  { %v197_v63 = vsel %vm196_vm5, %v3481_v53, %v193_v59 }
  0xb7   :  { %v202_v2 = vsel %vm199_vm6, %v201_v1, %v197_v63  ;;  %v212_v10 = vsel %vm211_vm9, %v3483_v56, %v208_v7 }
  0xb8   :  { %v217_v12 = vsel %vm214_vm10, %v216_v9, %v212_v10  ;;  %v226_v20 = vmul.f32 %v224_v17, %v202_v2 }
  0xb9   :  { %v243_v14 = vmul.f32 %v3928_v19, %v217_v12 }
 0x110   :  { %v229_v3 = vpop.permute.xlu0 %228 }
 0x111   :  { %v231_v6 = vmul.f32 %v229_v3, %v202_v2 }
 0x113   :  { %233 = vrot.lane.b32.xlu1 %v231_v6, %s3779_s18 }
 0x118   :  { %v246_v11 = vpop.permute.xlu0 %245 }
 0x119   :  { %v248_v13 = vmul.f32 %v246_v11, %v217_v12 }
 0x11b   :  { %250 = vrot.lane.b32.xlu2 %v248_v13, %s3779_s18 }
 0x175   :  { %v251_v15 = vpop.permute.xlu2 %250 }
 0x176   :  { %v253_v16 = vadd.f32 %v251_v15, %v243_v14 }
 0x178   :  { %3484 = vtanh.f32 %v253_v16 }
 0x17e   :  { %v3485_v18 = vpop.eup %3484 }
 0x17f   :  { %256 = vrot.lane.b32.xlu0 %v3485_v18, %s3780_s3 }
 0x185   :  { %v234_v21 = vpop.permute.xlu1 %233 }
 0x186   :  { %v236_v22 = vadd.f32 %v234_v21, %v226_v20 }
 0x188   :  { %3486 = vtanh.f32 %v236_v22  ;;  %261 = vrot.lane.b32.xlu0 %v236_v22, %s3781_s12 }
 0x18e   :  { %v3487_v23 = vpop.eup %3486 }
 0x18f   :  { %239 = vrot.lane.b32.xlu2 %v3487_v23, %s3780_s3 }
 0x1e9   :  { %v240_v24 = vpop.permute.xlu2 %239 }
 0x1ea   :  { %v242_v25 = vmul.f32 %v240_v24, %v202_v2 }
 0x1ec   :  { %269 = vrot.lane.b32.xlu1 %v242_v25, %s3779_s18 }
 0x1f1   :  { %v257_v19 = vpop.permute.xlu0 %256 }
 0x1f2   :  { %v4059_v26 = vmul.f32 %v257_v19, %v217_v12 }
 0x1f4   :  { %274 = vrot.lane.b32.xlu2 %v4059_v26, %s3780_s3 }
 0x1fa   :  { %v262_v27 = vpop.permute.xlu0 %261 }
 0x1fb   :  { %265 = vst.msk [vmem:[#allocation8] sm:$0x3] %vm264_vm11, %v262_v27 }
 0x1fc   :  { %267 = vst.msk [vmem:[#allocation8] sm:$0x3] %vm266_vm12, %v253_v16 }
 0x203   :  { %v4065_v28 = vld [vmem:[#allocation8] sm:$0x3] }
 0x204   :  { %394 = vrot.lane.b32.xlu0 %v4065_v28, %s3779_s18 }
 0x24e   :  { %v275_v34 = vpop.permute.xlu2 %274 }
 0x25e   :  { %v270_v33 = vpop.permute.xlu1 %269 }
 0x25f   :  { %272 = vst.msk [vmem:[#allocation7] sm:$0x3] %vm264_vm11, %v270_v33 }
 0x260   :  { %277 = vst.msk [vmem:[#allocation7] sm:$0x3] %vm266_vm12, %v275_v34  ;;  %v474_v34 = vrot.slane %v469_v32, 4  ;;  %v639_v32 = vld [vmem:[#allocation2 + $0x8] sm:$0x3] }
 0x261   :  { %278 = vst.msk [vmem:[#allocation3] sm:$0x3] %vm264_vm11, %v270_v33  ;;  %v470_v33 = vld [vmem:[#allocation2 + $0x8] sm:$0xc] }
 0x267   :  { %v283_v35 = vld [vmem:[#allocation7] sm:$0x3] }
 0x268   :  { %3379 = vmatmul.msk.f32.vlgmr.msrb.gmra.mxu0 %vm137_vm2, %v283_v35  ;;  %3380 = vmatmul.msk.f32.vlgmr.msrb.gmra.mxu1 %vm137_vm2, %v283_v35  ;;  %v3383_v35 = vrot.slane %v470_v33, 10 }
 0x276   :  { %v395_v15 = vpop.permute.xlu0 %394 }
 0x2e5   :  { %v329_v29 = vpop.f32.mrf.mxu0  ;;  %v349_v31 = vpop.f32.mrf.mxu1 }
 0x2e6   :  { %v330_v40 = vadd.f32 %v329_v29, %v305_v38  ;;  %v350_v41 = vadd.f32 %v3378_v39, %v349_v31 }
 0x2e8   :  { %3488 = vtanh.f32 %v330_v40  ;;  %v3382_v44 = vmul.f32 -1.442695, %v350_v41  ;;  %v3381_v48 = vmul.f32 -1.442695, %v330_v40 }
 0x2e9   :  { %3490 = vtanh.f32 %v350_v41 }
 0x2ea   :  { %3492 = vpow2.f32 %v3382_v44 }
 0x2ee   :  { %v3489_v42 = vpop.eup %3488 }
 0x2ef   :  { %v3491_v43 = vpop.eup %3490  ;;  %399 = vrot.lane.b32.xlu1 %v3489_v42, %s3780_s3 }
 0x2f0   :  { %416 = vrot.lane.b32.xlu2 %v3491_v43, %s3780_s3  ;;  %v3493_v45 = vpop.eup %3492 }
 0x2f1   :  { %v359_v46 = vadd.f32 1.0, %v3493_v45 }
 0x2f3   :  { %3494 = vrcp.f32 %v359_v46  ;;  %v386_v55 = vand.u32 2147483648, %v359_v46  ;;  %vm380_vm14 = vweird.f32 %v359_v46  ;;  %v384_v56 = vand.u32 2147483647, %v359_v46 }
 0x2f4   :  { %3496 = vpow2.f32 %v3381_v48 }
 0x2f5   :  { %v387_v58 = vor.u32 1.1754944e-38, %v386_v55  ;;  %vm385_vm3 = vcmp.eq.f32.partialorder %v384_v56, 8.507059e+37 }
 0x2f9   :  { %v3495_v47 = vpop.eup %3494 }
 0x2fa   :  { %v376_v49 = vmul.f32 %v3495_v47, %v359_v46  ;;  %v3497_v51 = vpop.eup %3496  ;;  %vm381_vm13 = vweird.f32 %v3495_v47 }
 0x2fb   :  { %v358_v53 = vadd.f32 1.0, %v3497_v51  ;;  %vm382_vm15 = vmor %vm380_vm14, %vm381_vm13 }
 0x2fc   :  { %v377_v50 = vsub.f32 1.0, %v376_v49 }
 0x2fd   :  { %3498 = vrcp.f32 %v358_v53  ;;  %v371_v3 = vand.u32 2147483648, %v358_v53  ;;  %vm365_vm5 = vweird.f32 %v358_v53  ;;  %v369_v4 = vand.u32 2147483647, %v358_v53 }
 0x2fe   :  { %v378_v52 = vmul.f32 %v3495_v47, %v377_v50 }
 0x2ff   :  { %v372_v7 = vor.u32 1.1754944e-38, %v371_v3  ;;  %vm370_vm7 = vcmp.eq.f32.partialorder %v369_v4, 8.507059e+37 }
 0x300   :  { %v379_v54 = vadd.f32 %v3495_v47, %v378_v52 }
 0x302   :  { %v383_v57 = vsel %vm382_vm15, %v3495_v47, %v379_v54 }
 0x303   :  { %v388_v60 = vsel %vm385_vm3, %v387_v58, %v383_v57  ;;  %v3499_v61 = vpop.eup %3498 }
 0x304   :  { %v361_v63 = vmul.f32 %v3499_v61, %v358_v53  ;;  %vm366_vm4 = vweird.f32 %v3499_v61  ;;  %v414_v11 = vmul.f32 %v4065_v28, %v388_v60 }
 0x305   :  { %vm367_vm6 = vmor %vm365_vm5, %vm366_vm4 }
 0x306   :  { %v362_v0 = vsub.f32 1.0, %v361_v63 }
 0x308   :  { %v363_v1 = vmul.f32 %v3499_v61, %v362_v0 }
 0x30a   :  { %v364_v2 = vadd.f32 %v3499_v61, %v363_v1 }
 0x30c   :  { %v368_v6 = vsel %vm367_vm6, %v3499_v61, %v364_v2 }
 0x30d   :  { %v373_v9 = vsel %vm370_vm7, %v372_v7, %v368_v6 }
 0x30e   :  { %v397_v16 = vmul.f32 %v395_v15, %v373_v9 }
 0x34a   :  { %v417_v59 = vpop.permute.xlu2 %416 }
 0x34b   :  { %v419_v62 = vmul.f32 %v417_v59, %v388_v60 }
 0x34d   :  { %421 = vrot.lane.b32.xlu2 %v419_v62, %s3779_s18 }
 0x361   :  { %v400_v8 = vpop.permute.xlu1 %399 }
 0x362   :  { %v402_v10 = vmul.f32 %v400_v8, %v373_v9 }
 0x364   :  { %404 = vrot.lane.b32.xlu1 %v402_v10, %s3779_s18 }
 0x3a7   :  { %v422_v12 = vpop.permute.xlu2 %421 }
 0x3a8   :  { %v424_v13 = vadd.f32 %v422_v12, %v414_v11 }
 0x3aa   :  { %3500 = vtanh.f32 %v424_v13 }
 0x3b0   :  { %v3501_v14 = vpop.eup %3500 }
 0x3b1   :  { %427 = vrot.lane.b32.xlu1 %v3501_v14, %s3780_s3 }
 0x3d6   :  { %v405_v17 = vpop.permute.xlu1 %404 }
 0x3d7   :  { %v407_v18 = vadd.f32 %v405_v17, %v397_v16 }
 0x3d9   :  { %3502 = vtanh.f32 %v407_v18  ;;  %432 = vrot.lane.b32.xlu1 %v407_v18, %s3781_s12 }
 0x3df   :  { %v3503_v20 = vpop.eup %3502 }
 0x3e0   :  { %410 = vrot.lane.b32.xlu0 %v3503_v20, %s3780_s3 }
 0x423   :  { %v428_v21 = vpop.permute.xlu1 %427 }
 0x424   :  { %v4084_v22 = vmul.f32 %v428_v21, %v388_v60 }
 0x426   :  { %443 = vrot.lane.b32.xlu0 %v4084_v22, %s3780_s3 }
 0x44b   :  { %v433_v23 = vpop.permute.xlu1 %432 }
 0x44c   :  { %435 = vst.msk [vmem:[#allocation8] sm:$0x3] %vm264_vm11, %v433_v23 }
 0x44d   :  { %436 = vst.msk [vmem:[#allocation8] sm:$0x3] %vm266_vm12, %v424_v13 }
 0x452   :  { %v411_v24 = vpop.permute.xlu0 %410 }
 0x453   :  { %v413_v25 = vmul.f32 %v411_v24, %v373_v9 }
 0x454   :  { %v4090_v19 = vld [vmem:[#allocation8] sm:$0x3] }
 0x455   :  { %563 = vrot.lane.b32.xlu1 %v4090_v19, %s3779_s18  ;;  %438 = vrot.lane.b32.xlu2 %v413_v25, %s3779_s18 }
 0x498   :  { %v444_v28 = vpop.permute.xlu0 %443 }
 0x4af   :  { %v439_v27 = vpop.permute.xlu2 %438 }
 0x4b0   :  { %441 = vst.msk [vmem:[#allocation7] sm:$0x3] %vm264_vm11, %v439_v27 }
 0x4b1   :  { %446 = vst.msk [vmem:[#allocation7] sm:$0x3] %vm266_vm12, %v444_v28 }
 0x4b2   :  { %447 = vst.msk [vmem:[#allocation3 + $0x2] sm:$0x3] %vm264_vm11, %v439_v27  ;;  %v638_v27 = vld [vmem:[#allocation2 + $0x10] sm:$0xc0] }
 0x4b3   :  { %v643_v28 = vrot.slane %v638_v27, 6 }
 0x4b8   :  { %v452_v30 = vld [vmem:[#allocation7] sm:$0x3] }
 0x4b9   :  { %3384 = vmatmul.msk.f32.vlgmr.msrb.gmra.mxu2 %vm137_vm2, %v452_v30  ;;  %3385 = vmatmul.msk.f32.vlgmr.msrb.gmra.mxu3 %vm137_vm2, %v452_v30 }
 0x4c7   :  { %v564_v7 = vpop.permute.xlu1 %563 }
 0x53c   :  { %v498_v36 = vpop.f32.mrf.mxu2  ;;  %v518_v37 = vpop.f32.mrf.mxu3 }
 0x53d   :  { %v499_v38 = vadd.f32 %v498_v36, %v474_v34  ;;  %v519_v39 = vadd.f32 %v3383_v35, %v518_v37 }
 0x53f   :  { %3504 = vtanh.f32 %v499_v38  ;;  %v3386_v40 = vmul.f32 -1.442695, %v499_v38  ;;  %v3387_v44 = vmul.f32 -1.442695, %v519_v39 }
 0x540   :  { %3506 = vtanh.f32 %v519_v39 }
 0x541   :  { %3508 = vpow2.f32 %v3386_v40 }
 0x545   :  { %v3505_v29 = vpop.eup %3504 }
 0x546   :  { %v3507_v31 = vpop.eup %3506  ;;  %568 = vrot.lane.b32.xlu2 %v3505_v29, %s3780_s3 }
 0x547   :  { %585 = vrot.lane.b32.xlu0 %v3507_v31, %s3780_s3  ;;  %v3509_v41 = vpop.eup %3508 }
 0x548   :  { %v527_v42 = vadd.f32 1.0, %v3509_v41 }
 0x54a   :  { %3510 = vrcp.f32 %v527_v42  ;;  %v540_v51 = vand.u32 2147483648, %v527_v42  ;;  %vm534_vm9 = vweird.f32 %v527_v42  ;;  %v538_v52 = vand.u32 2147483647, %v527_v42 }
 0x54b   :  { %3512 = vpow2.f32 %v3387_v44 }
 0x54c   :  { %v541_v54 = vor.u32 1.1754944e-38, %v540_v51  ;;  %vm539_vm13 = vcmp.eq.f32.partialorder %v538_v52, 8.507059e+37 }
 0x550   :  { %v3511_v43 = vpop.eup %3510 }
 0x551   :  { %v530_v45 = vmul.f32 %v3511_v43, %v527_v42  ;;  %v3513_v48 = vpop.eup %3512  ;;  %vm535_vm8 = vweird.f32 %v3511_v43 }
 0x552   :  { %v528_v49 = vadd.f32 1.0, %v3513_v48  ;;  %vm536_vm10 = vmor %vm534_vm9, %vm535_vm8 }
 0x553   :  { %v531_v46 = vsub.f32 1.0, %v530_v45 }
 0x554   :  { %3514 = vrcp.f32 %v528_v49  ;;  %v555_v63 = vand.u32 2147483648, %v528_v49  ;;  %vm549_vm15 = vweird.f32 %v528_v49  ;;  %v553_v0 = vand.u32 2147483647, %v528_v49 }
 0x555   :  { %v532_v47 = vmul.f32 %v3511_v43, %v531_v46 }
 0x556   :  { %v556_v2 = vor.u32 1.1754944e-38, %v555_v63  ;;  %vm554_vm4 = vcmp.eq.f32.partialorder %v553_v0, 8.507059e+37 }
 0x557   :  { %v533_v50 = vadd.f32 %v3511_v43, %v532_v47 }
 0x559   :  { %v537_v53 = vsel %vm536_vm10, %v3511_v43, %v533_v50 }
 0x55a   :  { %v542_v56 = vsel %vm539_vm13, %v541_v54, %v537_v53  ;;  %v3515_v58 = vpop.eup %3514 }
 0x55b   :  { %v545_v59 = vmul.f32 %v3515_v58, %v528_v49  ;;  %vm550_vm14 = vweird.f32 %v3515_v58  ;;  %v566_v8 = vmul.f32 %v564_v7, %v542_v56 }
 0x55c   :  { %vm551_vm3 = vmor %vm549_vm15, %vm550_vm14 }
 0x55d   :  { %v546_v60 = vsub.f32 1.0, %v545_v59 }
 0x55f   :  { %v547_v61 = vmul.f32 %v3515_v58, %v546_v60 }
 0x561   :  { %v548_v62 = vadd.f32 %v3515_v58, %v547_v61 }
 0x563   :  { %v552_v1 = vsel %vm551_vm3, %v3515_v58, %v548_v62 }
 0x564   :  { %v557_v4 = vsel %vm554_vm4, %v556_v2, %v552_v1 }
 0x565   :  { %v583_v12 = vmul.f32 %v4090_v19, %v557_v4 }
 0x5a0   :  { %v569_v55 = vpop.permute.xlu2 %568 }
 0x5a1   :  { %v571_v57 = vmul.f32 %v569_v55, %v542_v56 }
 0x5a3   :  { %573 = vrot.lane.b32.xlu2 %v571_v57, %s3779_s18 }
 0x5b9   :  { %v586_v3 = vpop.permute.xlu0 %585 }
 0x5ba   :  { %v588_v6 = vmul.f32 %v586_v3, %v557_v4 }
 0x5bc   :  { %590 = vrot.lane.b32.xlu0 %v588_v6, %s3779_s18 }
 0x5fd   :  { %v574_v9 = vpop.permute.xlu2 %573 }
 0x5fe   :  { %v576_v10 = vadd.f32 %v574_v9, %v566_v8 }
 0x600   :  { %3516 = vtanh.f32 %v576_v10 }
 0x606   :  { %v3517_v11 = vpop.eup %3516 }
 0x607   :  { %579 = vrot.lane.b32.xlu1 %v3517_v11, %s3780_s3 }
 0x62e   :  { %v591_v13 = vpop.permute.xlu0 %590 }
 0x62f   :  { %v593_v14 = vadd.f32 %v591_v13, %v583_v12 }
 0x631   :  { %3518 = vtanh.f32 %v593_v14 }
 0x637   :  { %v3519_v15 = vpop.eup %3518 }
 0x638   :  { %596 = vrot.lane.b32.xlu2 %v3519_v15, %s3780_s3 }
 0x640   :  { %601 = vrot.lane.b32.xlu2 %v576_v10, %s3781_s12 }
 0x679   :  { %v580_v16 = vpop.permute.xlu1 %579 }
 0x67a   :  { %v582_v17 = vmul.f32 %v580_v16, %v542_v56 }
 0x67c   :  { %607 = vrot.lane.b32.xlu0 %v582_v17, %s3779_s18 }
 0x692   :  { %v597_v18 = vpop.permute.xlu2 %596 }
 0x693   :  { %v4109_v20 = vmul.f32 %v597_v18, %v557_v4 }
 0x695   :  { %612 = vrot.lane.b32.xlu1 %v4109_v20, %s3780_s3 }
 0x69a   :  { %v602_v21 = vpop.permute.xlu2 %601 }
 0x69b   :  { %604 = vst.msk [vmem:[#allocation8] sm:$0x3] %vm264_vm11, %v602_v21 }
 0x69c   :  { %605 = vst.msk [vmem:[#allocation8] sm:$0x3] %vm266_vm12, %v593_v14 }
 0x6a3   :  { %v4115_v23 = vld [vmem:[#allocation8] sm:$0x3] }
 0x6a4   :  { %732 = vrot.lane.b32.xlu2 %v4115_v23, %s3779_s18 }
 0x6ee   :  { %v608_v24 = vpop.permute.xlu0 %607 }
 0x6ef   :  { %610 = vst.msk [vmem:[#allocation7] sm:$0x3] %vm264_vm11, %v608_v24 }
 0x6f0   :  { %616 = vst.msk [vmem:[#allocation3 + $0x4] sm:$0x3] %vm264_vm11, %v608_v24  ;;  %v808_v24 = vld [vmem:[#allocation2] sm:$0xc0] }
 0x6fe   :  { %v733_v2 = vpop.permute.xlu2 %732 }
 0x707   :  { %v613_v25 = vpop.permute.xlu1 %612 }
 0x708   :  { %615 = vst.msk [vmem:[#allocation7] sm:$0x3] %vm266_vm12, %v613_v25  ;;  %v810_v25 = vrot.slane %v808_v24, 6  ;;  %v967_v24 = vld [vmem:[%s5091_s2 + $0x58] sm:$0xff] }
 0x70f   :  { %v621_v19 = vld [vmem:[#allocation7] sm:$0x3] }
 0x710   :  { %3389 = vmatmul.msk.f32.vlgmr.msra.gmra.mxu0 %vm137_vm2, %v621_v19  ;;  %3390 = vmatmul.msk.f32.vlgmr.msra.gmra.mxu1 %vm137_vm2, %v621_v19  ;;  %v807_v19 = vld [vmem:[#allocation2 + $0x18] sm:$0x3] }
 0x78d   :  { %v667_v30 = vpop.f32.mrf.mxu0  ;;  %v687_v33 = vpop.f32.mrf.mxu1 }
 0x78e   :  { %v668_v34 = vadd.f32 %v667_v30, %v643_v28  ;;  %v688_v35 = vadd.f32 %v687_v33, %v639_v32 }
 0x790   :  { %3520 = vtanh.f32 %v668_v34  ;;  %v3391_v38 = vmul.f32 -1.442695, %v668_v34  ;;  %v3392_v39 = vmul.f32 -1.442695, %v688_v35 }
 0x791   :  { %3522 = vtanh.f32 %v688_v35 }
 0x792   :  { %3524 = vpow2.f32 %v3391_v38 }
 0x793   :  { %3526 = vpow2.f32 %v3392_v39 }
 0x796   :  { %v3521_v36 = vpop.eup %3520 }
 0x797   :  { %v3523_v37 = vpop.eup %3522  ;;  %737 = vrot.lane.b32.xlu0 %v3521_v36, %s3780_s3 }
 0x798   :  { %754 = vrot.lane.b32.xlu1 %v3523_v37, %s3780_s3  ;;  %v3525_v29 = vpop.eup %3524 }
 0x799   :  { %v3527_v31 = vpop.eup %3526  ;;  %v696_v40 = vadd.f32 1.0, %v3525_v29 }
 0x79a   :  { %v697_v41 = vadd.f32 1.0, %v3527_v31 }
 0x79b   :  { %3528 = vrcp.f32 %v696_v40  ;;  %v709_v52 = vand.u32 2147483648, %v696_v40  ;;  %vm703_vm7 = vweird.f32 %v696_v40  ;;  %v707_v54 = vand.u32 2147483647, %v696_v40 }
 0x79c   :  { %3530 = vrcp.f32 %v697_v41  ;;  %v724_v53 = vand.u32 2147483648, %v697_v41  ;;  %vm718_vm8 = vweird.f32 %v697_v41  ;;  %v722_v55 = vand.u32 2147483647, %v697_v41 }
 0x79d   :  { %v710_v58 = vor.u32 1.1754944e-38, %v709_v52  ;;  %vm708_vm13 = vcmp.eq.f32.partialorder %v707_v54, 8.507059e+37 }
 0x79e   :  { %v725_v59 = vor.u32 1.1754944e-38, %v724_v53  ;;  %vm723_vm14 = vcmp.eq.f32.partialorder %v722_v55, 8.507059e+37 }
 0x7a1   :  { %v3529_v42 = vpop.eup %3528 }
 0x7a2   :  { %v3531_v43 = vpop.eup %3530  ;;  %v699_v44 = vmul.f32 %v3529_v42, %v696_v40  ;;  %vm704_vm5 = vweird.f32 %v3529_v42 }
 0x7a3   :  { %v714_v45 = vmul.f32 %v3531_v43, %v697_v41  ;;  %vm719_vm6 = vweird.f32 %v3531_v43  ;;  %vm705_vm9 = vmor %vm703_vm7, %vm704_vm5 }
 0x7a4   :  { %v700_v46 = vsub.f32 1.0, %v699_v44  ;;  %vm720_vm10 = vmor %vm718_vm8, %vm719_vm6 }
 0x7a5   :  { %v715_v47 = vsub.f32 1.0, %v714_v45 }
 0x7a6   :  { %v701_v48 = vmul.f32 %v3529_v42, %v700_v46 }
 0x7a7   :  { %v716_v49 = vmul.f32 %v3531_v43, %v715_v47 }
 0x7a8   :  { %v702_v50 = vadd.f32 %v3529_v42, %v701_v48 }
 0x7a9   :  { %v717_v51 = vadd.f32 %v3531_v43, %v716_v49 }
 0x7aa   :  { %v706_v56 = vsel %vm705_vm9, %v3529_v42, %v702_v50 }
 0x7ab   :  { %v721_v57 = vsel %vm720_vm10, %v3531_v43, %v717_v51  ;;  %v711_v61 = vsel %vm708_vm13, %v710_v58, %v706_v56 }
 0x7ac   :  { %v726_v63 = vsel %vm723_vm14, %v725_v59, %v721_v57  ;;  %v735_v3 = vmul.f32 %v733_v2, %v711_v61 }
 0x7ad   :  { %v752_v4 = vmul.f32 %v4115_v23, %v726_v63 }
 0x809   :  { %v738_v60 = vpop.permute.xlu0 %737 }
 0x80a   :  { %v755_v62 = vpop.permute.xlu1 %754  ;;  %v740_v0 = vmul.f32 %v738_v60, %v711_v61 }
 0x80b   :  { %v757_v1 = vmul.f32 %v755_v62, %v726_v63 }
 0x80c   :  { %742 = vrot.lane.b32.xlu0 %v740_v0, %s3779_s18 }
 0x80d   :  { %759 = vrot.lane.b32.xlu1 %v757_v1, %s3779_s18 }
 0x87e   :  { %v743_v6 = vpop.permute.xlu0 %742 }
 0x87f   :  { %v760_v7 = vpop.permute.xlu1 %759  ;;  %v745_v8 = vadd.f32 %v743_v6, %v735_v3 }
 0x880   :  { %v762_v9 = vadd.f32 %v760_v7, %v752_v4 }
 0x881   :  { %3532 = vtanh.f32 %v745_v8 }
 0x882   :  { %3534 = vtanh.f32 %v762_v9 }
 0x887   :  { %v3533_v10 = vpop.eup %3532 }
 0x888   :  { %v3535_v11 = vpop.eup %3534  ;;  %748 = vrot.lane.b32.xlu2 %v3533_v10, %s3780_s3 }
 0x889   :  { %765 = vrot.lane.b32.xlu0 %v3535_v11, %s3780_s3 }
 0x891   :  { %770 = vrot.lane.b32.xlu0 %v745_v8, %s3781_s12 }
 0x8e2   :  { %v749_v12 = vpop.permute.xlu2 %748 }
 0x8e3   :  { %v751_v13 = vmul.f32 %v749_v12, %v711_v61 }
 0x8e5   :  { %776 = vrot.lane.b32.xlu1 %v751_v13, %s3779_s18 }
 0x8fb   :  { %v766_v14 = vpop.permute.xlu0 %765 }
 0x8fc   :  { %v4133_v15 = vmul.f32 %v766_v14, %v726_v63 }
 0x8fe   :  { %781 = vrot.lane.b32.xlu2 %v4133_v15, %s3780_s3 }
 0x903   :  { %v771_v16 = vpop.permute.xlu0 %770 }
 0x904   :  { %773 = vst.msk [vmem:[#allocation8] sm:$0x3] %vm264_vm11, %v771_v16  ;;  %v970_v16 = vld [vmem:[%s5091_s2 + $0x70] sm:$0xff] }
 0x905   :  { %774 = vst.msk [vmem:[#allocation8] sm:$0x3] %vm266_vm12, %v762_v9  ;;  %992 = vmatpush.msrb.mxu0 %v970_v16  ;;  %1161 = vmatpush.msrb.mxu2 %v970_v16 }
 0x90c   :  { %v4139_v17 = vld [vmem:[#allocation8] sm:$0x3] }
 0x90d   :  { %897 = vrot.lane.b32.xlu0 %v4139_v17, %s3779_s18 }
 0x957   :  { %v777_v18 = vpop.permute.xlu1 %776 }
 0x958   :  { %779 = vst.msk [vmem:[#allocation7] sm:$0x3] %vm264_vm11, %v777_v18  ;;  %v782_v21 = vpop.permute.xlu2 %781 }
 0x959   :  { %785 = vst.msk [vmem:[#allocation3 + $0x6] sm:$0x3] %vm264_vm11, %v777_v18  ;;  %v968_v18 = vld [vmem:[%s5091_s2 + $0x60] sm:$0xff] }
 0x95a   :  { %784 = vst.msk [vmem:[#allocation7] sm:$0x3] %vm266_vm12, %v782_v21  ;;  %v969_v21 = vld [vmem:[%s5091_s2 + $0x68] sm:$0xff]  ;;  %993 = vmatpush.msrb.mxu0 %v968_v18  ;;  %1162 = vmatpush.msrb.mxu2 %v968_v18 }
 0x961   :  { %v790_v23 = vld [vmem:[#allocation7] sm:$0x3] }
 0x962   :  { %3393 = vmatmul.msk.f32.vlgmr.msra.gmra.mxu2 %vm137_vm2, %v790_v23  ;;  %3394 = vmatmul.msk.f32.vlgmr.msra.gmra.mxu3 %vm137_vm2, %v790_v23  ;;  %v966_v23 = vld [vmem:[%s5091_s2 + $0x50] sm:$0xff] }
 0x963   :  { %994 = vmatpush.msrb.mxu0 %v966_v23  ;;  %1163 = vmatpush.msrb.mxu2 %v966_v23 }
 0x97f   :  { %v898_v3 = vpop.permute.xlu0 %897 }
 0x9e5   :  { %v832_v27 = vpop.f32.mrf.mxu2  ;;  %v852_v28 = vpop.f32.mrf.mxu3 }
 0x9e6   :  { %v833_v30 = vadd.f32 %v832_v27, %v807_v19  ;;  %v853_v32 = vadd.f32 %v852_v28, %v810_v25  ;;  %v964_v25 = vld [vmem:[%s5091_s2 + $0x40] sm:$0xff]  ;;  %v965_v19 = vld [vmem:[%s5091_s2 + $0x48] sm:$0xff]  ;;  %v962_v27 = vld [vmem:[%s5091_s2 + $0x30] sm:$0xff] }
 0x9e7   :  { %995 = vmatpush.msrb.mxu0 %v964_v25  ;;  %v963_v28 = vld [vmem:[%s5091_s2 + $0x38] sm:$0xff]  ;;  %1164 = vmatpush.msrb.mxu2 %v964_v25 }
 0x9e8   :  { %3536 = vtanh.f32 %v833_v30  ;;  %v3396_v35 = vmul.f32 -1.442695, %v853_v32  ;;  %v3395_v39 = vmul.f32 -1.442695, %v833_v30  ;;  %v960_v30 = vld [vmem:[%s5091_s2 + $0x20] sm:$0xff] }
 0x9e9   :  { %3538 = vtanh.f32 %v853_v32  ;;  %996 = vmatpush.msrb.mxu0 %v962_v27  ;;  %v961_v32 = vld [vmem:[%s5091_s2 + $0x28] sm:$0xff]  ;;  %1165 = vmatpush.msrb.mxu2 %v962_v27 }
 0x9ea   :  { %3540 = vpow2.f32 %v3396_v35  ;;  %v956_v35 = vld [vmem:[%s5091_s2] sm:$0xff] }
 0x9eb   :  { %997 = vmatpush.msrb.mxu0 %v960_v30  ;;  %1166 = vmatpush.msrb.mxu2 %v960_v30 }
 0x9ee   :  { %v3537_v33 = vpop.eup %3536 }
 0x9ef   :  { %v3539_v34 = vpop.eup %3538  ;;  %902 = vrot.lane.b32.xlu1 %v3537_v33, %s3780_s3  ;;  %v958_v33 = vld [vmem:[%s5091_s2 + $0x10] sm:$0xff] }
 0x9f0   :  { %919 = vrot.lane.b32.xlu2 %v3539_v34, %s3780_s3  ;;  %v3541_v36 = vpop.eup %3540  ;;  %v959_v34 = vld [vmem:[%s5091_s2 + $0x18] sm:$0xff]  ;;  %998 = vmatpush.msrb.mxu0 %v958_v33 }
 0x9f1   :  { %v862_v37 = vadd.f32 1.0, %v3541_v36  ;;  %v957_v36 = vld [vmem:[%s5091_s2 + $0x8] sm:$0xff]  ;;  %1167 = vmatpush.msrb.mxu2 %v958_v33 }
 0x9f2   :  { %999 = vmatpush.msrb.mxu0 %v956_v35 }
 0x9f3   :  { %3542 = vrcp.f32 %v862_v37  ;;  %v889_v44 = vand.u32 2147483648, %v862_v37  ;;  %vm883_vm3 = vweird.f32 %v862_v37  ;;  %v887_v45 = vand.u32 2147483647, %v862_v37  ;;  %1168 = vmatpush.msrb.mxu2 %v956_v35 }
 0x9f4   :  { %3544 = vpow2.f32 %v3395_v39  ;;  %1330 = vmatpush.msra.mxu0 %v970_v16 }
 0x9f5   :  { %v890_v47 = vor.u32 1.1754944e-38, %v889_v44  ;;  %vm888_vm5 = vcmp.eq.f32.partialorder %v887_v45, 8.507059e+37 }
 0x9f6   :  { %1331 = vmatpush.msra.mxu0 %v968_v18 }
 0x9f8   :  { %1332 = vmatpush.msra.mxu0 %v966_v23 }
 0x9f9   :  { %v3543_v38 = vpop.eup %3542 }
 0x9fa   :  { %v879_v29 = vmul.f32 %v3543_v38, %v862_v37  ;;  %v3545_v40 = vpop.eup %3544  ;;  %vm884_vm15 = vweird.f32 %v3543_v38  ;;  %1333 = vmatpush.msra.mxu0 %v964_v25 }
 0x9fb   :  { %v861_v42 = vadd.f32 1.0, %v3545_v40  ;;  %vm885_vm4 = vmor %vm883_vm3, %vm884_vm15 }
 0x9fc   :  { %v880_v31 = vsub.f32 1.0, %v879_v29  ;;  %1334 = vmatpush.msra.mxu0 %v962_v27  ;;  %v972_v29 = vld [vmem:[#allocation2 + $0x18] sm:$0xc] }
 0x9fd   :  { %3546 = vrcp.f32 %v861_v42  ;;  %v874_v56 = vand.u32 2147483648, %v861_v42  ;;  %vm868_vm7 = vweird.f32 %v861_v42  ;;  %v872_v57 = vand.u32 2147483647, %v861_v42 }
 0x9fe   :  { %v881_v41 = vmul.f32 %v3543_v38, %v880_v31  ;;  %1335 = vmatpush.msra.mxu0 %v960_v30  ;;  %v973_v31 = vld [vmem:[#allocation2] sm:$0x30]  ;;  %v977_v40 = vrot.slane %v972_v29, 2  ;;  %v1141_v29 = vld [vmem:[#allocation2 + $0x18] sm:$0x30] }
 0x9ff   :  { %v875_v59 = vor.u32 1.1754944e-38, %v874_v56  ;;  %vm873_vm9 = vcmp.eq.f32.partialorder %v872_v57, 8.507059e+37 }
 0xa00   :  { %v882_v43 = vadd.f32 %v3543_v38, %v881_v41  ;;  %1336 = vmatpush.msra.mxu0 %v958_v33  ;;  %v3397_v41 = vrot.slane %v973_v31, 4  ;;  %v1142_v31 = vld [vmem:[#allocation2] sm:$0xc] }
 0xa02   :  { %v886_v46 = vsel %vm885_vm4, %v3543_v38, %v882_v43  ;;  %1337 = vmatpush.msra.mxu0 %v956_v35 }
 0xa03   :  { %v891_v49 = vsel %vm888_vm5, %v890_v47, %v886_v46  ;;  %v3547_v50 = vpop.eup %3546 }
 0xa04   :  { %v864_v52 = vmul.f32 %v3547_v50, %v861_v42  ;;  %vm869_vm6 = vweird.f32 %v3547_v50  ;;  %v917_v63 = vmul.f32 %v4139_v17, %v891_v49  ;;  %v971_v17 = vld [vmem:[%s5091_s2 + $0x78] sm:$0xff]  ;;  %s3361_s2 = sshll.u32 %s5100_s11, 4  ;;  %s3362_s2 = int_to_ptr.hbm [resolvable:$true] %s3361_s2 }
 0xa05   :  { %vm870_vm8 = vmor %vm868_vm7, %vm869_vm6  ;;  %1012 = vmatpush.msrb.mxu1 %v971_v17  ;;  %1181 = vmatpush.msrb.mxu3 %v971_v17 }
 0xa06   :  { %v865_v53 = vsub.f32 1.0, %v864_v52 }
 0xa07   :  { %1013 = vmatpush.msrb.mxu1 %v969_v21  ;;  %1182 = vmatpush.msrb.mxu3 %v969_v21 }
 0xa08   :  { %v866_v54 = vmul.f32 %v3547_v50, %v865_v53 }
 0xa09   :  { %1014 = vmatpush.msrb.mxu1 %v967_v24  ;;  %1183 = vmatpush.msrb.mxu3 %v967_v24 }
 0xa0a   :  { %v867_v55 = vadd.f32 %v3547_v50, %v866_v54 }
 0xa0b   :  { %1015 = vmatpush.msrb.mxu1 %v965_v19  ;;  %1184 = vmatpush.msrb.mxu3 %v965_v19 }
 0xa0c   :  { %v871_v58 = vsel %vm870_vm8, %v3547_v50, %v867_v55 }
 0xa0d   :  { %v876_v61 = vsel %vm873_vm9, %v875_v59, %v871_v58  ;;  %1016 = vmatpush.msrb.mxu1 %v963_v28  ;;  %1185 = vmatpush.msrb.mxu3 %v963_v28 }
 0xa0e   :  { %v900_v4 = vmul.f32 %v898_v3, %v876_v61 }
 0xa0f   :  { %1017 = vmatpush.msrb.mxu1 %v961_v32  ;;  %1186 = vmatpush.msrb.mxu3 %v961_v32 }
 0xa11   :  { %1018 = vmatpush.msrb.mxu1 %v959_v34  ;;  %1187 = vmatpush.msrb.mxu3 %v959_v34 }
 0xa13   :  { %1019 = vmatpush.msrb.mxu1 %v957_v36  ;;  %1188 = vmatpush.msrb.mxu3 %v957_v36 }
 0xa15   :  { %1350 = vmatpush.msra.mxu1 %v971_v17 }
 0xa17   :  { %1351 = vmatpush.msra.mxu1 %v969_v21 }
 0xa19   :  { %1352 = vmatpush.msra.mxu1 %v967_v24 }
 0xa1b   :  { %1353 = vmatpush.msra.mxu1 %v965_v19 }
 0xa1d   :  { %1354 = vmatpush.msra.mxu1 %v963_v28 }
 0xa1f   :  { %1355 = vmatpush.msra.mxu1 %v961_v32 }
 0xa21   :  { %1356 = vmatpush.msra.mxu1 %v959_v34 }
 0xa23   :  { %1357 = vmatpush.msra.mxu1 %v957_v36 }
 0xa4a   :  { %v920_v48 = vpop.permute.xlu2 %919 }
 0xa4b   :  { %v922_v51 = vmul.f32 %v920_v48, %v891_v49 }
 0xa4d   :  { %924 = vrot.lane.b32.xlu2 %v922_v51, %s3779_s18 }
 0xa61   :  { %v903_v60 = vpop.permute.xlu1 %902 }
 0xa62   :  { %v905_v62 = vmul.f32 %v903_v60, %v876_v61 }
 0xa64   :  { %907 = vrot.lane.b32.xlu1 %v905_v62, %s3779_s18 }
 0xaa7   :  { %v925_v0 = vpop.permute.xlu2 %924 }
 0xaa8   :  { %v927_v1 = vadd.f32 %v925_v0, %v917_v63 }
 0xaaa   :  { %3548 = vtanh.f32 %v927_v1 }
 0xab0   :  { %v3549_v2 = vpop.eup %3548 }
 0xab1   :  { %930 = vrot.lane.b32.xlu1 %v3549_v2, %s3780_s3 }
 0xad6   :  { %v908_v6 = vpop.permute.xlu1 %907 }
 0xad7   :  { %v910_v7 = vadd.f32 %v908_v6, %v900_v4 }
 0xad9   :  { %3550 = vtanh.f32 %v910_v7  ;;  %935 = vrot.lane.b32.xlu1 %v910_v7, %s3781_s12 }
 0xadf   :  { %v3551_v8 = vpop.eup %3550 }
 0xae0   :  { %913 = vrot.lane.b32.xlu0 %v3551_v8, %s3780_s3 }
 0xb23   :  { %v931_v9 = vpop.permute.xlu1 %930 }
 0xb24   :  { %v4156_v10 = vmul.f32 %v931_v9, %v891_v49 }
 0xb26   :  { %946 = vrot.lane.b32.xlu0 %v4156_v10, %s3780_s3 }
 0xb4b   :  { %v936_v11 = vpop.permute.xlu1 %935 }
 0xb4c   :  { %938 = vst.msk [vmem:[#allocation8] sm:$0x3] %vm264_vm11, %v936_v11 }
 0xb4d   :  { %939 = vst.msk [vmem:[#allocation8] sm:$0x3] %vm266_vm12, %v927_v1 }
 0xb52   :  { %v914_v12 = vpop.permute.xlu0 %913 }
 0xb53   :  { %v916_v13 = vmul.f32 %v914_v12, %v876_v61 }
 0xb54   :  { %v4162_v14 = vld [vmem:[#allocation8] sm:$0x3] }
 0xb55   :  { %1066 = vrot.lane.b32.xlu1 %v4162_v14, %s3779_s18  ;;  %941 = vrot.lane.b32.xlu2 %v916_v13, %s3779_s18 }
 0xb98   :  { %v947_v38 = vpop.permute.xlu0 %946 }
 0xbaf   :  { %v942_v37 = vpop.permute.xlu2 %941 }
 0xbb0   :  { %944 = vst.msk [vmem:[#allocation7] sm:$0x3] %vm264_vm11, %v942_v37 }
 0xbb1   :  { %949 = vst.msk [vmem:[#allocation7] sm:$0x3] %vm266_vm12, %v947_v38 }
 0xbb2   :  { %950 = vst.msk [vmem:[#allocation3 + $0x8] sm:$0x3] %vm264_vm11, %v942_v37 }
 0xbb8   :  { %v955_v39 = vld [vmem:[#allocation7] sm:$0x3] }
 0xbb9   :  { %3398 = vmatmul.msk.f32.vlgmr.msrb.gmra.mxu0 %vm137_vm2, %v955_v39  ;;  %3399 = vmatmul.msk.f32.vlgmr.msrb.gmra.mxu1 %vm137_vm2, %v955_v39 }
 0xbc7   :  { %v1067_v18 = vpop.permute.xlu1 %1066 }
 0xc36   :  { %v1001_v42 = vpop.f32.mrf.mxu0  ;;  %v1021_v43 = vpop.f32.mrf.mxu1 }
 0xc37   :  { %v1002_v44 = vadd.f32 %v1001_v42, %v977_v40  ;;  %v1022_v45 = vadd.f32 %v3397_v41, %v1021_v43  ;;  %v1146_v40 = vrot.slane %v1141_v29, 4  ;;  %v3402_v41 = vrot.slane %v1142_v31, 10 }
 0xc39   :  { %3552 = vtanh.f32 %v1002_v44  ;;  %v3400_v48 = vmul.f32 -1.442695, %v1002_v44  ;;  %v3401_v52 = vmul.f32 -1.442695, %v1022_v45 }
 0xc3a   :  { %3554 = vtanh.f32 %v1022_v45 }
 0xc3b   :  { %3556 = vpow2.f32 %v3400_v48 }
 0xc3f   :  { %v3553_v46 = vpop.eup %3552 }
 0xc40   :  { %v3555_v47 = vpop.eup %3554  ;;  %1071 = vrot.lane.b32.xlu2 %v3553_v46, %s3780_s3 }
 0xc41   :  { %1088 = vrot.lane.b32.xlu0 %v3555_v47, %s3780_s3  ;;  %v3557_v49 = vpop.eup %3556 }
 0xc42   :  { %v1030_v50 = vadd.f32 1.0, %v3557_v49 }
 0xc44   :  { %3558 = vrcp.f32 %v1030_v50  ;;  %v1043_v59 = vand.u32 2147483648, %v1030_v50  ;;  %vm1037_vm13 = vweird.f32 %v1030_v50  ;;  %v1041_v60 = vand.u32 2147483647, %v1030_v50 }
 0xc45   :  { %3560 = vpow2.f32 %v3401_v52 }
 0xc46   :  { %v1044_v62 = vor.u32 1.1754944e-38, %v1043_v59  ;;  %vm1042_vm15 = vcmp.eq.f32.partialorder %v1041_v60, 8.507059e+37 }
 0xc4a   :  { %v3559_v51 = vpop.eup %3558 }
 0xc4b   :  { %v1033_v53 = vmul.f32 %v3559_v51, %v1030_v50  ;;  %v3561_v56 = vpop.eup %3560  ;;  %vm1038_vm10 = vweird.f32 %v3559_v51 }
 0xc4c   :  { %v1031_v57 = vadd.f32 1.0, %v3561_v56  ;;  %vm1039_vm14 = vmor %vm1037_vm13, %vm1038_vm10 }
 0xc4d   :  { %v1034_v54 = vsub.f32 1.0, %v1033_v53 }
 0xc4e   :  { %3562 = vrcp.f32 %v1031_v57  ;;  %v1058_v8 = vand.u32 2147483648, %v1031_v57  ;;  %vm1052_vm4 = vweird.f32 %v1031_v57  ;;  %v1056_v9 = vand.u32 2147483647, %v1031_v57 }
 0xc4f   :  { %v1035_v55 = vmul.f32 %v3559_v51, %v1034_v54 }
 0xc50   :  { %v1059_v12 = vor.u32 1.1754944e-38, %v1058_v8  ;;  %vm1057_vm6 = vcmp.eq.f32.partialorder %v1056_v9, 8.507059e+37 }
 0xc51   :  { %v1036_v58 = vadd.f32 %v3559_v51, %v1035_v55 }
 0xc53   :  { %v1040_v61 = vsel %vm1039_vm14, %v3559_v51, %v1036_v58 }
 0xc54   :  { %v1045_v0 = vsel %vm1042_vm15, %v1044_v62, %v1040_v61  ;;  %v3563_v2 = vpop.eup %3562 }
 0xc55   :  { %v1048_v3 = vmul.f32 %v3563_v2, %v1031_v57  ;;  %vm1053_vm3 = vweird.f32 %v3563_v2  ;;  %v1069_v21 = vmul.f32 %v1067_v18, %v1045_v0 }
 0xc56   :  { %vm1054_vm5 = vmor %vm1052_vm4, %vm1053_vm3 }
 0xc57   :  { %v1049_v4 = vsub.f32 1.0, %v1048_v3 }
 0xc59   :  { %v1050_v6 = vmul.f32 %v3563_v2, %v1049_v4 }
 0xc5b   :  { %v1051_v7 = vadd.f32 %v3563_v2, %v1050_v6 }
 0xc5d   :  { %v1055_v11 = vsel %vm1054_vm5, %v3563_v2, %v1051_v7 }
 0xc5e   :  { %v1060_v16 = vsel %vm1057_vm6, %v1059_v12, %v1055_v11 }
 0xc5f   :  { %v1086_v19 = vmul.f32 %v4162_v14, %v1060_v16 }
 0xc9a   :  { %v1072_v63 = vpop.permute.xlu2 %1071 }
 0xc9b   :  { %v1074_v1 = vmul.f32 %v1072_v63, %v1045_v0 }
 0xc9d   :  { %1076 = vrot.lane.b32.xlu2 %v1074_v1, %s3779_s18 }
 0xcb3   :  { %v1089_v13 = vpop.permute.xlu0 %1088 }
 0xcb4   :  { %v1091_v17 = vmul.f32 %v1089_v13, %v1060_v16 }
 0xcb6   :  { %1093 = vrot.lane.b32.xlu0 %v1091_v17, %s3779_s18 }
 0xcf7   :  { %v1077_v23 = vpop.permute.xlu2 %1076 }
 0xcf8   :  { %v1079_v24 = vadd.f32 %v1077_v23, %v1069_v21 }
 0xcfa   :  { %3564 = vtanh.f32 %v1079_v24 }
 0xd00   :  { %v3565_v25 = vpop.eup %3564 }
 0xd01   :  { %1082 = vrot.lane.b32.xlu1 %v3565_v25, %s3780_s3 }
 0xd28   :  { %v1094_v27 = vpop.permute.xlu0 %1093 }
 0xd29   :  { %v1096_v28 = vadd.f32 %v1094_v27, %v1086_v19 }
 0xd2b   :  { %3566 = vtanh.f32 %v1096_v28 }
 0xd31   :  { %v3567_v30 = vpop.eup %3566 }
 0xd32   :  { %1099 = vrot.lane.b32.xlu2 %v3567_v30, %s3780_s3 }
 0xd3a   :  { %1104 = vrot.lane.b32.xlu2 %v1079_v24, %s3781_s12 }
 0xd73   :  { %v1083_v32 = vpop.permute.xlu1 %1082 }
 0xd74   :  { %v1085_v33 = vmul.f32 %v1083_v32, %v1045_v0 }
 0xd76   :  { %1110 = vrot.lane.b32.xlu0 %v1085_v33, %s3779_s18 }
 0xd8c   :  { %v1100_v34 = vpop.permute.xlu2 %1099 }
 0xd8d   :  { %v4229_v35 = vmul.f32 %v1100_v34, %v1060_v16 }
 0xd8f   :  { %1115 = vrot.lane.b32.xlu1 %v4229_v35, %s3780_s3 }
 0xd94   :  { %v1105_v36 = vpop.permute.xlu2 %1104 }
 0xd95   :  { %1107 = vst.msk [vmem:[#allocation8] sm:$0x3] %vm264_vm11, %v1105_v36 }
 0xd96   :  { %1108 = vst.msk [vmem:[#allocation8] sm:$0x3] %vm266_vm12, %v1096_v28 }
 0xd9d   :  { %v4235_v14 = vld [vmem:[#allocation8] sm:$0x3] }
 0xd9e   :  { %1235 = vrot.lane.b32.xlu2 %v4235_v14, %s3779_s18 }
 0xde8   :  { %v1111_v37 = vpop.permute.xlu0 %1110 }
 0xde9   :  { %1113 = vst.msk [vmem:[#allocation7] sm:$0x3] %vm264_vm11, %v1111_v37 }
 0xdea   :  { %1119 = vst.msk [vmem:[#allocation3 + $0xa] sm:$0x3] %vm264_vm11, %v1111_v37 }
 0xdf8   :  { %v1236_v18 = vpop.permute.xlu2 %1235 }
 0xe01   :  { %v1116_v38 = vpop.permute.xlu1 %1115 }
 0xe02   :  { %1118 = vst.msk [vmem:[#allocation7] sm:$0x3] %vm266_vm12, %v1116_v38 }
 0xe09   :  { %v1124_v39 = vld [vmem:[#allocation7] sm:$0x3] }
 0xe0a   :  { %3403 = vmatmul.msk.f32.vlgmr.msrb.gmra.mxu2 %vm137_vm2, %v1124_v39  ;;  %3404 = vmatmul.msk.f32.vlgmr.msrb.gmra.mxu3 %vm137_vm2, %v1124_v39 }
 0xe8d   :  { %v1170_v42 = vpop.f32.mrf.mxu2  ;;  %v1190_v43 = vpop.f32.mrf.mxu3 }
 0xe8e   :  { %v1171_v44 = vadd.f32 %v1170_v42, %v1146_v40  ;;  %v1191_v45 = vadd.f32 %v3402_v41, %v1190_v43  ;;  %v1311_v40 = vld [vmem:[#allocation2] sm:$0x3]  ;;  %v1310_v43 = vld [vmem:[#allocation2 + $0x18] sm:$0xc0] }
 0xe90   :  { %3568 = vtanh.f32 %v1171_v44  ;;  %v3405_v48 = vmul.f32 -1.442695, %v1171_v44  ;;  %v3406_v49 = vmul.f32 -1.442695, %v1191_v45 }
 0xe91   :  { %3570 = vtanh.f32 %v1191_v45 }
 0xe92   :  { %3572 = vpow2.f32 %v3405_v48 }
 0xe93   :  { %3574 = vpow2.f32 %v3406_v49 }
 0xe96   :  { %v3569_v46 = vpop.eup %3568 }
 0xe97   :  { %v3571_v47 = vpop.eup %3570  ;;  %1240 = vrot.lane.b32.xlu0 %v3569_v46, %s3780_s3  ;;  %v1315_v46 = vrot.slane %v1310_v43, 6  ;;  %v1482_v43 = vld [vmem:[%s5093_s4 + $0x30] sm:$0xff] }
 0xe98   :  { %1257 = vrot.lane.b32.xlu1 %v3571_v47, %s3780_s3  ;;  %v3573_v50 = vpop.eup %3572 }
 0xe99   :  { %v3575_v51 = vpop.eup %3574  ;;  %v1199_v52 = vadd.f32 1.0, %v3573_v50 }
 0xe9a   :  { %v1200_v53 = vadd.f32 1.0, %v3575_v51 }
 0xe9b   :  { %3576 = vrcp.f32 %v1199_v52  ;;  %v1212_v0 = vand.u32 2147483648, %v1199_v52  ;;  %vm1206_vm9 = vweird.f32 %v1199_v52  ;;  %v1210_v2 = vand.u32 2147483647, %v1199_v52 }
 0xe9c   :  { %3578 = vrcp.f32 %v1200_v53  ;;  %v1227_v1 = vand.u32 2147483648, %v1200_v53  ;;  %vm1221_vm10 = vweird.f32 %v1200_v53  ;;  %v1225_v3 = vand.u32 2147483647, %v1200_v53 }
 0xe9d   :  { %v1213_v7 = vor.u32 1.1754944e-38, %v1212_v0  ;;  %vm1211_vm15 = vcmp.eq.f32.partialorder %v1210_v2, 8.507059e+37 }
 0xe9e   :  { %v1228_v8 = vor.u32 1.1754944e-38, %v1227_v1  ;;  %vm1226_vm3 = vcmp.eq.f32.partialorder %v1225_v3, 8.507059e+37 }
 0xea1   :  { %v3577_v54 = vpop.eup %3576 }
 0xea2   :  { %v3579_v55 = vpop.eup %3578  ;;  %v1202_v56 = vmul.f32 %v3577_v54, %v1199_v52  ;;  %vm1207_vm7 = vweird.f32 %v3577_v54 }
 0xea3   :  { %v1217_v57 = vmul.f32 %v3579_v55, %v1200_v53  ;;  %vm1222_vm8 = vweird.f32 %v3579_v55  ;;  %vm1208_vm13 = vmor %vm1206_vm9, %vm1207_vm7 }
 0xea4   :  { %v1203_v58 = vsub.f32 1.0, %v1202_v56  ;;  %vm1223_vm14 = vmor %vm1221_vm10, %vm1222_vm8 }
 0xea5   :  { %v1218_v59 = vsub.f32 1.0, %v1217_v57 }
 0xea6   :  { %v1204_v60 = vmul.f32 %v3577_v54, %v1203_v58 }
 0xea7   :  { %v1219_v61 = vmul.f32 %v3579_v55, %v1218_v59 }
 0xea8   :  { %v1205_v62 = vadd.f32 %v3577_v54, %v1204_v60 }
 0xea9   :  { %v1220_v63 = vadd.f32 %v3579_v55, %v1219_v61 }
 0xeaa   :  { %v1209_v4 = vsel %vm1208_vm13, %v3577_v54, %v1205_v62 }
 0xeab   :  { %v1224_v6 = vsel %vm1223_vm14, %v3579_v55, %v1220_v63  ;;  %v1214_v11 = vsel %vm1211_vm15, %v1213_v7, %v1209_v4 }
 0xeac   :  { %v1229_v13 = vsel %vm1226_vm3, %v1228_v8, %v1224_v6  ;;  %v1238_v21 = vmul.f32 %v1236_v18, %v1214_v11 }
 0xead   :  { %v1255_v23 = vmul.f32 %v4235_v14, %v1229_v13 }
 0xf09   :  { %v1241_v9 = vpop.permute.xlu0 %1240 }
 0xf0a   :  { %v1258_v12 = vpop.permute.xlu1 %1257  ;;  %v1243_v16 = vmul.f32 %v1241_v9, %v1214_v11 }
 0xf0b   :  { %v1260_v17 = vmul.f32 %v1258_v12, %v1229_v13 }
 0xf0c   :  { %1245 = vrot.lane.b32.xlu0 %v1243_v16, %s3779_s18 }
 0xf0d   :  { %1262 = vrot.lane.b32.xlu1 %v1260_v17, %s3779_s18 }
 0xf7e   :  { %v1246_v24 = vpop.permute.xlu0 %1245 }
 0xf7f   :  { %v1263_v25 = vpop.permute.xlu1 %1262  ;;  %v1248_v19 = vadd.f32 %v1246_v24, %v1238_v21 }
 0xf80   :  { %v1265_v27 = vadd.f32 %v1263_v25, %v1255_v23 }
 0xf81   :  { %3580 = vtanh.f32 %v1248_v19 }
 0xf82   :  { %3582 = vtanh.f32 %v1265_v27 }
 0xf87   :  { %v3581_v28 = vpop.eup %3580 }
 0xf88   :  { %v3583_v30 = vpop.eup %3582  ;;  %1251 = vrot.lane.b32.xlu2 %v3581_v28, %s3780_s3 }
 0xf89   :  { %1268 = vrot.lane.b32.xlu0 %v3583_v30, %s3780_s3 }
 0xfe2   :  { %v1252_v32 = vpop.permute.xlu2 %1251 }
 0xfe3   :  { %v1254_v33 = vmul.f32 %v1252_v32, %v1214_v11 }
 0xfe5   :  { %1279 = vrot.lane.b32.xlu1 %v1254_v33, %s3779_s18 }
 0xfed   :  { %1273 = vrot.lane.b32.xlu1 %v1248_v19, %s3781_s12 }
 0xffb   :  { %v1269_v34 = vpop.permute.xlu0 %1268 }
 0xffc   :  { %v4253_v36 = vmul.f32 %v1269_v34, %v1229_v13 }
 0xffe   :  { %1284 = vrot.lane.b32.xlu2 %v4253_v36, %s3780_s3 }
0x1057   :  { %v1280_v14 = vpop.permute.xlu1 %1279 }
0x1058   :  { %1282 = vst.msk [vmem:[#allocation7] sm:$0x3] %vm264_vm11, %v1280_v14  ;;  %v1285_v37 = vpop.permute.xlu2 %1284 }
0x1059   :  { %1288 = vst.msk [vmem:[#allocation3 + $0xc] sm:$0x3] %vm264_vm11, %v1280_v14 }
0x105a   :  { %1287 = vst.msk [vmem:[#allocation7] sm:$0x3] %vm266_vm12, %v1285_v37 }
0x105f   :  { %v1274_v38 = vpop.permute.xlu1 %1273 }
0x1060   :  { %1276 = vst.msk [vmem:[#allocation8] sm:$0x3] %vm264_vm11, %v1274_v38  ;;  %v1491_v38 = vld [vmem:[%s5093_s4 + $0x78] sm:$0xff] }
0x1061   :  { %v1293_v39 = vld [vmem:[#allocation7] sm:$0x3]  ;;  %1277 = vst.msk [vmem:[#allocation8] sm:$0x3] %vm266_vm12, %v1265_v27  ;;  %1535 = vmatpush.msra.mxu3 %v1491_v38 }
0x1062   :  { %3408 = vmatmul.msk.f32.vlgmr.msra.gmra.mxu0 %vm137_vm2, %v1293_v39  ;;  %3409 = vmatmul.msk.f32.vlgmr.msra.gmra.mxu1 %vm137_vm2, %v1293_v39  ;;  %v1489_v39 = vld [vmem:[%s5093_s4 + $0x68] sm:$0xff] }
0x1063   :  { %1536 = vmatpush.msra.mxu3 %v1489_v39 }
0x1068   :  { %v4264_v29 = vld [vmem:[#allocation8] sm:$0x3] }
0x1069   :  { %1404 = vrot.lane.b32.xlu1 %v4264_v29, %s3779_s18 }
0x1071   :  { %951 = vrot.lane.b32.xlu1 %v4156_v10, %s3779_s18 }
0x10db   :  { %v4270_v31 = vpop.permute.xlu1 %1404 }
0x10df   :  { %v1359_v41 = vpop.f32.mrf.mxu1  ;;  %v1339_v45 = vpop.f32.mrf.mxu0 }
0x10e0   :  { %v1360_v42 = vadd.f32 %v1359_v41, %v1311_v40  ;;  %v1340_v47 = vadd.f32 %v1339_v45, %v1315_v46  ;;  %v1484_v40 = vld [vmem:[%s5093_s4 + $0x40] sm:$0xff]  ;;  %v1485_v41 = vld [vmem:[%s5093_s4 + $0x48] sm:$0xff] }
0x10e1   :  { %v1480_v45 = vld [vmem:[%s5093_s4 + $0x20] sm:$0xff]  ;;  %v1481_v46 = vld [vmem:[%s5093_s4 + $0x28] sm:$0xff] }
0x10e2   :  { %3584 = vtanh.f32 %v1360_v42  ;;  %v3411_v10 = vmul.f32 -1.442695, %v1360_v42  ;;  %v3410_v50 = vmul.f32 -1.442695, %v1340_v47 }
0x10e3   :  { %v952_v44 = vpop.permute.xlu1 %951  ;;  %3586 = vtanh.f32 %v1340_v47  ;;  %v1478_v47 = vld [vmem:[%s5093_s4 + $0x10] sm:$0xff] }
0x10e4   :  { %954 = vst.msk [vmem:[#allocation4 + $0x6] sm:$0x3] %vm264_vm11, %v952_v44  ;;  %3588 = vpow2.f32 %v3411_v10  ;;  %v1483_v44 = vld [vmem:[%s5093_s4 + $0x38] sm:$0xff] }
0x10e5   :  { %3590 = vpow2.f32 %v3410_v50 }
0x10e8   :  { %v3585_v48 = vpop.eup %3584 }
0x10e9   :  { %1426 = vrot.lane.b32.xlu0 %v3585_v48, %s3780_s3  ;;  %v3587_v49 = vpop.eup %3586  ;;  %v1479_v48 = vld [vmem:[%s5093_s4 + $0x18] sm:$0xff] }
0x10ea   :  { %v3589_v51 = vpop.eup %3588 }
0x10eb   :  { %v1369_v52 = vadd.f32 1.0, %v3589_v51  ;;  %v3591_v53 = vpop.eup %3590 }
0x10ec   :  { %v1368_v54 = vadd.f32 1.0, %v3591_v53  ;;  %v1476_v53 = vld [vmem:[%s5093_s4] sm:$0xff] }
0x10ed   :  { %3592 = vrcp.f32 %v1369_v52  ;;  %v1396_v63 = vand.u32 2147483648, %v1369_v52  ;;  %vm1390_vm5 = vweird.f32 %v1369_v52  ;;  %v1394_v0 = vand.u32 2147483647, %v1369_v52 }
0x10ee   :  { %3594 = vrcp.f32 %v1368_v54  ;;  %v1381_v9 = vand.u32 2147483648, %v1368_v54  ;;  %vm1375_vm9 = vweird.f32 %v1368_v54  ;;  %v1379_v11 = vand.u32 2147483647, %v1368_v54 }
0x10ef   :  { %v1397_v3 = vor.u32 1.1754944e-38, %v1396_v63  ;;  %vm1395_vm7 = vcmp.eq.f32.partialorder %v1394_v0, 8.507059e+37  ;;  %v1462_v0 = vld [vmem:[#allocation3] sm:$0xff] }
0x10f0   :  { %v1382_v13 = vor.u32 1.1754944e-38, %v1381_v9  ;;  %vm1380_vm13 = vcmp.eq.f32.partialorder %v1379_v11, 8.507059e+37  ;;  %v1564_v9 = vld [vmem:[%s5094_s5 + $0x38] sm:$0xff]  ;;  %v1562_v11 = vld [vmem:[%s5094_s5 + $0x28] sm:$0xff] }
0x10f1   :  { %1409 = vrot.lane.b32.xlu0 %v3587_v49, %s3780_s3 }
0x10f3   :  { %v3593_v55 = vpop.eup %3592 }
0x10f4   :  { %v1386_v56 = vmul.f32 %v3593_v55, %v1369_v52  ;;  %v3595_v58 = vpop.eup %3594  ;;  %vm1391_vm4 = vweird.f32 %v3593_v55 }
0x10f5   :  { %v1371_v60 = vmul.f32 %v3595_v58, %v1368_v54  ;;  %vm1392_vm6 = vmor %vm1390_vm5, %vm1391_vm4  ;;  %vm1376_vm8 = vweird.f32 %v3595_v58  ;;  %v1477_v54 = vld [vmem:[%s5093_s4 + $0x8] sm:$0xff] }
0x10f6   :  { %v1387_v57 = vsub.f32 1.0, %v1386_v56  ;;  %vm1377_vm10 = vmor %vm1375_vm9, %vm1376_vm8  ;;  %v1569_v56 = vld [vmem:[%s5094_s5 + $0x60] sm:$0xff] }
0x10f7   :  { %v1372_v62 = vsub.f32 1.0, %v1371_v60  ;;  %v4384_v60 = vld [vmem:[%s5094_s5 + $0x20] sm:$0xff] }
0x10f8   :  { %v1388_v59 = vmul.f32 %v3593_v55, %v1387_v57  ;;  %v1567_v57 = vld [vmem:[%s5094_s5 + $0x50] sm:$0xff] }
0x10f9   :  { %v1373_v2 = vmul.f32 %v3595_v58, %v1372_v62  ;;  %v4396_v62 = vld [vmem:[%s5094_s5] sm:$0xff] }
0x10fa   :  { %v1389_v61 = vadd.f32 %v3593_v55, %v1388_v59  ;;  %v1563_v59 = vld [vmem:[%s5094_s5 + $0x30] sm:$0xff] }
0x10fb   :  { %v1374_v8 = vadd.f32 %v3595_v58, %v1373_v2 }
0x10fc   :  { %v1393_v1 = vsel %vm1392_vm6, %v3593_v55, %v1389_v61  ;;  %v1571_v55 = vld [vmem:[%s5094_s5 + $0x70] sm:$0xff] }
0x10fd   :  { %v1398_v6 = vsel %vm1395_vm7, %v1397_v3, %v1393_v1  ;;  %v1378_v12 = vsel %vm1377_vm10, %v3595_v58, %v1374_v8  ;;  %1589 = vmatpush.msrb.mxu0 %v1571_v55  ;;  %v1565_v58 = vld [vmem:[%s5094_s5 + $0x40] sm:$0xff]  ;;  %v4389_v61 = vld [vmem:[%s5094_s5 + $0x10] sm:$0xff]  ;;  %v4411_v3 = vld [vmem:[%s5094_s5 + $0x78] sm:$0xff] }
0x10fe   :  { %v1383_v17 = vsel %vm1380_vm13, %v1382_v13, %v1378_v12  ;;  %v1424_v21 = vmul.f32 %v4264_v29, %v1398_v6  ;;  %v1486_v29 = vld [vmem:[%s5093_s4 + $0x50] sm:$0xff]  ;;  %1609 = vmatpush.msrb.mxu1 %v4411_v3  ;;  %v1560_v12 = vld [vmem:[%s5094_s5 + $0x18] sm:$0xff]  ;;  %v1558_v13 = vld [vmem:[%s5094_s5 + $0x8] sm:$0xff] }
0x10ff   :  { %v1407_v25 = vmul.f32 %v4270_v31, %v1383_v17  ;;  %v1487_v31 = vld [vmem:[%s5093_s4 + $0x58] sm:$0xff]  ;;  %1590 = vmatpush.msrb.mxu0 %v1569_v56 }
0x1100   :  { %1537 = vmatpush.msra.mxu3 %v1487_v31 }
0x1101   :  { %1591 = vmatpush.msrb.mxu0 %v1567_v57 }
0x1102   :  { %1538 = vmatpush.msra.mxu3 %v1485_v41 }
0x1103   :  { %1592 = vmatpush.msrb.mxu0 %v1565_v58 }
0x1104   :  { %1539 = vmatpush.msra.mxu3 %v1483_v44 }
0x1105   :  { %1593 = vmatpush.msrb.mxu0 %v1563_v59 }
0x1106   :  { %1540 = vmatpush.msra.mxu3 %v1481_v46 }
0x1107   :  { %1594 = vmatpush.msrb.mxu0 %v4384_v60 }
0x1108   :  { %1541 = vmatpush.msra.mxu3 %v1479_v48 }
0x1109   :  { %1595 = vmatpush.msrb.mxu0 %v4389_v61 }
0x110a   :  { %1542 = vmatpush.msra.mxu3 %v1477_v54 }
0x110b   :  { %1596 = vmatpush.msrb.mxu0 %v4396_v62 }
0x110c   :  { %1778 = vmatpush.msrb.mxu3 %v4411_v3 }
0x110d   :  { %1927 = vmatpush.msra.mxu0 %v1571_v55 }
0x110f   :  { %1928 = vmatpush.msra.mxu0 %v1569_v56 }
0x1111   :  { %1929 = vmatpush.msra.mxu0 %v1567_v57 }
0x1113   :  { %1930 = vmatpush.msra.mxu0 %v1565_v58 }
0x1115   :  { %1931 = vmatpush.msra.mxu0 %v1563_v59 }
0x1117   :  { %1932 = vmatpush.msra.mxu0 %v4384_v60 }
0x1119   :  { %1933 = vmatpush.msra.mxu0 %v4389_v61 }
0x111b   :  { %1934 = vmatpush.msra.mxu0 %v4396_v62 }
0x115b   :  { %v1427_v4 = vpop.permute.xlu0 %1426 }
0x115c   :  { %v1429_v7 = vmul.f32 %v1427_v4, %v1398_v6  ;;  %v4416_v4 = vld [vmem:[%s5094_s5 + $0x68] sm:$0xff] }
0x115d   :  { %1610 = vmatpush.msrb.mxu1 %v4416_v4  ;;  %1779 = vmatpush.msrb.mxu3 %v4416_v4 }
0x115e   :  { %1431 = vrot.lane.b32.xlu2 %v1429_v7, %s3779_s18  ;;  %v1566_v7 = vld [vmem:[%s5094_s5 + $0x48] sm:$0xff] }
0x1163   :  { %v1410_v16 = vpop.permute.xlu0 %1409 }
0x1164   :  { %v1412_v18 = vmul.f32 %v1410_v16, %v1383_v17 }
0x1166   :  { %1414 = vrot.lane.b32.xlu2 %v1412_v18, %s3779_s18 }
0x116e   :  { %1120 = vrot.lane.b32.xlu2 %v4229_v35, %s3779_s18 }
0x11b8   :  { %v1432_v23 = vpop.permute.xlu2 %1431 }
0x11b9   :  { %v4280_v24 = vadd.f32 %v1432_v23, %v1424_v21  ;;  %v1492_v21 = vld [vmem:[%s5095_s6] sm:$0x3] }
0x11ba   :  { %v1494_v23 = vperm.slane %v1492_v21, 0 }
0x11bb   :  { %3596 = vtanh.f32 %v4280_v24 }
0x11c0   :  { %v1415_v19 = vpop.permute.xlu2 %1414 }
0x11c1   :  { %v3597_v27 = vpop.eup %3596  ;;  %v4284_v28 = vadd.f32 %v1415_v19, %v1407_v25 }
0x11c2   :  { %1437 = vrot.lane.b32.xlu0 %v3597_v27, %s3780_s3 }
0x11c3   :  { %3598 = vtanh.f32 %v4284_v28 }
0x11c8   :  { %v1121_v30 = vpop.permute.xlu2 %1120 }
0x11c9   :  { %v3599_v32 = vpop.eup %3598  ;;  %1123 = vst.msk [vmem:[#allocation4 + $0x4] sm:$0x3] %vm264_vm11, %v1121_v30 }
0x11ca   :  { %1289 = vrot.lane.b32.xlu0 %v4253_v36, %s3779_s18  ;;  %1420 = vrot.lane.b32.xlu2 %v3599_v32, %s3780_s3 }
0x11d2   :  { %279 = vrot.lane.b32.xlu0 %v4059_v26, %s3779_s18  ;;  %617 = vrot.lane.b32.xlu2 %v4109_v20, %s3779_s18 }
0x11da   :  { %786 = vrot.lane.b32.xlu0 %v4133_v15, %s3779_s18  ;;  %v1490_v15 = vld [vmem:[%s5093_s4 + $0x70] sm:$0xff] }
0x11db   :  { %1512 = vmatpush.msra.mxu2 %v1490_v15 }
0x1224   :  { %v1421_v35 = vpop.permute.xlu2 %1420 }
0x1225   :  { %v1423_v37 = vmul.f32 %v1421_v35, %v1383_v17 }
0x122c   :  { %v618_v33 = vpop.permute.xlu2 %617 }
0x122d   :  { %620 = vst.msk [vmem:[#allocation4 + $0xa] sm:$0x3] %vm264_vm11, %v618_v33 }
0x1234   :  { %v1438_v34 = vpop.permute.xlu0 %1437 }
0x1235   :  { %v1440_v14 = vmul.f32 %v1438_v34, %v1398_v6  ;;  %v4423_v6 = vld [vmem:[%s5094_s5 + $0x58] sm:$0xff] }
0x1236   :  { %1611 = vmatpush.msrb.mxu1 %v4423_v6  ;;  %1780 = vmatpush.msrb.mxu3 %v4423_v6 }
0x1237   :  { %1458 = vrot.lane.b32.xlu1 %v1440_v14, %s3779_s18 }
0x1238   :  { %1612 = vmatpush.msrb.mxu1 %v1566_v7  ;;  %1781 = vmatpush.msrb.mxu3 %v1566_v7 }
0x123a   :  { %1613 = vmatpush.msrb.mxu1 %v1564_v9  ;;  %1782 = vmatpush.msrb.mxu3 %v1564_v9 }
0x123c   :  { %v1290_v36 = vpop.permute.xlu0 %1289  ;;  %1614 = vmatpush.msrb.mxu1 %v1562_v11  ;;  %1783 = vmatpush.msrb.mxu3 %v1562_v11 }
0x123d   :  { %1292 = vst.msk [vmem:[#allocation4 + $0x2] sm:$0x3] %vm264_vm11, %v1290_v36 }
0x123e   :  { %1615 = vmatpush.msrb.mxu1 %v1560_v12  ;;  %1784 = vmatpush.msrb.mxu3 %v1560_v12 }
0x123f   :  { %448 = vrot.lane.b32.xlu1 %v4084_v22, %s3779_s18  ;;  %v1488_v22 = vld [vmem:[%s5093_s4 + $0x60] sm:$0xff]  ;;  %s3359_s4 = sshll.u32 %s3783_s24, 4  ;;  %s3360_s4 = int_to_ptr.vmem [resolvable:$true] %s3359_s4 }
0x1240   :  { %1513 = vmatpush.msra.mxu2 %v1488_v22  ;;  %1616 = vmatpush.msrb.mxu1 %v1558_v13 }
0x1241   :  { %1785 = vmatpush.msrb.mxu3 %v1558_v13 }
0x1242   :  { %1514 = vmatpush.msra.mxu2 %v1486_v29  ;;  %1947 = vmatpush.msra.mxu1 %v4411_v3 }
0x1244   :  { %v280_v26 = vpop.permute.xlu0 %279  ;;  %1515 = vmatpush.msra.mxu2 %v1484_v40  ;;  %1948 = vmatpush.msra.mxu1 %v4416_v4 }
0x1245   :  { %282 = vst.msk [vmem:[#allocation4 + $0xe] sm:$0x3] %vm264_vm11, %v280_v26 }
0x1246   :  { %1516 = vmatpush.msra.mxu2 %v1482_v43  ;;  %1949 = vmatpush.msra.mxu1 %v4423_v6 }
0x1247   :  { %1448 = vrot.lane.b32.xlu1 %v1423_v37, %s3779_s18 }
0x1248   :  { %1517 = vmatpush.msra.mxu2 %v1480_v45  ;;  %1950 = vmatpush.msra.mxu1 %v1566_v7 }
0x124a   :  { %1518 = vmatpush.msra.mxu2 %v1478_v47  ;;  %1951 = vmatpush.msra.mxu1 %v1564_v9 }
0x124c   :  { %v787_v20 = vpop.permute.xlu0 %786  ;;  %1519 = vmatpush.msra.mxu2 %v1476_v53  ;;  %1952 = vmatpush.msra.mxu1 %v1562_v11 }
0x124d   :  { %789 = vst.msk [vmem:[#allocation4 + $0x8] sm:$0x3] %vm264_vm11, %v787_v20 }
0x124e   :  { %1758 = vmatpush.msrb.mxu2 %v1571_v55  ;;  %1953 = vmatpush.msra.mxu1 %v1560_v12 }
0x124f   :  { %1453 = vrot.lane.b32.xlu1 %v1440_v14, %s3780_s3 }
0x1250   :  { %1759 = vmatpush.msrb.mxu2 %v1569_v56  ;;  %1954 = vmatpush.msra.mxu1 %v1558_v13 }
0x1252   :  { %1760 = vmatpush.msrb.mxu2 %v1567_v57 }
0x1254   :  { %1761 = vmatpush.msrb.mxu2 %v1565_v58 }
0x1256   :  { %1762 = vmatpush.msrb.mxu2 %v1563_v59 }
0x1258   :  { %1763 = vmatpush.msrb.mxu2 %v4384_v60 }
0x125a   :  { %1764 = vmatpush.msrb.mxu2 %v4389_v61 }
0x125c   :  { %1765 = vmatpush.msrb.mxu2 %v4396_v62 }
0x12a9   :  { %v1459_v42 = vpop.permute.xlu1 %1458 }
0x12aa   :  { %1461 = vst.msk [vmem:[#allocation4] sm:$0x3] %vm264_vm11, %v1459_v42 }
0x12b1   :  { %v449_v49 = vpop.permute.xlu1 %448  ;;  %v1464_v10 = vld [vmem:[#allocation4] sm:$0xff] }
0x12b2   :  { %451 = vst.msk [vmem:[#allocation4 + $0xc] sm:$0x3] %vm264_vm11, %v449_v49  ;;  %1468 = vrot.lane.b32.xlu2 %v1464_v10, %s3779_s18 }
0x12b9   :  { %v1449_v50 = vpop.permute.xlu1 %1448  ;;  %v1465_v51 = vld [vmem:[#allocation4 + $0x8] sm:$0xff] }
0x12ba   :  { %1451 = vst.msk [vmem:[#allocation7] sm:$0x3] %vm264_vm11, %v1449_v50  ;;  %1442 = vrot.lane.b32.xlu2 %v4284_v28, %s3781_s12  ;;  %1470 = vrot.lane.b32.xlu0 %v1465_v51, %s3779_s18 }
0x12bb   :  { %1457 = vst.msk [vmem:[#allocation3 + $0xe] sm:$0x3] %vm264_vm11, %v1449_v50 }
0x12c1   :  { %v1454_v52 = vpop.permute.xlu1 %1453 }
0x12c2   :  { %1456 = vst.msk [vmem:[#allocation7] sm:$0x3] %vm266_vm12, %v1454_v52  ;;  %v1463_v17 = vld [vmem:[#allocation3 + $0x8] sm:$0xff] }
0x12c3   :  { %1554 = vst.msk [vmem:[#allocation7] sm:$0x3] %vm112_vm0, %v3778_v5 }
0x12ca   :  { %v1556_v63 = vld [vmem:[#allocation7] sm:$0x3] }
0x12cb   :  { %3416 = vmatmul.msk.f32.vlgmr.msrb.gmra.mxu0 %vm137_vm2, %v1556_v63  ;;  %3417 = vmatmul.msk.f32.vlgmr.msrb.gmra.mxu1 %vm137_vm2, %v1556_v63 }
0x12cc   :  { %2261 = vmatpush.msrb.mxu0 %v1571_v55  ;;  %2281 = vmatpush.msrb.mxu1 %v4411_v3 }
0x12ce   :  { %2262 = vmatpush.msrb.mxu0 %v1569_v56  ;;  %2282 = vmatpush.msrb.mxu1 %v4416_v4 }
0x12d0   :  { %2263 = vmatpush.msrb.mxu0 %v1567_v57  ;;  %2283 = vmatpush.msrb.mxu1 %v4423_v6 }
0x12d2   :  { %2264 = vmatpush.msrb.mxu0 %v1565_v58  ;;  %2284 = vmatpush.msrb.mxu1 %v1566_v7 }
0x12d4   :  { %2265 = vmatpush.msrb.mxu0 %v1563_v59  ;;  %2285 = vmatpush.msrb.mxu1 %v1564_v9 }
0x12d6   :  { %2266 = vmatpush.msrb.mxu0 %v4384_v60  ;;  %2286 = vmatpush.msrb.mxu1 %v1562_v11 }
0x12d8   :  { %2267 = vmatpush.msrb.mxu0 %v4389_v61  ;;  %2287 = vmatpush.msrb.mxu1 %v1560_v12 }
0x12da   :  { %2268 = vmatpush.msrb.mxu0 %v4396_v62  ;;  %2288 = vmatpush.msrb.mxu1 %v1558_v13 }
0x130c   :  { %v1469_v1 = vpop.permute.xlu2 %1468 }
0x130d   :  { %v1474_v2 = vsel %vm55_vm1, %v1462_v0, %v1469_v1 }
0x130e   :  { %3412 = vmatmul.msk.f32.vlgmr.msra.gmra.mxu2 %vm137_vm2, %v1474_v2  ;;  %3414 = vmatmul.msk.f32.vlgmr.msra.gmra.mxu3 %vm137_vm2, %v1474_v2 }
0x130f   :  { %2096 = vmatpush.msra.mxu2 %v1571_v55  ;;  %2116 = vmatpush.msra.mxu3 %v4411_v3 }
0x1311   :  { %2097 = vmatpush.msra.mxu2 %v1569_v56  ;;  %2117 = vmatpush.msra.mxu3 %v4416_v4 }
0x1313   :  { %2098 = vmatpush.msra.mxu2 %v1567_v57  ;;  %2118 = vmatpush.msra.mxu3 %v4423_v6 }
0x1314   :  { %v1443_v8 = vpop.permute.xlu2 %1442 }
0x1315   :  { %1445 = vst.msk [vmem:[#allocation8] sm:$0x3] %vm264_vm11, %v1443_v8  ;;  %2099 = vmatpush.msra.mxu2 %v1565_v58  ;;  %2119 = vmatpush.msra.mxu3 %v1566_v7 }
0x1316   :  { %1446 = vst.msk [vmem:[#allocation8] sm:$0x3] %vm266_vm12, %v4280_v24  ;;  %v1495_v24 = vperm.slane %v1492_v21, 1 }
0x1317   :  { %1555 = vst.msk [vmem:[#allocation8] sm:$0x3] %vm112_vm0, %v3778_v5  ;;  %2100 = vmatpush.msra.mxu2 %v1563_v59  ;;  %2120 = vmatpush.msra.mxu3 %v1564_v9 }
0x1319   :  { %2101 = vmatpush.msra.mxu2 %v4384_v60  ;;  %2121 = vmatpush.msra.mxu3 %v1562_v11 }
0x131b   :  { %2102 = vmatpush.msra.mxu2 %v4389_v61  ;;  %2122 = vmatpush.msra.mxu3 %v1560_v12 }
0x131d   :  { %2103 = vmatpush.msra.mxu2 %v4396_v62  ;;  %2123 = vmatpush.msra.mxu3 %v1558_v13 }
0x131e   :  { %v4454_v5 = vld [vmem:[#allocation8] sm:$0x3] }
0x131f   :  { %1663 = vrot.lane.b32.xlu2 %v4454_v5, %s3779_s18 }
0x132c   :  { %v1471_v16 = vpop.permute.xlu0 %1470 }
0x132d   :  { %v1475_v18 = vsel %vm55_vm1, %v1463_v17, %v1471_v16 }
0x132e   :  { %3413 = vmatmul.msk.f32.gmra.mxu2 %vm137_vm2, %v1475_v18  ;;  %3415 = vmatmul.msk.f32.gmra.mxu3 %vm137_vm2, %v1475_v18 }
0x1348   :  { %v1598_v30 = vpop.f32.mrf.mxu0  ;;  %v1618_v20 = vpop.f32.mrf.mxu1 }
0x1379   :  { %v1664_v2 = vpop.permute.xlu2 %1663 }
0x1391   :  { %v1521_v25 = vpop.f32.mrf.mxu2  ;;  %v1544_v19 = vpop.f32.mrf.mxu3 }
0x1392   :  { %v1522_v27 = vadd.f32 %v1521_v25, %v1494_v23  ;;  %v1545_v28 = vadd.f32 %v1544_v19, %v1495_v24 }
0x1394   :  { %1550 = vst [vmem:[#allocation2 + $0x10] sm:$0xff] %v1522_v27 }
0x1395   :  { %1551 = vst [vmem:[#allocation2] sm:$0xff] %v1545_v28 }
0x139b   :  { %v1573_v32 = vld [vmem:[#allocation2 + $0x10] sm:$0x3]  ;;  %v1738_v19 = vld [vmem:[#allocation2 + $0x10] sm:$0xc] }
0x139c   :  { %v1599_v35 = vadd.f32 %v1598_v30, %v1573_v32  ;;  %v1743_v28 = vrot.slane %v1738_v19, 2 }
0x139e   :  { %3600 = vtanh.f32 %v1599_v35  ;;  %v3418_v39 = vmul.f32 -1.442695, %v1599_v35 }
0x13a4   :  { %v3601_v33 = vpop.eup %3600 }
0x13a5   :  { %1668 = vrot.lane.b32.xlu0 %v3601_v33, %s3780_s3 }
0x13b1   :  { %v1524_v34 = vpop.f32.mrf.mxu2  ;;  %v1547_v14 = vpop.f32.mrf.mxu3 }
0x13b2   :  { %v1525_v36 = vadd.f32 %v1524_v34, %v1494_v23  ;;  %v1548_v26 = vadd.f32 %v1547_v14, %v1495_v24 }
0x13b4   :  { %1552 = vst [vmem:[#allocation2 + $0x18] sm:$0xff] %v1525_v36 }
0x13b5   :  { %1553 = vst [vmem:[#allocation2 + $0x8] sm:$0xff] %v1548_v26 }
0x13bc   :  { %v1574_v37 = vld [vmem:[#allocation2 + $0x8] sm:$0xc0]  ;;  %v1739_v27 = vld [vmem:[#allocation2 + $0x8] sm:$0x30] }
0x13bd   :  { %v1576_v15 = vrot.slane %v1574_v37, 6  ;;  %v3420_v30 = vrot.slane %v1739_v27, 4 }
0x13bf   :  { %v1619_v38 = vadd.f32 %v1618_v20, %v1576_v15 }
0x13c1   :  { %3602 = vtanh.f32 %v1619_v38  ;;  %v3419_v44 = vmul.f32 -1.442695, %v1619_v38 }
0x13c2   :  { %3604 = vpow2.f32 %v3418_v39 }
0x13c7   :  { %v3603_v22 = vpop.eup %3602 }
0x13c8   :  { %1685 = vrot.lane.b32.xlu1 %v3603_v22, %s3780_s3  ;;  %v3605_v29 = vpop.eup %3604 }
0x13c9   :  { %v1627_v31 = vadd.f32 1.0, %v3605_v29 }
0x13cb   :  { %3606 = vrcp.f32 %v1627_v31  ;;  %v1640_v46 = vand.u32 2147483648, %v1627_v31  ;;  %vm1634_vm14 = vweird.f32 %v1627_v31  ;;  %v1638_v47 = vand.u32 2147483647, %v1627_v31 }
0x13cc   :  { %3608 = vpow2.f32 %v3419_v44 }
0x13cd   :  { %v1641_v49 = vor.u32 1.1754944e-38, %v1640_v46  ;;  %vm1639_vm3 = vcmp.eq.f32.partialorder %v1638_v47, 8.507059e+37 }
0x13d1   :  { %v3607_v40 = vpop.eup %3606 }
0x13d2   :  { %v1630_v41 = vmul.f32 %v3607_v40, %v1627_v31  ;;  %vm1635_vm0 = vweird.f32 %v3607_v40  ;;  %v3609_v10 = vpop.eup %3608 }
0x13d3   :  { %vm1636_vm15 = vmor %vm1634_vm14, %vm1635_vm0  ;;  %v1628_v53 = vadd.f32 1.0, %v3609_v10 }
0x13d4   :  { %v1631_v42 = vsub.f32 1.0, %v1630_v41 }
0x13d5   :  { %3610 = vrcp.f32 %v1628_v53  ;;  %v1655_v59 = vand.u32 2147483648, %v1628_v53  ;;  %vm1649_vm5 = vweird.f32 %v1628_v53  ;;  %v1653_v60 = vand.u32 2147483647, %v1628_v53 }
0x13d6   :  { %v1632_v43 = vmul.f32 %v3607_v40, %v1631_v42 }
0x13d7   :  { %v1656_v62 = vor.u32 1.1754944e-38, %v1655_v59  ;;  %vm1654_vm7 = vcmp.eq.f32.partialorder %v1653_v60, 8.507059e+37 }
0x13d8   :  { %v1633_v45 = vadd.f32 %v3607_v40, %v1632_v43 }
0x13da   :  { %v1637_v48 = vsel %vm1636_vm15, %v3607_v40, %v1633_v45 }
0x13db   :  { %v1642_v50 = vsel %vm1639_vm3, %v1641_v49, %v1637_v48  ;;  %v3611_v54 = vpop.eup %3610 }
0x13dc   :  { %v1645_v55 = vmul.f32 %v3611_v54, %v1628_v53  ;;  %vm1650_vm4 = vweird.f32 %v3611_v54  ;;  %v1666_v3 = vmul.f32 %v1664_v2, %v1642_v50 }
0x13dd   :  { %vm1651_vm6 = vmor %vm1649_vm5, %vm1650_vm4 }
0x13de   :  { %v1646_v56 = vsub.f32 1.0, %v1645_v55 }
0x13e0   :  { %v1647_v57 = vmul.f32 %v3611_v54, %v1646_v56 }
0x13e2   :  { %v1648_v58 = vadd.f32 %v3611_v54, %v1647_v57 }
0x13e4   :  { %v1652_v61 = vsel %vm1651_vm6, %v3611_v54, %v1648_v58 }
0x13e5   :  { %v1657_v0 = vsel %vm1654_vm7, %v1656_v62, %v1652_v61 }
0x13e6   :  { %v1683_v8 = vmul.f32 %v4454_v5, %v1657_v0 }
0x1417   :  { %v1669_v51 = vpop.permute.xlu0 %1668 }
0x1418   :  { %v1671_v52 = vmul.f32 %v1669_v51, %v1642_v50 }
0x141a   :  { %1673 = vrot.lane.b32.xlu0 %v1671_v52, %s3779_s18 }
0x143a   :  { %v1686_v63 = vpop.permute.xlu1 %1685 }
0x143b   :  { %v1688_v1 = vmul.f32 %v1686_v63, %v1657_v0 }
0x143d   :  { %1690 = vrot.lane.b32.xlu1 %v1688_v1, %s3779_s18 }
0x148c   :  { %v1674_v4 = vpop.permute.xlu0 %1673 }
0x148d   :  { %v1676_v6 = vadd.f32 %v1674_v4, %v1666_v3 }
0x148f   :  { %3612 = vtanh.f32 %v1676_v6 }
0x1495   :  { %v3613_v7 = vpop.eup %3612 }
0x1496   :  { %1679 = vrot.lane.b32.xlu2 %v3613_v7, %s3780_s3 }
0x14af   :  { %v1691_v9 = vpop.permute.xlu1 %1690 }
0x14b0   :  { %v1693_v11 = vadd.f32 %v1691_v9, %v1683_v8 }
0x14b2   :  { %3614 = vtanh.f32 %v1693_v11 }
0x14b8   :  { %v3615_v12 = vpop.eup %3614 }
0x14b9   :  { %1696 = vrot.lane.b32.xlu0 %v3615_v12, %s3780_s3 }
0x14c1   :  { %1701 = vrot.lane.b32.xlu0 %v1676_v6, %s3781_s12 }
0x14f0   :  { %v1680_v13 = vpop.permute.xlu2 %1679 }
0x14f1   :  { %v1682_v16 = vmul.f32 %v1680_v13, %v1642_v50 }
0x14f3   :  { %1707 = vrot.lane.b32.xlu1 %v1682_v16, %s3779_s18 }
0x152b   :  { %v1697_v17 = vpop.permute.xlu0 %1696 }
0x152c   :  { %v4485_v18 = vmul.f32 %v1697_v17, %v1657_v0 }
0x152e   :  { %1712 = vrot.lane.b32.xlu2 %v4485_v18, %s3780_s3 }
0x1533   :  { %v1702_v21 = vpop.permute.xlu0 %1701 }
0x1534   :  { %1704 = vst.msk [vmem:[#allocation8] sm:$0x3] %vm264_vm11, %v1702_v21  ;;  %v1907_v21 = vld [vmem:[#allocation2 + $0x10] sm:$0x30] }
0x1535   :  { %1705 = vst.msk [vmem:[#allocation8] sm:$0x3] %vm266_vm12, %v1693_v11 }
0x153c   :  { %v4491_v5 = vld [vmem:[#allocation8] sm:$0x3] }
0x153d   :  { %1832 = vrot.lane.b32.xlu0 %v4491_v5, %s3779_s18 }
0x1565   :  { %v1708_v23 = vpop.permute.xlu1 %1707 }
0x1566   :  { %1710 = vst.msk [vmem:[#allocation7] sm:$0x3] %vm264_vm11, %v1708_v23 }
0x1567   :  { %1716 = vst.msk [vmem:[#allocation5] sm:$0x3] %vm264_vm11, %v1708_v23  ;;  %v1912_v23 = vrot.slane %v1907_v21, 4 }
0x1588   :  { %v1713_v24 = vpop.permute.xlu2 %1712 }
0x1589   :  { %1715 = vst.msk [vmem:[#allocation7] sm:$0x3] %vm266_vm12, %v1713_v24 }
0x1590   :  { %v1721_v25 = vld [vmem:[#allocation7] sm:$0x3] }
0x1591   :  { %3421 = vmatmul.msk.f32.vlgmr.msrb.gmra.mxu2 %vm137_vm2, %v1721_v25  ;;  %3422 = vmatmul.msk.f32.vlgmr.msrb.gmra.mxu3 %vm137_vm2, %v1721_v25 }
0x15af   :  { %v1833_v0 = vpop.permute.xlu0 %1832 }
0x1614   :  { %v1767_v32 = vpop.f32.mrf.mxu2  ;;  %v1787_v35 = vpop.f32.mrf.mxu3 }
0x1615   :  { %v1768_v33 = vadd.f32 %v1767_v32, %v1743_v28  ;;  %v1788_v34 = vadd.f32 %v3420_v30, %v1787_v35 }
0x1617   :  { %3616 = vtanh.f32 %v1768_v33  ;;  %v3424_v26 = vmul.f32 -1.442695, %v1788_v34  ;;  %v3423_v38 = vmul.f32 -1.442695, %v1768_v33 }
0x1618   :  { %3618 = vtanh.f32 %v1788_v34 }
0x1619   :  { %3620 = vpow2.f32 %v3424_v26 }
0x161d   :  { %v3617_v14 = vpop.eup %3616 }
0x161e   :  { %v3619_v36 = vpop.eup %3618  ;;  %1837 = vrot.lane.b32.xlu1 %v3617_v14, %s3780_s3 }
0x161f   :  { %1854 = vrot.lane.b32.xlu2 %v3619_v36, %s3780_s3  ;;  %v3621_v37 = vpop.eup %3620 }
0x1620   :  { %v1797_v20 = vadd.f32 1.0, %v3621_v37 }
0x1622   :  { %3622 = vrcp.f32 %v1797_v20  ;;  %v1824_v42 = vand.u32 2147483648, %v1797_v20  ;;  %vm1818_vm9 = vweird.f32 %v1797_v20  ;;  %v1822_v43 = vand.u32 2147483647, %v1797_v20 }
0x1623   :  { %3624 = vpow2.f32 %v3423_v38 }
0x1624   :  { %v1825_v45 = vor.u32 1.1754944e-38, %v1824_v42  ;;  %vm1823_vm13 = vcmp.eq.f32.partialorder %v1822_v43, 8.507059e+37 }
0x1628   :  { %v3623_v15 = vpop.eup %3622 }
0x1629   :  { %v1814_v22 = vmul.f32 %v3623_v15, %v1797_v20  ;;  %v3625_v29 = vpop.eup %3624  ;;  %vm1819_vm8 = vweird.f32 %v3623_v15 }
0x162a   :  { %v1796_v40 = vadd.f32 1.0, %v3625_v29  ;;  %vm1820_vm10 = vmor %vm1818_vm9, %vm1819_vm8 }
0x162b   :  { %v1815_v39 = vsub.f32 1.0, %v1814_v22 }
0x162c   :  { %3626 = vrcp.f32 %v1796_v40  ;;  %v1809_v53 = vand.u32 2147483648, %v1796_v40  ;;  %vm1803_vm14 = vweird.f32 %v1796_v40  ;;  %v1807_v54 = vand.u32 2147483647, %v1796_v40 }
0x162d   :  { %v1816_v31 = vmul.f32 %v3623_v15, %v1815_v39 }
0x162e   :  { %v1810_v56 = vor.u32 1.1754944e-38, %v1809_v53  ;;  %vm1808_vm3 = vcmp.eq.f32.partialorder %v1807_v54, 8.507059e+37 }
0x162f   :  { %v1817_v41 = vadd.f32 %v3623_v15, %v1816_v31 }
0x1631   :  { %v1821_v44 = vsel %vm1820_vm10, %v3623_v15, %v1817_v41 }
0x1632   :  { %v1826_v47 = vsel %vm1823_vm13, %v1825_v45, %v1821_v44  ;;  %v3627_v48 = vpop.eup %3626 }
0x1633   :  { %v1799_v10 = vmul.f32 %v3627_v48, %v1796_v40  ;;  %vm1804_vm0 = vweird.f32 %v3627_v48  ;;  %v1852_v60 = vmul.f32 %v4491_v5, %v1826_v47  ;;  %v1908_v5 = vld [vmem:[#allocation2 + $0x8] sm:$0xc] }
0x1634   :  { %vm1805_vm15 = vmor %vm1803_vm14, %vm1804_vm0  ;;  %v3425_v24 = vrot.slane %v1908_v5, 10 }
0x1635   :  { %v1800_v50 = vsub.f32 1.0, %v1799_v10 }
0x1637   :  { %v1801_v51 = vmul.f32 %v3627_v48, %v1800_v50 }
0x1639   :  { %v1802_v52 = vadd.f32 %v3627_v48, %v1801_v51 }
0x163b   :  { %v1806_v55 = vsel %vm1805_vm15, %v3627_v48, %v1802_v52 }
0x163c   :  { %v1811_v58 = vsel %vm1808_vm3, %v1810_v56, %v1806_v55 }
0x163d   :  { %v1835_v1 = vmul.f32 %v1833_v0, %v1811_v58 }
0x1679   :  { %v1855_v46 = vpop.permute.xlu2 %1854 }
0x167a   :  { %v1857_v49 = vmul.f32 %v1855_v46, %v1826_v47 }
0x167c   :  { %1859 = vrot.lane.b32.xlu2 %v1857_v49, %s3779_s18 }
0x1690   :  { %v1838_v57 = vpop.permute.xlu1 %1837 }
0x1691   :  { %v1840_v59 = vmul.f32 %v1838_v57, %v1811_v58 }
0x1693   :  { %1842 = vrot.lane.b32.xlu1 %v1840_v59, %s3779_s18 }
0x16d6   :  { %v1860_v61 = vpop.permute.xlu2 %1859 }
0x16d7   :  { %v1862_v62 = vadd.f32 %v1860_v61, %v1852_v60 }
0x16d9   :  { %3628 = vtanh.f32 %v1862_v62 }
0x16df   :  { %v3629_v63 = vpop.eup %3628 }
0x16e0   :  { %1865 = vrot.lane.b32.xlu1 %v3629_v63, %s3780_s3 }
0x1705   :  { %v1843_v2 = vpop.permute.xlu1 %1842 }
0x1706   :  { %v1845_v3 = vadd.f32 %v1843_v2, %v1835_v1 }
0x1708   :  { %3630 = vtanh.f32 %v1845_v3  ;;  %1870 = vrot.lane.b32.xlu1 %v1845_v3, %s3781_s12 }
0x170e   :  { %v3631_v4 = vpop.eup %3630 }
0x170f   :  { %1848 = vrot.lane.b32.xlu0 %v3631_v4, %s3780_s3 }
0x1752   :  { %v1866_v6 = vpop.permute.xlu1 %1865 }
0x1753   :  { %v4508_v7 = vmul.f32 %v1866_v6, %v1826_v47 }
0x1755   :  { %1881 = vrot.lane.b32.xlu0 %v4508_v7, %s3780_s3 }
0x177a   :  { %v1871_v8 = vpop.permute.xlu1 %1870 }
0x177b   :  { %1873 = vst.msk [vmem:[#allocation8] sm:$0x3] %vm264_vm11, %v1871_v8 }
0x177c   :  { %1874 = vst.msk [vmem:[#allocation8] sm:$0x3] %vm266_vm12, %v1862_v62 }
0x1781   :  { %v1849_v9 = vpop.permute.xlu0 %1848 }
0x1782   :  { %v1851_v11 = vmul.f32 %v1849_v9, %v1811_v58 }
0x1783   :  { %v4514_v12 = vld [vmem:[#allocation8] sm:$0x3] }
0x1784   :  { %1876 = vrot.lane.b32.xlu2 %v1851_v11, %s3779_s18  ;;  %2001 = vrot.lane.b32.xlu1 %v4514_v12, %s3779_s18 }
0x17c7   :  { %v1882_v16 = vpop.permute.xlu0 %1881 }
0x17de   :  { %v1877_v13 = vpop.permute.xlu2 %1876 }
0x17df   :  { %1879 = vst.msk [vmem:[#allocation7] sm:$0x3] %vm264_vm11, %v1877_v13 }
0x17e0   :  { %1885 = vst.msk [vmem:[#allocation5 + $0x2] sm:$0x3] %vm264_vm11, %v1877_v13 }
0x17e1   :  { %1884 = vst.msk [vmem:[#allocation7] sm:$0x3] %vm266_vm12, %v1882_v16 }
0x17e8   :  { %v1890_v17 = vld [vmem:[#allocation7] sm:$0x3] }
0x17e9   :  { %3426 = vmatmul.msk.f32.vlgmr.msra.gmra.mxu0 %vm137_vm2, %v1890_v17  ;;  %3427 = vmatmul.msk.f32.vlgmr.msra.gmra.mxu1 %vm137_vm2, %v1890_v17  ;;  %v2077_v17 = vld [vmem:[#allocation2 + $0x8] sm:$0x3] }
0x17f6   :  { %v2002_v55 = vpop.permute.xlu1 %2001 }
0x1866   :  { %v1936_v25 = vpop.f32.mrf.mxu0  ;;  %v1956_v19 = vpop.f32.mrf.mxu1 }
0x1867   :  { %v1937_v27 = vadd.f32 %v1936_v25, %v1912_v23  ;;  %v1957_v28 = vadd.f32 %v3425_v24, %v1956_v19 }
0x1869   :  { %3632 = vtanh.f32 %v1937_v27  ;;  %v3428_v35 = vmul.f32 -1.442695, %v1937_v27  ;;  %v3429_v36 = vmul.f32 -1.442695, %v1957_v28 }
0x186a   :  { %3634 = vtanh.f32 %v1957_v28 }
0x186b   :  { %3636 = vpow2.f32 %v3428_v35 }
0x186f   :  { %v3633_v30 = vpop.eup %3632 }
0x1870   :  { %v3635_v32 = vpop.eup %3634  ;;  %2006 = vrot.lane.b32.xlu2 %v3633_v30, %s3780_s3 }
0x1871   :  { %2023 = vrot.lane.b32.xlu0 %v3635_v32, %s3780_s3  ;;  %v3637_v33 = vpop.eup %3636 }
0x1872   :  { %v1965_v34 = vadd.f32 1.0, %v3637_v33 }
0x1874   :  { %3638 = vrcp.f32 %v1965_v34  ;;  %v1978_v39 = vand.u32 2147483648, %v1965_v34  ;;  %vm1972_vm5 = vweird.f32 %v1965_v34  ;;  %v1976_v29 = vand.u32 2147483647, %v1965_v34 }
0x1875   :  { %3640 = vpow2.f32 %v3429_v36 }
0x1876   :  { %v1979_v40 = vor.u32 1.1754944e-38, %v1978_v39  ;;  %vm1977_vm7 = vcmp.eq.f32.partialorder %v1976_v29, 8.507059e+37 }
0x187a   :  { %v3639_v14 = vpop.eup %3638 }
0x187b   :  { %v1968_v26 = vmul.f32 %v3639_v14, %v1965_v34  ;;  %v3641_v15 = vpop.eup %3640  ;;  %vm1973_vm4 = vweird.f32 %v3639_v14 }
0x187c   :  { %v1966_v38 = vadd.f32 1.0, %v3641_v15  ;;  %vm1974_vm6 = vmor %vm1972_vm5, %vm1973_vm4 }
0x187d   :  { %v1969_v37 = vsub.f32 1.0, %v1968_v26 }
0x187e   :  { %3642 = vrcp.f32 %v1966_v38  ;;  %v1993_v49 = vand.u32 2147483648, %v1966_v38  ;;  %vm1987_vm9 = vweird.f32 %v1966_v38  ;;  %v1991_v10 = vand.u32 2147483647, %v1966_v38 }
0x187f   :  { %v1970_v20 = vmul.f32 %v3639_v14, %v1969_v37 }
0x1880   :  { %v1994_v51 = vor.u32 1.1754944e-38, %v1993_v49  ;;  %vm1992_vm13 = vcmp.eq.f32.partialorder %v1991_v10, 8.507059e+37 }
0x1881   :  { %v1971_v22 = vadd.f32 %v3639_v14, %v1970_v20 }
0x1883   :  { %v1975_v31 = vsel %vm1974_vm6, %v3639_v14, %v1971_v22 }
0x1884   :  { %v1980_v42 = vsel %vm1977_vm7, %v1979_v40, %v1975_v31  ;;  %v3643_v44 = vpop.eup %3642 }
0x1885   :  { %v1983_v45 = vmul.f32 %v3643_v44, %v1966_v38  ;;  %vm1988_vm8 = vweird.f32 %v3643_v44  ;;  %v2004_v56 = vmul.f32 %v2002_v55, %v1980_v42 }
0x1886   :  { %vm1989_vm10 = vmor %vm1987_vm9, %vm1988_vm8 }
0x1887   :  { %v1984_v46 = vsub.f32 1.0, %v1983_v45 }
0x1889   :  { %v1985_v47 = vmul.f32 %v3643_v44, %v1984_v46 }
0x188b   :  { %v1986_v48 = vadd.f32 %v3643_v44, %v1985_v47 }
0x188d   :  { %v1990_v50 = vsel %vm1989_vm10, %v3643_v44, %v1986_v48 }
0x188e   :  { %v1995_v53 = vsel %vm1992_vm13, %v1994_v51, %v1990_v50 }
0x188f   :  { %v2021_v60 = vmul.f32 %v4514_v12, %v1995_v53  ;;  %v2076_v12 = vld [vmem:[#allocation2 + $0x10] sm:$0xc0] }
0x1890   :  { %v2081_v13 = vrot.slane %v2076_v12, 6 }
0x18ca   :  { %v2007_v41 = vpop.permute.xlu2 %2006 }
0x18cb   :  { %v2009_v43 = vmul.f32 %v2007_v41, %v1980_v42 }
0x18cd   :  { %2011 = vrot.lane.b32.xlu2 %v2009_v43, %s3779_s18 }
0x18e3   :  { %v2024_v52 = vpop.permute.xlu0 %2023 }
0x18e4   :  { %v2026_v54 = vmul.f32 %v2024_v52, %v1995_v53 }
0x18e6   :  { %2028 = vrot.lane.b32.xlu0 %v2026_v54, %s3779_s18 }
0x1927   :  { %v2012_v57 = vpop.permute.xlu2 %2011 }
0x1928   :  { %v2014_v58 = vadd.f32 %v2012_v57, %v2004_v56 }
0x192a   :  { %3644 = vtanh.f32 %v2014_v58 }
0x1930   :  { %v3645_v59 = vpop.eup %3644 }
0x1931   :  { %2017 = vrot.lane.b32.xlu1 %v3645_v59, %s3780_s3 }
0x1958   :  { %v2029_v61 = vpop.permute.xlu0 %2028 }
0x1959   :  { %v2031_v62 = vadd.f32 %v2029_v61, %v2021_v60 }
0x195b   :  { %3646 = vtanh.f32 %v2031_v62 }
0x1961   :  { %v3647_v63 = vpop.eup %3646 }
0x1962   :  { %2034 = vrot.lane.b32.xlu2 %v3647_v63, %s3780_s3 }
0x196a   :  { %2039 = vrot.lane.b32.xlu2 %v2014_v58, %s3781_s12 }
0x19a3   :  { %v2018_v0 = vpop.permute.xlu1 %2017 }
0x19a4   :  { %v2020_v1 = vmul.f32 %v2018_v0, %v1980_v42 }
0x19a6   :  { %2045 = vrot.lane.b32.xlu0 %v2020_v1, %s3779_s18 }
0x19bc   :  { %v2035_v2 = vpop.permute.xlu2 %2034 }
0x19bd   :  { %v4533_v3 = vmul.f32 %v2035_v2, %v1995_v53 }
0x19bf   :  { %2050 = vrot.lane.b32.xlu1 %v4533_v3, %s3780_s3 }
0x19c4   :  { %v2040_v4 = vpop.permute.xlu2 %2039 }
0x19c5   :  { %2042 = vst.msk [vmem:[#allocation8] sm:$0x3] %vm264_vm11, %v2040_v4 }
0x19c6   :  { %2043 = vst.msk [vmem:[#allocation8] sm:$0x3] %vm266_vm12, %v2031_v62 }
0x19cd   :  { %v4539_v6 = vld [vmem:[#allocation8] sm:$0x3] }
0x19ce   :  { %2170 = vrot.lane.b32.xlu2 %v4539_v6, %s3779_s18 }
0x1a18   :  { %v2046_v8 = vpop.permute.xlu0 %2045 }
0x1a19   :  { %2048 = vst.msk [vmem:[#allocation7] sm:$0x3] %vm264_vm11, %v2046_v8 }
0x1a1a   :  { %2054 = vst.msk [vmem:[#allocation5 + $0x4] sm:$0x3] %vm264_vm11, %v2046_v8 }
0x1a28   :  { %v2171_v50 = vpop.permute.xlu2 %2170 }
0x1a31   :  { %v2051_v9 = vpop.permute.xlu1 %2050 }
0x1a32   :  { %2053 = vst.msk [vmem:[#allocation7] sm:$0x3] %vm266_vm12, %v2051_v9  ;;  %v2245_v9 = vld [vmem:[#allocation2 + $0x18] sm:$0x3] }
0x1a39   :  { %v2059_v11 = vld [vmem:[#allocation7] sm:$0x3] }
0x1a3a   :  { %3431 = vmatmul.msk.f32.vlgmr.msra.gmra.mxu2 %vm137_vm2, %v2059_v11  ;;  %3432 = vmatmul.msk.f32.vlgmr.msra.gmra.mxu3 %vm137_vm2, %v2059_v11 }
0x1abd   :  { %v2105_v16 = vpop.f32.mrf.mxu2  ;;  %v2125_v21 = vpop.f32.mrf.mxu3 }
0x1abe   :  { %v2106_v5 = vadd.f32 %v2105_v16, %v2081_v13  ;;  %v2126_v23 = vadd.f32 %v2125_v21, %v2077_v17 }
0x1ac0   :  { %3648 = vtanh.f32 %v2106_v5  ;;  %v3433_v19 = vmul.f32 -1.442695, %v2106_v5  ;;  %v3434_v27 = vmul.f32 -1.442695, %v2126_v23 }
0x1ac1   :  { %3650 = vtanh.f32 %v2126_v23 }
0x1ac2   :  { %3652 = vpow2.f32 %v3433_v19 }
0x1ac3   :  { %3654 = vpow2.f32 %v3434_v27 }
0x1ac6   :  { %v3649_v24 = vpop.eup %3648 }
0x1ac7   :  { %v3651_v25 = vpop.eup %3650  ;;  %2175 = vrot.lane.b32.xlu0 %v3649_v24, %s3780_s3 }
0x1ac8   :  { %2192 = vrot.lane.b32.xlu1 %v3651_v25, %s3780_s3  ;;  %v3653_v28 = vpop.eup %3652 }
0x1ac9   :  { %v3655_v30 = vpop.eup %3654  ;;  %v2134_v32 = vadd.f32 1.0, %v3653_v28 }
0x1aca   :  { %v2135_v35 = vadd.f32 1.0, %v3655_v30 }
0x1acb   :  { %3656 = vrcp.f32 %v2134_v32  ;;  %v2147_v39 = vand.u32 2147483648, %v2134_v32  ;;  %vm2141_vm15 = vweird.f32 %v2134_v32  ;;  %v2145_v31 = vand.u32 2147483647, %v2134_v32 }
0x1acc   :  { %3658 = vrcp.f32 %v2135_v35  ;;  %v2162_v29 = vand.u32 2147483648, %v2135_v35  ;;  %vm2156_vm3 = vweird.f32 %v2135_v35  ;;  %v2160_v40 = vand.u32 2147483647, %v2135_v35 }
0x1acd   :  { %v2148_v43 = vor.u32 1.1754944e-38, %v2147_v39  ;;  %vm2146_vm6 = vcmp.eq.f32.partialorder %v2145_v31, 8.507059e+37 }
0x1ace   :  { %v2163_v44 = vor.u32 1.1754944e-38, %v2162_v29  ;;  %vm2161_vm7 = vcmp.eq.f32.partialorder %v2160_v40, 8.507059e+37 }
0x1ad1   :  { %v3657_v33 = vpop.eup %3656 }
0x1ad2   :  { %v3659_v34 = vpop.eup %3658  ;;  %v2137_v14 = vmul.f32 %v3657_v33, %v2134_v32  ;;  %vm2142_vm0 = vweird.f32 %v3657_v33 }
0x1ad3   :  { %v2152_v36 = vmul.f32 %v3659_v34, %v2135_v35  ;;  %vm2157_vm14 = vweird.f32 %v3659_v34  ;;  %vm2143_vm4 = vmor %vm2141_vm15, %vm2142_vm0 }
0x1ad4   :  { %v2138_v26 = vsub.f32 1.0, %v2137_v14  ;;  %vm2158_vm5 = vmor %vm2156_vm3, %vm2157_vm14 }
0x1ad5   :  { %v2153_v37 = vsub.f32 1.0, %v2152_v36 }
0x1ad6   :  { %v2139_v20 = vmul.f32 %v3657_v33, %v2138_v26 }
0x1ad7   :  { %v2154_v15 = vmul.f32 %v3659_v34, %v2153_v37 }
0x1ad8   :  { %v2140_v38 = vadd.f32 %v3657_v33, %v2139_v20 }
0x1ad9   :  { %v2155_v22 = vadd.f32 %v3659_v34, %v2154_v15 }
0x1ada   :  { %v2144_v41 = vsel %vm2143_vm4, %v3657_v33, %v2140_v38 }
0x1adb   :  { %v2159_v42 = vsel %vm2158_vm5, %v3659_v34, %v2155_v22  ;;  %v2149_v46 = vsel %vm2146_vm6, %v2148_v43, %v2144_v41 }
0x1adc   :  { %v2164_v48 = vsel %vm2161_vm7, %v2163_v44, %v2159_v42  ;;  %v2173_v51 = vmul.f32 %v2171_v50, %v2149_v46 }
0x1add   :  { %v2190_v52 = vmul.f32 %v4539_v6, %v2164_v48  ;;  %v2246_v6 = vld [vmem:[#allocation2] sm:$0xc0] }
0x1ade   :  { %v2248_v8 = vrot.slane %v2246_v6, 6  ;;  %v2402_v6 = vld [vmem:[%s5094_s5 + $0x40] sm:$0xff] }
0x1b39   :  { %v2176_v45 = vpop.permute.xlu0 %2175 }
0x1b3a   :  { %v2193_v47 = vpop.permute.xlu1 %2192  ;;  %v2178_v49 = vmul.f32 %v2176_v45, %v2149_v46 }
0x1b3b   :  { %v2195_v10 = vmul.f32 %v2193_v47, %v2164_v48 }
0x1b3c   :  { %2180 = vrot.lane.b32.xlu0 %v2178_v49, %s3779_s18 }
0x1b3d   :  { %2197 = vrot.lane.b32.xlu1 %v2195_v10, %s3779_s18 }
0x1bae   :  { %v2181_v53 = vpop.permute.xlu0 %2180 }
0x1baf   :  { %v2198_v54 = vpop.permute.xlu1 %2197  ;;  %v2183_v55 = vadd.f32 %v2181_v53, %v2173_v51 }
0x1bb0   :  { %v2200_v56 = vadd.f32 %v2198_v54, %v2190_v52 }
0x1bb1   :  { %3660 = vtanh.f32 %v2183_v55 }
0x1bb2   :  { %3662 = vtanh.f32 %v2200_v56 }
0x1bb7   :  { %v3661_v57 = vpop.eup %3660 }
0x1bb8   :  { %v3663_v58 = vpop.eup %3662  ;;  %2186 = vrot.lane.b32.xlu2 %v3661_v57, %s3780_s3 }
0x1bb9   :  { %2203 = vrot.lane.b32.xlu0 %v3663_v58, %s3780_s3 }
0x1bc1   :  { %2208 = vrot.lane.b32.xlu0 %v2183_v55, %s3781_s12 }
0x1c12   :  { %v2187_v59 = vpop.permute.xlu2 %2186 }
0x1c13   :  { %v2189_v60 = vmul.f32 %v2187_v59, %v2149_v46 }
0x1c15   :  { %2214 = vrot.lane.b32.xlu1 %v2189_v60, %s3779_s18 }
0x1c2b   :  { %v2204_v61 = vpop.permute.xlu0 %2203 }
0x1c2c   :  { %v4557_v62 = vmul.f32 %v2204_v61, %v2164_v48  ;;  %v2408_v61 = vld [vmem:[%s5094_s5 + $0x70] sm:$0xff] }
0x1c2d   :  { %2430 = vmatpush.msrb.mxu2 %v2408_v61  ;;  %2599 = vmatpush.msra.mxu0 %v2408_v61 }
0x1c2e   :  { %2219 = vrot.lane.b32.xlu2 %v4557_v62, %s3780_s3 }
0x1c33   :  { %v2209_v63 = vpop.permute.xlu0 %2208 }
0x1c34   :  { %2211 = vst.msk [vmem:[#allocation8] sm:$0x3] %vm264_vm11, %v2209_v63  ;;  %v2409_v63 = vld [vmem:[%s5094_s5 + $0x78] sm:$0xff] }
0x1c35   :  { %2212 = vst.msk [vmem:[#allocation8] sm:$0x3] %vm266_vm12, %v2200_v56  ;;  %2450 = vmatpush.msrb.mxu3 %v2409_v63  ;;  %2619 = vmatpush.msra.mxu1 %v2409_v63 }
0x1c3c   :  { %v4563_v0 = vld [vmem:[#allocation8] sm:$0x3] }
0x1c3d   :  { %2335 = vrot.lane.b32.xlu0 %v4563_v0, %s3779_s18 }
0x1c87   :  { %v2215_v1 = vpop.permute.xlu1 %2214 }
0x1c88   :  { %2217 = vst.msk [vmem:[#allocation7] sm:$0x3] %vm264_vm11, %v2215_v1  ;;  %v2220_v2 = vpop.permute.xlu2 %2219 }
0x1c89   :  { %2223 = vst.msk [vmem:[#allocation5 + $0x6] sm:$0x3] %vm264_vm11, %v2215_v1  ;;  %v2407_v1 = vld [vmem:[%s5094_s5 + $0x68] sm:$0xff] }
0x1c8a   :  { %2222 = vst.msk [vmem:[#allocation7] sm:$0x3] %vm266_vm12, %v2220_v2  ;;  %v2404_v2 = vld [vmem:[%s5094_s5 + $0x50] sm:$0xff]  ;;  %2451 = vmatpush.msrb.mxu3 %v2407_v1  ;;  %2620 = vmatpush.msra.mxu1 %v2407_v1 }
0x1c91   :  { %v2228_v4 = vld [vmem:[#allocation7] sm:$0x3] }
0x1c92   :  { %3435 = vmatmul.msk.f32.vlgmr.msrb.gmra.mxu0 %vm137_vm2, %v2228_v4  ;;  %3436 = vmatmul.msk.f32.vlgmr.msrb.gmra.mxu1 %vm137_vm2, %v2228_v4  ;;  %v2405_v4 = vld [vmem:[%s5094_s5 + $0x58] sm:$0xff] }
0x1c93   :  { %2452 = vmatpush.msrb.mxu3 %v2405_v4  ;;  %2621 = vmatpush.msra.mxu1 %v2405_v4 }
0x1caf   :  { %v2336_v50 = vpop.permute.xlu0 %2335 }
0x1d0f   :  { %v2270_v11 = vpop.f32.mrf.mxu0  ;;  %v2290_v12 = vpop.f32.mrf.mxu1 }
0x1d10   :  { %v2271_v13 = vadd.f32 %v2270_v11, %v2245_v9  ;;  %v2291_v16 = vadd.f32 %v2290_v12, %v2248_v8  ;;  %v2403_v8 = vld [vmem:[%s5094_s5 + $0x48] sm:$0xff]  ;;  %v2400_v9 = vld [vmem:[%s5094_s5 + $0x30] sm:$0xff]  ;;  %v2401_v11 = vld [vmem:[%s5094_s5 + $0x38] sm:$0xff] }
0x1d11   :  { %2453 = vmatpush.msrb.mxu3 %v2403_v8  ;;  %v2398_v12 = vld [vmem:[%s5094_s5 + $0x20] sm:$0xff]  ;;  %2622 = vmatpush.msra.mxu1 %v2403_v8 }
0x1d12   :  { %3664 = vtanh.f32 %v2271_v13  ;;  %v3438_v5 = vmul.f32 -1.442695, %v2291_v16  ;;  %v3437_v19 = vmul.f32 -1.442695, %v2271_v13  ;;  %v2399_v13 = vld [vmem:[%s5094_s5 + $0x28] sm:$0xff] }
0x1d13   :  { %3666 = vtanh.f32 %v2291_v16  ;;  %2454 = vmatpush.msrb.mxu3 %v2401_v11  ;;  %v2396_v16 = vld [vmem:[%s5094_s5 + $0x10] sm:$0xff]  ;;  %2623 = vmatpush.msra.mxu1 %v2401_v11 }
0x1d14   :  { %3668 = vpow2.f32 %v3438_v5  ;;  %v2395_v5 = vld [vmem:[%s5094_s5 + $0x8] sm:$0xff] }
0x1d15   :  { %2455 = vmatpush.msrb.mxu3 %v2399_v13  ;;  %2624 = vmatpush.msra.mxu1 %v2399_v13 }
0x1d18   :  { %v3665_v17 = vpop.eup %3664 }
0x1d19   :  { %v3667_v21 = vpop.eup %3666  ;;  %2340 = vrot.lane.b32.xlu1 %v3665_v17, %s3780_s3  ;;  %v2397_v17 = vld [vmem:[%s5094_s5 + $0x18] sm:$0xff] }
0x1d1a   :  { %2357 = vrot.lane.b32.xlu2 %v3667_v21, %s3780_s3  ;;  %v3669_v23 = vpop.eup %3668  ;;  %v2394_v21 = vld [vmem:[%s5094_s5] sm:$0xff]  ;;  %2456 = vmatpush.msrb.mxu3 %v2397_v17 }
0x1d1b   :  { %v2300_v24 = vadd.f32 1.0, %v3669_v23  ;;  %2625 = vmatpush.msra.mxu1 %v2397_v17 }
0x1d1c   :  { %2457 = vmatpush.msrb.mxu3 %v2395_v5 }
0x1d1d   :  { %3670 = vrcp.f32 %v2300_v24  ;;  %v2327_v34 = vand.u32 2147483648, %v2300_v24  ;;  %vm2321_vm9 = vweird.f32 %v2300_v24  ;;  %v2325_v14 = vand.u32 2147483647, %v2300_v24  ;;  %2626 = vmatpush.msra.mxu1 %v2395_v5 }
0x1d1e   :  { %3672 = vpow2.f32 %v3437_v19  ;;  %2788 = vmatpush.msra.mxu3 %v2409_v63  ;;  %v2410_v19 = vld [vmem:[#allocation2 + $0x18] sm:$0xc] }
0x1d1f   :  { %v2328_v26 = vor.u32 1.1754944e-38, %v2327_v34  ;;  %vm2326_vm13 = vcmp.eq.f32.partialorder %v2325_v14, 8.507059e+37 }
0x1d20   :  { %2789 = vmatpush.msra.mxu3 %v2407_v1 }
0x1d22   :  { %2790 = vmatpush.msra.mxu3 %v2405_v4 }
0x1d23   :  { %v3671_v25 = vpop.eup %3670 }
0x1d24   :  { %v2317_v27 = vmul.f32 %v3671_v25, %v2300_v24  ;;  %v3673_v30 = vpop.eup %3672  ;;  %vm2322_vm8 = vweird.f32 %v3671_v25  ;;  %2791 = vmatpush.msra.mxu3 %v2403_v8 }
0x1d25   :  { %v2299_v35 = vadd.f32 1.0, %v3673_v30  ;;  %vm2323_vm10 = vmor %vm2321_vm9, %vm2322_vm8 }
0x1d26   :  { %v2318_v28 = vsub.f32 1.0, %v2317_v27  ;;  %2792 = vmatpush.msra.mxu3 %v2401_v11  ;;  %v2411_v27 = vld [vmem:[#allocation2] sm:$0x30] }
0x1d27   :  { %3674 = vrcp.f32 %v2299_v35  ;;  %v2312_v40 = vand.u32 2147483648, %v2299_v35  ;;  %vm2306_vm14 = vweird.f32 %v2299_v35  ;;  %v2310_v41 = vand.u32 2147483647, %v2299_v35 }
0x1d28   :  { %v2319_v32 = vmul.f32 %v3671_v25, %v2318_v28  ;;  %2793 = vmatpush.msra.mxu3 %v2399_v13  ;;  %v2415_v28 = vrot.slane %v2410_v19, 2  ;;  %v3439_v30 = vrot.slane %v2411_v27, 4  ;;  %v2580_v19 = vld [vmem:[#allocation2] sm:$0xc] }
0x1d29   :  { %v2313_v43 = vor.u32 1.1754944e-38, %v2312_v40  ;;  %vm2311_vm3 = vcmp.eq.f32.partialorder %v2310_v41, 8.507059e+37 }
0x1d2a   :  { %v2320_v33 = vadd.f32 %v3671_v25, %v2319_v32  ;;  %2794 = vmatpush.msra.mxu3 %v2397_v17 }
0x1d2c   :  { %v2324_v36 = vsel %vm2323_vm10, %v3671_v25, %v2320_v33  ;;  %2795 = vmatpush.msra.mxu3 %v2395_v5 }
0x1d2d   :  { %v2329_v20 = vsel %vm2326_vm13, %v2328_v26, %v2324_v36  ;;  %v3675_v15 = vpop.eup %3674 }
0x1d2e   :  { %v2302_v22 = vmul.f32 %v3675_v15, %v2299_v35  ;;  %vm2307_vm0 = vweird.f32 %v3675_v15  ;;  %v2355_v47 = vmul.f32 %v4563_v0, %v2329_v20  ;;  %v2406_v0 = vld [vmem:[%s5094_s5 + $0x60] sm:$0xff] }
0x1d2f   :  { %vm2308_vm15 = vmor %vm2306_vm14, %vm2307_vm0  ;;  %2431 = vmatpush.msrb.mxu2 %v2406_v0  ;;  %2600 = vmatpush.msra.mxu0 %v2406_v0 }
0x1d30   :  { %v2303_v39 = vsub.f32 1.0, %v2302_v22 }
0x1d31   :  { %2432 = vmatpush.msrb.mxu2 %v2404_v2  ;;  %2601 = vmatpush.msra.mxu0 %v2404_v2 }
0x1d32   :  { %v2304_v29 = vmul.f32 %v3675_v15, %v2303_v39 }
0x1d33   :  { %2433 = vmatpush.msrb.mxu2 %v2402_v6  ;;  %2602 = vmatpush.msra.mxu0 %v2402_v6 }
0x1d34   :  { %v2305_v31 = vadd.f32 %v3675_v15, %v2304_v29 }
0x1d35   :  { %2434 = vmatpush.msrb.mxu2 %v2400_v9  ;;  %2603 = vmatpush.msra.mxu0 %v2400_v9 }
0x1d36   :  { %v2309_v42 = vsel %vm2308_vm15, %v3675_v15, %v2305_v31 }
0x1d37   :  { %v2314_v45 = vsel %vm2311_vm3, %v2313_v43, %v2309_v42  ;;  %2435 = vmatpush.msrb.mxu2 %v2398_v12  ;;  %2604 = vmatpush.msra.mxu0 %v2398_v12 }
0x1d38   :  { %v2338_v51 = vmul.f32 %v2336_v50, %v2314_v45 }
0x1d39   :  { %2436 = vmatpush.msrb.mxu2 %v2396_v16  ;;  %2605 = vmatpush.msra.mxu0 %v2396_v16 }
0x1d3b   :  { %2437 = vmatpush.msrb.mxu2 %v2394_v21  ;;  %2606 = vmatpush.msra.mxu0 %v2394_v21 }
0x1d3d   :  { %2768 = vmatpush.msra.mxu2 %v2408_v61 }
0x1d3f   :  { %2769 = vmatpush.msra.mxu2 %v2406_v0 }
0x1d41   :  { %2770 = vmatpush.msra.mxu2 %v2404_v2 }
0x1d43   :  { %2771 = vmatpush.msra.mxu2 %v2402_v6 }
0x1d45   :  { %2772 = vmatpush.msra.mxu2 %v2400_v9 }
0x1d47   :  { %2773 = vmatpush.msra.mxu2 %v2398_v12 }
0x1d49   :  { %2774 = vmatpush.msra.mxu2 %v2396_v16 }
0x1d4b   :  { %2775 = vmatpush.msra.mxu2 %v2394_v21 }
0x1d74   :  { %v2358_v37 = vpop.permute.xlu2 %2357 }
0x1d75   :  { %v2360_v38 = vmul.f32 %v2358_v37, %v2329_v20 }
0x1d77   :  { %2362 = vrot.lane.b32.xlu2 %v2360_v38, %s3779_s18 }
0x1d8b   :  { %v2341_v44 = vpop.permute.xlu1 %2340 }
0x1d8c   :  { %v2343_v46 = vmul.f32 %v2341_v44, %v2314_v45 }
0x1d8e   :  { %2345 = vrot.lane.b32.xlu1 %v2343_v46, %s3779_s18 }
0x1dd1   :  { %v2363_v48 = vpop.permute.xlu2 %2362 }
0x1dd2   :  { %v2365_v49 = vadd.f32 %v2363_v48, %v2355_v47 }
0x1dd4   :  { %3676 = vtanh.f32 %v2365_v49 }
0x1dda   :  { %v3677_v10 = vpop.eup %3676 }
0x1ddb   :  { %2368 = vrot.lane.b32.xlu1 %v3677_v10, %s3780_s3 }
0x1e00   :  { %v2346_v52 = vpop.permute.xlu1 %2345 }
0x1e01   :  { %v2348_v53 = vadd.f32 %v2346_v52, %v2338_v51 }
0x1e03   :  { %3678 = vtanh.f32 %v2348_v53  ;;  %2373 = vrot.lane.b32.xlu1 %v2348_v53, %s3781_s12 }
0x1e09   :  { %v3679_v54 = vpop.eup %3678 }
0x1e0a   :  { %2351 = vrot.lane.b32.xlu0 %v3679_v54, %s3780_s3 }
0x1e4d   :  { %v2369_v55 = vpop.permute.xlu1 %2368 }
0x1e4e   :  { %v4580_v56 = vmul.f32 %v2369_v55, %v2329_v20 }
0x1e50   :  { %2384 = vrot.lane.b32.xlu0 %v4580_v56, %s3780_s3 }
0x1e75   :  { %v2374_v57 = vpop.permute.xlu1 %2373 }
0x1e76   :  { %2376 = vst.msk [vmem:[#allocation8] sm:$0x3] %vm264_vm11, %v2374_v57 }
0x1e77   :  { %2377 = vst.msk [vmem:[#allocation8] sm:$0x3] %vm266_vm12, %v2365_v49 }
0x1e7c   :  { %v2352_v58 = vpop.permute.xlu0 %2351 }
0x1e7d   :  { %v2354_v59 = vmul.f32 %v2352_v58, %v2314_v45 }
0x1e7e   :  { %v4586_v60 = vld [vmem:[#allocation8] sm:$0x3] }
0x1e7f   :  { %2379 = vrot.lane.b32.xlu2 %v2354_v59, %s3779_s18  ;;  %2504 = vrot.lane.b32.xlu1 %v4586_v60, %s3779_s18 }
0x1ec2   :  { %v2385_v24 = vpop.permute.xlu0 %2384 }
0x1ed9   :  { %v2380_v23 = vpop.permute.xlu2 %2379 }
0x1eda   :  { %2382 = vst.msk [vmem:[#allocation7] sm:$0x3] %vm264_vm11, %v2380_v23 }
0x1edb   :  { %2388 = vst.msk [vmem:[#allocation5 + $0x8] sm:$0x3] %vm264_vm11, %v2380_v23 }
0x1edc   :  { %2387 = vst.msk [vmem:[#allocation7] sm:$0x3] %vm266_vm12, %v2385_v24 }
0x1ee3   :  { %v2393_v25 = vld [vmem:[#allocation7] sm:$0x3] }
0x1ee4   :  { %3440 = vmatmul.msk.f32.vlgmr.msrb.gmra.mxu2 %vm137_vm2, %v2393_v25  ;;  %3441 = vmatmul.msk.f32.vlgmr.msrb.gmra.mxu3 %vm137_vm2, %v2393_v25  ;;  %v2579_v25 = vld [vmem:[#allocation2 + $0x18] sm:$0x30] }
0x1ee5   :  { %v2584_v27 = vrot.slane %v2579_v25, 4 }
0x1ef1   :  { %v2505_v63 = vpop.permute.xlu1 %2504 }
0x1f67   :  { %v2439_v32 = vpop.f32.mrf.mxu2  ;;  %v2459_v35 = vpop.f32.mrf.mxu3 }
0x1f68   :  { %v2440_v33 = vadd.f32 %v2439_v32, %v2415_v28  ;;  %v2460_v34 = vadd.f32 %v3439_v30, %v2459_v35  ;;  %v3444_v28 = vrot.slane %v2580_v19, 10 }
0x1f6a   :  { %3680 = vtanh.f32 %v2440_v33  ;;  %v3442_v26 = vmul.f32 -1.442695, %v2440_v33  ;;  %v3443_v38 = vmul.f32 -1.442695, %v2460_v34 }
0x1f6b   :  { %3682 = vtanh.f32 %v2460_v34 }
0x1f6c   :  { %3684 = vpow2.f32 %v3442_v26 }
0x1f70   :  { %v3681_v14 = vpop.eup %3680 }
0x1f71   :  { %v3683_v36 = vpop.eup %3682  ;;  %2509 = vrot.lane.b32.xlu2 %v3681_v14, %s3780_s3 }
0x1f72   :  { %2526 = vrot.lane.b32.xlu0 %v3683_v36, %s3780_s3  ;;  %v3685_v37 = vpop.eup %3684 }
0x1f73   :  { %v2468_v20 = vadd.f32 1.0, %v3685_v37 }
0x1f75   :  { %3686 = vrcp.f32 %v2468_v20  ;;  %v2481_v42 = vand.u32 2147483648, %v2468_v20  ;;  %vm2475_vm5 = vweird.f32 %v2468_v20  ;;  %v2479_v43 = vand.u32 2147483647, %v2468_v20 }
0x1f76   :  { %3688 = vpow2.f32 %v3443_v38 }
0x1f77   :  { %v2482_v45 = vor.u32 1.1754944e-38, %v2481_v42  ;;  %vm2480_vm7 = vcmp.eq.f32.partialorder %v2479_v43, 8.507059e+37 }
0x1f7b   :  { %v3687_v15 = vpop.eup %3686 }
0x1f7c   :  { %v2471_v22 = vmul.f32 %v3687_v15, %v2468_v20  ;;  %v3689_v31 = vpop.eup %3688  ;;  %vm2476_vm4 = vweird.f32 %v3687_v15 }
0x1f7d   :  { %v2469_v40 = vadd.f32 1.0, %v3689_v31  ;;  %vm2477_vm6 = vmor %vm2475_vm5, %vm2476_vm4 }
0x1f7e   :  { %v2472_v39 = vsub.f32 1.0, %v2471_v22 }
0x1f7f   :  { %3690 = vrcp.f32 %v2469_v40  ;;  %v2496_v53 = vand.u32 2147483648, %v2469_v40  ;;  %vm2490_vm9 = vweird.f32 %v2469_v40  ;;  %v2494_v54 = vand.u32 2147483647, %v2469_v40 }
0x1f80   :  { %v2473_v29 = vmul.f32 %v3687_v15, %v2472_v39 }
0x1f81   :  { %v2497_v57 = vor.u32 1.1754944e-38, %v2496_v53  ;;  %vm2495_vm13 = vcmp.eq.f32.partialorder %v2494_v54, 8.507059e+37 }
0x1f82   :  { %v2474_v41 = vadd.f32 %v3687_v15, %v2473_v29 }
0x1f84   :  { %v2478_v44 = vsel %vm2477_vm6, %v3687_v15, %v2474_v41 }
0x1f85   :  { %v2483_v47 = vsel %vm2480_vm7, %v2482_v45, %v2478_v44  ;;  %v3691_v49 = vpop.eup %3690 }
0x1f86   :  { %v2486_v10 = vmul.f32 %v3691_v49, %v2469_v40  ;;  %vm2491_vm8 = vweird.f32 %v3691_v49  ;;  %v2507_v0 = vmul.f32 %v2505_v63, %v2483_v47 }
0x1f87   :  { %vm2492_vm10 = vmor %vm2490_vm9, %vm2491_vm8 }
0x1f88   :  { %v2487_v50 = vsub.f32 1.0, %v2486_v10 }
0x1f8a   :  { %v2488_v51 = vmul.f32 %v3691_v49, %v2487_v50 }
0x1f8c   :  { %v2489_v52 = vadd.f32 %v3691_v49, %v2488_v51 }
0x1f8e   :  { %v2493_v55 = vsel %vm2492_vm10, %v3691_v49, %v2489_v52 }
0x1f8f   :  { %v2498_v59 = vsel %vm2495_vm13, %v2497_v57, %v2493_v55 }
0x1f90   :  { %v2524_v6 = vmul.f32 %v4586_v60, %v2498_v59 }
0x1fcb   :  { %v2510_v46 = vpop.permute.xlu2 %2509 }
0x1fcc   :  { %v2512_v48 = vmul.f32 %v2510_v46, %v2483_v47 }
0x1fce   :  { %2514 = vrot.lane.b32.xlu2 %v2512_v48, %s3779_s18 }
0x1fe4   :  { %v2527_v58 = vpop.permute.xlu0 %2526 }
0x1fe5   :  { %v2529_v61 = vmul.f32 %v2527_v58, %v2498_v59 }
0x1fe7   :  { %2531 = vrot.lane.b32.xlu0 %v2529_v61, %s3779_s18 }
0x2028   :  { %v2515_v1 = vpop.permute.xlu2 %2514 }
0x2029   :  { %v2517_v2 = vadd.f32 %v2515_v1, %v2507_v0 }
0x202b   :  { %3692 = vtanh.f32 %v2517_v2 }
0x2031   :  { %v3693_v4 = vpop.eup %3692 }
0x2032   :  { %2520 = vrot.lane.b32.xlu1 %v3693_v4, %s3780_s3 }
0x2059   :  { %v2532_v8 = vpop.permute.xlu0 %2531 }
0x205a   :  { %v2534_v9 = vadd.f32 %v2532_v8, %v2524_v6 }
0x205c   :  { %3694 = vtanh.f32 %v2534_v9 }
0x2062   :  { %v3695_v11 = vpop.eup %3694 }
0x2063   :  { %2537 = vrot.lane.b32.xlu2 %v3695_v11, %s3780_s3 }
0x206b   :  { %2542 = vrot.lane.b32.xlu2 %v2517_v2, %s3781_s12 }
0x20a4   :  { %v2521_v12 = vpop.permute.xlu1 %2520 }
0x20a5   :  { %v2523_v13 = vmul.f32 %v2521_v12, %v2483_v47 }
0x20a7   :  { %2548 = vrot.lane.b32.xlu0 %v2523_v13, %s3779_s18 }
0x20bd   :  { %v2538_v16 = vpop.permute.xlu2 %2537 }
0x20be   :  { %v4653_v17 = vmul.f32 %v2538_v16, %v2498_v59 }
0x20c0   :  { %2553 = vrot.lane.b32.xlu1 %v4653_v17, %s3780_s3 }
0x20c5   :  { %v2543_v21 = vpop.permute.xlu2 %2542 }
0x20c6   :  { %2545 = vst.msk [vmem:[#allocation8] sm:$0x3] %vm264_vm11, %v2543_v21 }
0x20c7   :  { %2546 = vst.msk [vmem:[#allocation8] sm:$0x3] %vm266_vm12, %v2534_v9 }
0x20ce   :  { %v4659_v60 = vld [vmem:[#allocation8] sm:$0x3] }
0x20cf   :  { %2673 = vrot.lane.b32.xlu2 %v4659_v60, %s3779_s18 }
0x2119   :  { %v2549_v5 = vpop.permute.xlu0 %2548 }
0x211a   :  { %2551 = vst.msk [vmem:[#allocation7] sm:$0x3] %vm264_vm11, %v2549_v5 }
0x211b   :  { %2557 = vst.msk [vmem:[#allocation5 + $0xa] sm:$0x3] %vm264_vm11, %v2549_v5 }
0x2129   :  { %v2674_v61 = vpop.permute.xlu2 %2673 }
0x2132   :  { %v2554_v23 = vpop.permute.xlu1 %2553 }
0x2133   :  { %2556 = vst.msk [vmem:[#allocation7] sm:$0x3] %vm266_vm12, %v2554_v23 }
0x213a   :  { %v2562_v24 = vld [vmem:[#allocation7] sm:$0x3] }
0x213b   :  { %3445 = vmatmul.msk.f32.vlgmr.msra.gmra.mxu0 %vm137_vm2, %v2562_v24  ;;  %3446 = vmatmul.msk.f32.vlgmr.msra.gmra.mxu1 %vm137_vm2, %v2562_v24 }
0x21b8   :  { %v2608_v30 = vpop.f32.mrf.mxu0  ;;  %v2628_v32 = vpop.f32.mrf.mxu1 }
0x21b9   :  { %v2609_v35 = vadd.f32 %v2608_v30, %v2584_v27  ;;  %v2629_v33 = vadd.f32 %v3444_v28, %v2628_v32  ;;  %v2749_v27 = vld [vmem:[#allocation2] sm:$0x3]  ;;  %v2748_v32 = vld [vmem:[#allocation2 + $0x18] sm:$0xc0] }
0x21bb   :  { %3696 = vtanh.f32 %v2609_v35  ;;  %v3447_v36 = vmul.f32 -1.442695, %v2609_v35  ;;  %v3448_v26 = vmul.f32 -1.442695, %v2629_v33 }
0x21bc   :  { %3698 = vtanh.f32 %v2629_v33  ;;  %v2753_v33 = vrot.slane %v2748_v32, 6  ;;  %v2937_v32 = vld [vmem:[%s5096_s7 + $0xb8] sm:$0xff] }
0x21bd   :  { %3700 = vpow2.f32 %v3447_v36 }
0x21be   :  { %3702 = vpow2.f32 %v3448_v26 }
0x21c1   :  { %v3697_v34 = vpop.eup %3696 }
0x21c2   :  { %v3699_v14 = vpop.eup %3698  ;;  %2678 = vrot.lane.b32.xlu0 %v3697_v34, %s3780_s3 }
0x21c3   :  { %2695 = vrot.lane.b32.xlu1 %v3699_v14, %s3780_s3  ;;  %v3701_v37 = vpop.eup %3700 }
0x21c4   :  { %v3703_v20 = vpop.eup %3702  ;;  %v2637_v15 = vadd.f32 1.0, %v3701_v37 }
0x21c5   :  { %v2638_v38 = vadd.f32 1.0, %v3703_v20 }
0x21c6   :  { %3704 = vrcp.f32 %v2637_v15  ;;  %v2650_v46 = vand.u32 2147483648, %v2637_v15  ;;  %vm2644_vm15 = vweird.f32 %v2637_v15  ;;  %v2648_v48 = vand.u32 2147483647, %v2637_v15 }
0x21c7   :  { %3706 = vrcp.f32 %v2638_v38  ;;  %v2665_v47 = vand.u32 2147483648, %v2638_v38  ;;  %vm2659_vm3 = vweird.f32 %v2638_v38  ;;  %v2663_v49 = vand.u32 2147483647, %v2638_v38 }
0x21c8   :  { %v2651_v51 = vor.u32 1.1754944e-38, %v2650_v46  ;;  %vm2649_vm6 = vcmp.eq.f32.partialorder %v2648_v48, 8.507059e+37 }
0x21c9   :  { %v2666_v52 = vor.u32 1.1754944e-38, %v2665_v47  ;;  %vm2664_vm7 = vcmp.eq.f32.partialorder %v2663_v49, 8.507059e+37 }
0x21cc   :  { %v3705_v22 = vpop.eup %3704 }
0x21cd   :  { %v3707_v39 = vpop.eup %3706  ;;  %v2640_v29 = vmul.f32 %v3705_v22, %v2637_v15  ;;  %vm2645_vm0 = vweird.f32 %v3705_v22 }
0x21ce   :  { %v2655_v31 = vmul.f32 %v3707_v39, %v2638_v38  ;;  %vm2660_vm14 = vweird.f32 %v3707_v39  ;;  %vm2646_vm4 = vmor %vm2644_vm15, %vm2645_vm0 }
0x21cf   :  { %v2641_v40 = vsub.f32 1.0, %v2640_v29  ;;  %vm2661_vm5 = vmor %vm2659_vm3, %vm2660_vm14 }
0x21d0   :  { %v2656_v41 = vsub.f32 1.0, %v2655_v31 }
0x21d1   :  { %v2642_v42 = vmul.f32 %v3705_v22, %v2641_v40 }
0x21d2   :  { %v2657_v43 = vmul.f32 %v3707_v39, %v2656_v41 }
0x21d3   :  { %v2643_v44 = vadd.f32 %v3705_v22, %v2642_v42 }
0x21d4   :  { %v2658_v45 = vadd.f32 %v3707_v39, %v2657_v43 }
0x21d5   :  { %v2647_v10 = vsel %vm2646_vm4, %v3705_v22, %v2643_v44 }
0x21d6   :  { %v2662_v50 = vsel %vm2661_vm5, %v3707_v39, %v2658_v45  ;;  %v2652_v54 = vsel %vm2649_vm6, %v2651_v51, %v2647_v10 }
0x21d7   :  { %v2667_v57 = vsel %vm2664_vm7, %v2666_v52, %v2662_v50  ;;  %v2676_v63 = vmul.f32 %v2674_v61, %v2652_v54 }
0x21d8   :  { %v2693_v0 = vmul.f32 %v4659_v60, %v2667_v57 }
0x2234   :  { %v2679_v53 = vpop.permute.xlu0 %2678 }
0x2235   :  { %v2696_v55 = vpop.permute.xlu1 %2695  ;;  %v2681_v58 = vmul.f32 %v2679_v53, %v2652_v54 }
0x2236   :  { %v2698_v59 = vmul.f32 %v2696_v55, %v2667_v57 }
0x2237   :  { %2683 = vrot.lane.b32.xlu0 %v2681_v58, %s3779_s18 }
0x2238   :  { %2700 = vrot.lane.b32.xlu1 %v2698_v59, %s3779_s18 }
0x22a9   :  { %v2684_v1 = vpop.permute.xlu0 %2683 }
0x22aa   :  { %v2701_v2 = vpop.permute.xlu1 %2700  ;;  %v2686_v4 = vadd.f32 %v2684_v1, %v2676_v63 }
0x22ab   :  { %v2703_v6 = vadd.f32 %v2701_v2, %v2693_v0 }
0x22ac   :  { %3708 = vtanh.f32 %v2686_v4 }
0x22ad   :  { %3710 = vtanh.f32 %v2703_v6 }
0x22b2   :  { %v3709_v8 = vpop.eup %3708 }
0x22b3   :  { %v3711_v9 = vpop.eup %3710  ;;  %2689 = vrot.lane.b32.xlu2 %v3709_v8, %s3780_s3 }
0x22b4   :  { %2706 = vrot.lane.b32.xlu0 %v3711_v9, %s3780_s3 }
0x230d   :  { %v2690_v11 = vpop.permute.xlu2 %2689 }
0x230e   :  { %v2692_v12 = vmul.f32 %v2690_v11, %v2652_v54 }
0x2310   :  { %2717 = vrot.lane.b32.xlu1 %v2692_v12, %s3779_s18 }
0x2318   :  { %2711 = vrot.lane.b32.xlu1 %v2686_v4, %s3781_s12 }
0x2326   :  { %v2707_v13 = vpop.permute.xlu0 %2706 }
0x2327   :  { %v4677_v16 = vmul.f32 %v2707_v13, %v2667_v57 }
0x2329   :  { %2722 = vrot.lane.b32.xlu2 %v4677_v16, %s3780_s3 }
0x2382   :  { %v2718_v21 = vpop.permute.xlu1 %2717 }
0x2383   :  { %2720 = vst.msk [vmem:[#allocation7] sm:$0x3] %vm264_vm11, %v2718_v21  ;;  %v2723_v60 = vpop.permute.xlu2 %2722 }
0x2384   :  { %2726 = vst.msk [vmem:[#allocation5 + $0xc] sm:$0x3] %vm264_vm11, %v2718_v21  ;;  %v2942_v21 = vld [vmem:[%s5096_s7 + $0xe0] sm:$0xff] }
0x2385   :  { %2725 = vst.msk [vmem:[#allocation7] sm:$0x3] %vm266_vm12, %v2723_v60  ;;  %v2943_v60 = vld [vmem:[%s5096_s7 + $0xe8] sm:$0xff]  ;;  %2960 = vmatpush.msrb.mxu0 %v2942_v21  ;;  %v3078_v21 = vld [vmem:[%s5097_s8 + $0xd0] sm:$0xff] }
0x2386   :  { %2983 = vmatpush.msrb.mxu1 %v2943_v60  ;;  %v3095_v60 = vld [vmem:[%s5097_s8 + $0x158] sm:$0xff] }
0x238a   :  { %v2712_v5 = vpop.permute.xlu1 %2711 }
0x238b   :  { %2714 = vst.msk [vmem:[#allocation8] sm:$0x3] %vm264_vm11, %v2712_v5  ;;  %v2945_v5 = vld [vmem:[%s5096_s7 + $0xf8] sm:$0xff] }
0x238c   :  { %2715 = vst.msk [vmem:[#allocation8] sm:$0x3] %vm266_vm12, %v2703_v6  ;;  %v2731_v23 = vld [vmem:[#allocation7] sm:$0x3]  ;;  %3029 = vmatpush.msrb.mxu3 %v2945_v5  ;;  %v3061_v5 = vld [vmem:[%s5097_s8 + $0x48] sm:$0xff] }
0x238d   :  { %3450 = vmatmul.msk.f32.vlgmr.msra.gmra.mxu2 %vm137_vm2, %v2731_v23  ;;  %3451 = vmatmul.msk.f32.vlgmr.msra.gmra.mxu3 %vm137_vm2, %v2731_v23  ;;  %v2938_v23 = vld [vmem:[%s5096_s7 + $0xc0] sm:$0xff] }
0x238e   :  { %2961 = vmatpush.msrb.mxu0 %v2938_v23  ;;  %v3077_v23 = vld [vmem:[%s5097_s8 + $0xc8] sm:$0xff] }
0x2393   :  { %v4688_v24 = vld [vmem:[#allocation8] sm:$0x3] }
0x2394   :  { %2842 = vrot.lane.b32.xlu1 %v4688_v24, %s3779_s18 }
0x239c   :  { %2389 = vrot.lane.b32.xlu1 %v4580_v56, %s3779_s18 }
0x2406   :  { %v4694_v25 = vpop.permute.xlu1 %2842 }
0x240e   :  { %v2390_v19 = vpop.permute.xlu1 %2389 }
0x240f   :  { %2392 = vst.msk [vmem:[#allocation6 + $0x6] sm:$0x3] %vm264_vm11, %v2390_v19  ;;  %v2941_v19 = vld [vmem:[%s5096_s7 + $0xd8] sm:$0xff] }
0x2410   :  { %v2797_v28 = vpop.f32.mrf.mxu3  ;;  %v2777_v35 = vpop.f32.mrf.mxu2  ;;  %3030 = vmatpush.msrb.mxu3 %v2941_v19 }
0x2411   :  { %v2798_v30 = vadd.f32 %v2797_v28, %v2749_v27  ;;  %v2778_v34 = vadd.f32 %v2777_v35, %v2753_v33  ;;  %v2934_v27 = vld [vmem:[%s5096_s7 + $0xa0] sm:$0xff]  ;;  %v2935_v28 = vld [vmem:[%s5096_s7 + $0xa8] sm:$0xff] }
0x2412   :  { %v2930_v35 = vld [vmem:[%s5096_s7 + $0x80] sm:$0xff]  ;;  %v2931_v33 = vld [vmem:[%s5096_s7 + $0x88] sm:$0xff]  ;;  %2962 = vmatpush.msrb.mxu0 %v2934_v27  ;;  %3031 = vmatpush.msrb.mxu3 %v2937_v32 }
0x2413   :  { %3712 = vtanh.f32 %v2798_v30  ;;  %v3453_v56 = vmul.f32 -1.442695, %v2798_v30  ;;  %v3452_v26 = vmul.f32 -1.442695, %v2778_v34  ;;  %v2936_v30 = vld [vmem:[%s5096_s7 + $0xb0] sm:$0xff]  ;;  %v3060_v27 = vld [vmem:[%s5097_s8 + $0x40] sm:$0xff] }
0x2414   :  { %3714 = vtanh.f32 %v2778_v34  ;;  %v2932_v34 = vld [vmem:[%s5096_s7 + $0x90] sm:$0xff]  ;;  %2963 = vmatpush.msrb.mxu0 %v2930_v35  ;;  %v3109_v32 = vld [vmem:[%s5097_s8 + $0x1c8] sm:$0xff]  ;;  %v3059_v35 = vld [vmem:[%s5097_s8 + $0x38] sm:$0xff] }
0x2415   :  { %3716 = vpow2.f32 %v3453_v56  ;;  %v2927_v56 = vld [vmem:[%s5096_s7 + $0x68] sm:$0xff] }
0x2416   :  { %3718 = vpow2.f32 %v3452_v26 }
0x2419   :  { %v3713_v14 = vpop.eup %3712 }
0x241a   :  { %2864 = vrot.lane.b32.xlu0 %v3713_v14, %s3780_s3  ;;  %v3715_v36 = vpop.eup %3714  ;;  %v2933_v14 = vld [vmem:[%s5096_s7 + $0x98] sm:$0xff] }
0x241b   :  { %v3717_v37 = vpop.eup %3716  ;;  %3032 = vmatpush.msrb.mxu3 %v2933_v14  ;;  %v3058_v14 = vld [vmem:[%s5097_s8 + $0x30] sm:$0xff] }
0x241c   :  { %v2807_v20 = vadd.f32 1.0, %v3717_v37  ;;  %v3719_v15 = vpop.eup %3718  ;;  %v2928_v37 = vld [vmem:[%s5096_s7 + $0x70] sm:$0xff] }
0x241d   :  { %v2806_v38 = vadd.f32 1.0, %v3719_v15  ;;  %v2922_v15 = vld [vmem:[%s5096_s7 + $0x40] sm:$0xff] }
0x241e   :  { %3720 = vrcp.f32 %v2807_v20  ;;  %v2834_v44 = vand.u32 2147483648, %v2807_v20  ;;  %vm2828_vm9 = vweird.f32 %v2807_v20  ;;  %v2832_v45 = vand.u32 2147483647, %v2807_v20 }
0x241f   :  { %3722 = vrcp.f32 %v2806_v38  ;;  %v2819_v52 = vand.u32 2147483648, %v2806_v38  ;;  %vm2813_vm14 = vweird.f32 %v2806_v38  ;;  %v2817_v53 = vand.u32 2147483647, %v2806_v38 }
0x2420   :  { %v2835_v48 = vor.u32 1.1754944e-38, %v2834_v44  ;;  %vm2833_vm13 = vcmp.eq.f32.partialorder %v2832_v45, 8.507059e+37 }
0x2421   :  { %v2820_v55 = vor.u32 1.1754944e-38, %v2819_v52  ;;  %vm2818_vm3 = vcmp.eq.f32.partialorder %v2817_v53, 8.507059e+37 }
0x2422   :  { %2847 = vrot.lane.b32.xlu0 %v3715_v36, %s3780_s3  ;;  %v2926_v36 = vld [vmem:[%s5096_s7 + $0x60] sm:$0xff] }
0x2423   :  { %2964 = vmatpush.msrb.mxu0 %v2926_v36  ;;  %v3074_v36 = vld [vmem:[%s5097_s8 + $0xb0] sm:$0xff] }
0x2424   :  { %v3721_v22 = vpop.eup %3720 }
0x2425   :  { %v2824_v39 = vmul.f32 %v3721_v22, %v2807_v20  ;;  %v3723_v31 = vpop.eup %3722  ;;  %vm2829_vm8 = vweird.f32 %v3721_v22  ;;  %v2929_v20 = vld [vmem:[%s5096_s7 + $0x78] sm:$0xff]  ;;  %2965 = vmatpush.msrb.mxu0 %v2922_v15  ;;  %v3056_v15 = vld [vmem:[%s5097_s8 + $0x20] sm:$0xff] }
0x2426   :  { %v2809_v41 = vmul.f32 %v3723_v31, %v2806_v38  ;;  %vm2830_vm10 = vmor %vm2828_vm9, %vm2829_vm8  ;;  %vm2814_vm0 = vweird.f32 %v3723_v31  ;;  %v2923_v38 = vld [vmem:[%s5096_s7 + $0x48] sm:$0xff]  ;;  %3033 = vmatpush.msrb.mxu3 %v2929_v20 }
0x2427   :  { %v2825_v29 = vsub.f32 1.0, %v2824_v39  ;;  %vm2815_vm15 = vmor %vm2813_vm14, %vm2814_vm0  ;;  %v2925_v39 = vld [vmem:[%s5096_s7 + $0x58] sm:$0xff]  ;;  %v3073_v20 = vld [vmem:[%s5097_s8 + $0xa8] sm:$0xff]  ;;  %vm3315_vm0 = vcmask 1040384  }
0x2428   :  { %v2810_v43 = vsub.f32 1.0, %v2809_v41  ;;  %v2921_v41 = vld [vmem:[%s5096_s7 + $0x38] sm:$0xff]  ;;  %3034 = vmatpush.msrb.mxu3 %v2925_v39 }
0x2429   :  { %v2826_v40 = vmul.f32 %v3721_v22, %v2825_v29  ;;  %v2918_v29 = vld [vmem:[%s5096_s7 + $0x20] sm:$0xff] }
0x242a   :  { %v2811_v47 = vmul.f32 %v3723_v31, %v2810_v43  ;;  %2966 = vmatpush.msrb.mxu0 %v2918_v29  ;;  %3035 = vmatpush.msrb.mxu3 %v2921_v41  ;;  %v3090_v41 = vld [vmem:[%s5097_s8 + $0x130] sm:$0xff] }
0x242b   :  { %v2827_v42 = vadd.f32 %v3721_v22, %v2826_v40  ;;  %v2920_v40 = vld [vmem:[%s5096_s7 + $0x30] sm:$0xff] }
0x242c   :  { %v2812_v51 = vadd.f32 %v3723_v31, %v2811_v47 }
0x242d   :  { %v2831_v46 = vsel %vm2830_vm10, %v3721_v22, %v2827_v42  ;;  %v2924_v22 = vld [vmem:[%s5096_s7 + $0x50] sm:$0xff] }
0x242e   :  { %v2836_v10 = vsel %vm2833_vm13, %v2835_v48, %v2831_v46  ;;  %v2816_v54 = vsel %vm2815_vm15, %v3723_v31, %v2812_v51  ;;  %v2919_v31 = vld [vmem:[%s5096_s7 + $0x28] sm:$0xff]  ;;  %v2914_v48 = vld [vmem:[%s5096_s7] sm:$0xff] }
0x242f   :  { %v2821_v58 = vsel %vm2818_vm3, %v2820_v55, %v2816_v54  ;;  %v2862_v61 = vmul.f32 %v4688_v24, %v2836_v10  ;;  %v2939_v24 = vld [vmem:[%s5096_s7 + $0xc8] sm:$0xff]  ;;  %2967 = vmatpush.msrb.mxu0 %v2914_v48  ;;  %v2900_v51 = vld [vmem:[#allocation5] sm:$0xff]  ;;  %v3067_v54 = vld [vmem:[%s5097_s8 + $0x78] sm:$0xff] }
0x2430   :  { %v2845_v1 = vmul.f32 %v4694_v25, %v2821_v58  ;;  %v2940_v25 = vld [vmem:[%s5096_s7 + $0xd0] sm:$0xff]  ;;  %2984 = vmatpush.msrb.mxu1 %v2939_v24  ;;  %v3083_v55 = vld [vmem:[%s5097_s8 + $0xf8] sm:$0xff]  ;;  %v3069_v48 = vld [vmem:[%s5097_s8 + $0x88] sm:$0xff] }
0x2431   :  { %3116 = vmatpush.msra.mxu0 %v3067_v54  ;;  %v3094_v24 = vld [vmem:[%s5097_s8 + $0x150] sm:$0xff] }
0x2432   :  { %2985 = vmatpush.msrb.mxu1 %v2935_v28  ;;  %v3076_v28 = vld [vmem:[%s5097_s8 + $0xc0] sm:$0xff]  ;;  %v3086_v54 = vld [vmem:[%s5097_s8 + $0x110] sm:$0xff] }
0x2434   :  { %2986 = vmatpush.msrb.mxu1 %v2931_v33  ;;  %v3075_v33 = vld [vmem:[%s5097_s8 + $0xb8] sm:$0xff] }
0x2436   :  { %2987 = vmatpush.msrb.mxu1 %v2927_v56  ;;  %v3091_v56 = vld [vmem:[%s5097_s8 + $0x138] sm:$0xff] }
0x2438   :  { %2988 = vmatpush.msrb.mxu1 %v2923_v38  ;;  %v3072_v38 = vld [vmem:[%s5097_s8 + $0xa0] sm:$0xff] }
0x243a   :  { %2989 = vmatpush.msrb.mxu1 %v2919_v31  ;;  %v3055_v31 = vld [vmem:[%s5097_s8 + $0x18] sm:$0xff] }
0x248c   :  { %v2865_v49 = vpop.permute.xlu0 %2864 }
0x248d   :  { %v2867_v50 = vmul.f32 %v2865_v49, %v2836_v10  ;;  %v2915_v49 = vld [vmem:[%s5096_s7 + $0x8] sm:$0xff] }
0x248e   :  { %2990 = vmatpush.msrb.mxu1 %v2915_v49  ;;  %v3088_v49 = vld [vmem:[%s5097_s8 + $0x120] sm:$0xff] }
0x248f   :  { %2869 = vrot.lane.b32.xlu2 %v2867_v50, %s3779_s18  ;;  %v2917_v50 = vld [vmem:[%s5096_s7 + $0x18] sm:$0xff] }
0x2490   :  { %3036 = vmatpush.msrb.mxu3 %v2917_v50  ;;  %3139 = vmatpush.msra.mxu1 %v3083_v55  ;;  %v3052_v50 = vld [vmem:[%s5097_s8] sm:$0xff]  ;;  %v3102_v55 = vld [vmem:[%s5097_s8 + $0x190] sm:$0xff] }
0x2494   :  { %v2848_v57 = vpop.permute.xlu0 %2847 }
0x2495   :  { %v2850_v59 = vmul.f32 %v2848_v57, %v2821_v58  ;;  %v3066_v57 = vld [vmem:[%s5097_s8 + $0x70] sm:$0xff] }
0x2496   :  { %3117 = vmatpush.msra.mxu0 %v3066_v57  ;;  %v3085_v57 = vld [vmem:[%s5097_s8 + $0x108] sm:$0xff] }
0x2497   :  { %2852 = vrot.lane.b32.xlu2 %v2850_v59, %s3779_s18  ;;  %v3065_v59 = vld [vmem:[%s5097_s8 + $0x68] sm:$0xff] }
0x2498   :  { %3118 = vmatpush.msra.mxu0 %v3065_v59  ;;  %v3084_v59 = vld [vmem:[%s5097_s8 + $0x100] sm:$0xff] }
0x249f   :  { %2558 = vrot.lane.b32.xlu2 %v4653_v17, %s3779_s18 }
0x24e9   :  { %v2870_v63 = vpop.permute.xlu2 %2869 }
0x24ea   :  { %v4704_v0 = vadd.f32 %v2870_v63, %v2862_v61  ;;  %v3081_v61 = vld [vmem:[%s5097_s8 + $0xe8] sm:$0xff]  ;;  %v3099_v63 = vld [vmem:[%s5097_s8 + $0x178] sm:$0xff] }
0x24ec   :  { %3724 = vtanh.f32 %v4704_v0 }
0x24f1   :  { %v2853_v2 = vpop.permute.xlu2 %2852 }
0x24f2   :  { %v3725_v4 = vpop.eup %3724  ;;  %v4708_v6 = vadd.f32 %v2853_v2, %v2845_v1  ;;  %v3064_v1 = vld [vmem:[%s5097_s8 + $0x60] sm:$0xff]  ;;  %v3115_v2 = vld [vmem:[%s5097_s8 + $0x1f8] sm:$0xff] }
0x24f3   :  { %2875 = vrot.lane.b32.xlu0 %v3725_v4, %s3780_s3  ;;  %3185 = vmatpush.msra.mxu3 %v3115_v2 }
0x24f4   :  { %3726 = vtanh.f32 %v4708_v6  ;;  %3119 = vmatpush.msra.mxu0 %v3064_v1 }
0x24f9   :  { %v2559_v8 = vpop.permute.xlu2 %2558 }
0x24fa   :  { %v3727_v9 = vpop.eup %3726  ;;  %2561 = vst.msk [vmem:[#allocation6 + $0x4] sm:$0x3] %vm264_vm11, %v2559_v8  ;;  %v3098_v8 = vld [vmem:[%s5097_s8 + $0x170] sm:$0xff] }
0x24fb   :  { %2727 = vrot.lane.b32.xlu0 %v4677_v16, %s3779_s18  ;;  %2858 = vrot.lane.b32.xlu2 %v3727_v9, %s3780_s3  ;;  %v3114_v9 = vld [vmem:[%s5097_s8 + $0x1f0] sm:$0xff] }
0x24fc   :  { %3186 = vmatpush.msra.mxu3 %v3114_v9 }
0x2503   :  { %1717 = vrot.lane.b32.xlu0 %v4485_v18, %s3779_s18  ;;  %2055 = vrot.lane.b32.xlu2 %v4533_v3, %s3779_s18 }
0x250b   :  { %2224 = vrot.lane.b32.xlu0 %v4557_v62, %s3779_s18 }
0x2555   :  { %v2859_v17 = vpop.permute.xlu2 %2858 }
0x2556   :  { %v2861_v3 = vmul.f32 %v2859_v17, %v2821_v58  ;;  %v3082_v58 = vld [vmem:[%s5097_s8 + $0xf0] sm:$0xff]  ;;  %v3097_v17 = vld [vmem:[%s5097_s8 + $0x168] sm:$0xff] }
0x2557   :  { %3140 = vmatpush.msra.mxu1 %v3082_v58  ;;  %v3101_v58 = vld [vmem:[%s5097_s8 + $0x188] sm:$0xff] }
0x2559   :  { %3141 = vmatpush.msra.mxu1 %v3081_v61  ;;  %v3100_v61 = vld [vmem:[%s5097_s8 + $0x180] sm:$0xff] }
0x255d   :  { %v2056_v11 = vpop.permute.xlu2 %2055 }
0x255e   :  { %2058 = vst.msk [vmem:[#allocation6 + $0xa] sm:$0x3] %vm264_vm11, %v2056_v11  ;;  %v3113_v11 = vld [vmem:[%s5097_s8 + $0x1e8] sm:$0xff] }
0x255f   :  { %3187 = vmatpush.msra.mxu3 %v3113_v11 }
0x2565   :  { %v2876_v12 = vpop.permute.xlu0 %2875 }
0x2566   :  { %v4723_v13 = vmul.f32 %v2876_v12, %v2836_v10  ;;  %v2916_v10 = vld [vmem:[%s5096_s7 + $0x10] sm:$0xff]  ;;  %v3063_v12 = vld [vmem:[%s5097_s8 + $0x58] sm:$0xff] }
0x2567   :  { %3120 = vmatpush.msra.mxu0 %v3063_v12 }
0x2568   :  { %2896 = vrot.lane.b32.xlu1 %v4723_v13, %s3779_s18 }
0x256d   :  { %v2728_v16 = vpop.permute.xlu0 %2727 }
0x256e   :  { %2730 = vst.msk [vmem:[#allocation6 + $0x2] sm:$0x3] %vm264_vm11, %v2728_v16  ;;  %v3079_v16 = vld [vmem:[%s5097_s8 + $0xd8] sm:$0xff] }
0x2570   :  { %1886 = vrot.lane.b32.xlu1 %v4508_v7, %s3779_s18  ;;  %v2944_v7 = vld [vmem:[%s5096_s7 + $0xf0] sm:$0xff] }
0x2571   :  { %3006 = vmatpush.msrb.mxu2 %v2944_v7  ;;  %v3111_v7 = vld [vmem:[%s5097_s8 + $0x1d8] sm:$0xff] }
0x2573   :  { %3007 = vmatpush.msrb.mxu2 %v2940_v25  ;;  %v3110_v25 = vld [vmem:[%s5097_s8 + $0x1d0] sm:$0xff] }
0x2575   :  { %v1718_v18 = vpop.permute.xlu0 %1717  ;;  %3008 = vmatpush.msrb.mxu2 %v2936_v30  ;;  %v3093_v30 = vld [vmem:[%s5097_s8 + $0x148] sm:$0xff] }
0x2576   :  { %1720 = vst.msk [vmem:[#allocation6 + $0xe] sm:$0x3] %vm264_vm11, %v1718_v18  ;;  %v3096_v18 = vld [vmem:[%s5097_s8 + $0x160] sm:$0xff] }
0x2577   :  { %3009 = vmatpush.msrb.mxu2 %v2932_v34  ;;  %v3092_v34 = vld [vmem:[%s5097_s8 + $0x140] sm:$0xff] }
0x2578   :  { %2886 = vrot.lane.b32.xlu1 %v2861_v3, %s3779_s18  ;;  %v3112_v3 = vld [vmem:[%s5097_s8 + $0x1e0] sm:$0xff] }
0x2579   :  { %3010 = vmatpush.msrb.mxu2 %v2928_v37  ;;  %3188 = vmatpush.msra.mxu3 %v3112_v3  ;;  %v3057_v37 = vld [vmem:[%s5097_s8 + $0x28] sm:$0xff] }
0x257b   :  { %3011 = vmatpush.msrb.mxu2 %v2924_v22  ;;  %3189 = vmatpush.msra.mxu3 %v3111_v7 }
0x257d   :  { %v2225_v62 = vpop.permute.xlu0 %2224  ;;  %3012 = vmatpush.msrb.mxu2 %v2920_v40  ;;  %3190 = vmatpush.msra.mxu3 %v3110_v25  ;;  %v3071_v40 = vld [vmem:[%s5097_s8 + $0x98] sm:$0xff] }
0x257e   :  { %2227 = vst.msk [vmem:[#allocation6 + $0x8] sm:$0x3] %vm264_vm11, %v2225_v62  ;;  %v3062_v62 = vld [vmem:[%s5097_s8 + $0x50] sm:$0xff] }
0x257f   :  { %3013 = vmatpush.msrb.mxu2 %v2916_v10  ;;  %3121 = vmatpush.msra.mxu0 %v3062_v62  ;;  %v3104_v10 = vld [vmem:[%s5097_s8 + $0x1a0] sm:$0xff] }
0x2580   :  { %3191 = vmatpush.msra.mxu3 %v3109_v32 }
0x2581   :  { %3162 = vmatpush.msra.mxu2 %v3099_v63  ;;  %3122 = vmatpush.msra.mxu0 %v3061_v5 }
0x2583   :  { %3163 = vmatpush.msra.mxu2 %v3098_v8  ;;  %3123 = vmatpush.msra.mxu0 %v3060_v27 }
0x2585   :  { %3164 = vmatpush.msra.mxu2 %v3097_v17  ;;  %3124 = vmatpush.msra.mxu0 %v3059_v35 }
0x2587   :  { %3165 = vmatpush.msra.mxu2 %v3096_v18  ;;  %3125 = vmatpush.msra.mxu0 %v3058_v14 }
0x2589   :  { %3166 = vmatpush.msra.mxu2 %v3095_v60  ;;  %3126 = vmatpush.msra.mxu0 %v3057_v37 }
0x258b   :  { %3167 = vmatpush.msra.mxu2 %v3094_v24  ;;  %3127 = vmatpush.msra.mxu0 %v3056_v15 }
0x258d   :  { %3168 = vmatpush.msra.mxu2 %v3093_v30  ;;  %3128 = vmatpush.msra.mxu0 %v3055_v31 }
0x258f   :  { %3169 = vmatpush.msra.mxu2 %v3092_v34 }
0x2591   :  { %3170 = vmatpush.msra.mxu2 %v3091_v56 }
0x2593   :  { %3171 = vmatpush.msra.mxu2 %v3090_v41 }
0x25da   :  { %v2897_v26 = vpop.permute.xlu1 %2896 }
0x25db   :  { %2899 = vst.msk [vmem:[#allocation6] sm:$0x3] %vm264_vm11, %v2897_v26  ;;  %v3107_v26 = vld [vmem:[%s5097_s8 + $0x1b8] sm:$0xff] }
0x25e2   :  { %v1887_v42 = vpop.permute.xlu1 %1886  ;;  %v2902_v43 = vld [vmem:[#allocation6] sm:$0xff] }
0x25e3   :  { %1889 = vst.msk [vmem:[#allocation6 + $0xc] sm:$0x3] %vm264_vm11, %v1887_v42  ;;  %2906 = vrot.lane.b32.xlu2 %v2902_v43, %s3779_s18  ;;  %v3106_v42 = vld [vmem:[%s5097_s8 + $0x1b0] sm:$0xff] }
0x25e4   :  { %v3054_v43 = vld [vmem:[%s5097_s8 + $0x10] sm:$0xff] }
0x25e5   :  { %3129 = vmatpush.msra.mxu0 %v3054_v43 }
0x25ea   :  { %v2887_v44 = vpop.permute.xlu1 %2886  ;;  %v3296_v45 = vld [vmem:[#allocation6 + $0x1] ss:$2 sm:$0xff]  ;;  %v3242_v46 = vld [vmem:[#allocation6] ss:$2 sm:$0xff] }
0x25eb   :  { %v2903_v47 = vld [vmem:[#allocation6 + $0x8] sm:$0xff]  ;;  %2889 = vst.msk [vmem:[#allocation7] sm:$0x3] %vm264_vm11, %v2887_v44  ;;  %3298 = vrot.lane.b32.xlu2 %v3296_v45, %s3779_s18  ;;  %3244 = vrot.lane.b32.xlu1 %v3242_v46, %s3779_s18  ;;  %v3089_v45 = vld [vmem:[%s5097_s8 + $0x128] sm:$0xff] }
0x25ec   :  { %2895 = vst.msk [vmem:[#allocation5 + $0xe] sm:$0x3] %vm264_vm11, %v2887_v44  ;;  %2908 = vrot.lane.b32.xlu0 %v2903_v47, %s3779_s18  ;;  %v3070_v44 = vld [vmem:[%s5097_s8 + $0x90] sm:$0xff]  ;;  %v3105_v46 = vld [vmem:[%s5097_s8 + $0x1a8] sm:$0xff]  ;;  %3172 = vmatpush.msra.mxu2 %v3089_v45 }
0x25ed   :  { %v3053_v47 = vld [vmem:[%s5097_s8 + $0x8] sm:$0xff] }
0x25ee   :  { %3130 = vmatpush.msra.mxu0 %v3053_v47  ;;  %3173 = vmatpush.msra.mxu2 %v3088_v49 }
0x25f0   :  { %3131 = vmatpush.msra.mxu0 %v3052_v50 }
0x25f3   :  { %2880 = vrot.lane.b32.xlu2 %v4708_v6, %s3781_s12  ;;  %v3080_v6 = vld [vmem:[%s5097_s8 + $0xe0] sm:$0xff]  ;;  %v2901_v22 = vld [vmem:[#allocation5 + $0x8] sm:$0xff] }
0x25f4   :  { %3142 = vmatpush.msra.mxu1 %v3080_v6 }
0x25f6   :  { %3143 = vmatpush.msra.mxu1 %v3079_v16 }
0x25f8   :  { %3144 = vmatpush.msra.mxu1 %v3078_v21 }
0x25fa   :  { %3145 = vmatpush.msra.mxu1 %v3077_v23 }
0x25fc   :  { %3146 = vmatpush.msra.mxu1 %v3076_v28 }
0x25fe   :  { %3147 = vmatpush.msra.mxu1 %v3075_v33 }
0x2600   :  { %3148 = vmatpush.msra.mxu1 %v3074_v36 }
0x2602   :  { %3149 = vmatpush.msra.mxu1 %v3073_v20 }
0x2604   :  { %3150 = vmatpush.msra.mxu1 %v3072_v38 }
0x2606   :  { %3151 = vmatpush.msra.mxu1 %v3071_v40 }
0x2608   :  { %3152 = vmatpush.msra.mxu1 %v3070_v44 }
0x260a   :  { %3153 = vmatpush.msra.mxu1 %v3069_v48 }
0x263d   :  { %v2907_v52 = vpop.permute.xlu2 %2906 }
0x263e   :  { %v2912_v53 = vsel %vm55_vm1, %v2900_v51, %v2907_v52  ;;  %v3068_v51 = vld [vmem:[%s5097_s8 + $0x80] sm:$0xff]  ;;  %v3087_v52 = vld [vmem:[%s5097_s8 + $0x118] sm:$0xff] }
0x263f   :  { %3454 = vmatmul.msk.f32.vlgmr.msrb.gmra.mxu0 %vm137_vm2, %v2912_v53  ;;  %3456 = vmatmul.msk.f32.vlgmr.msrb.gmra.mxu1 %vm137_vm2, %v2912_v53 }
0x2640   :  { %3458 = vmatmul.msk.f32.vlgmr.msrb.gmra.mxu2 %vm137_vm2, %v2912_v53  ;;  %3460 = vmatmul.msk.f32.vlgmr.msrb.gmra.mxu3 %vm137_vm2, %v2912_v53  ;;  %v3103_v53 = vld [vmem:[%s5097_s8 + $0x198] sm:$0xff] }
0x2641   :  { %3154 = vmatpush.msra.mxu1 %v3068_v51  ;;  %3174 = vmatpush.msra.mxu2 %v3087_v52 }
0x2643   :  { %3175 = vmatpush.msra.mxu2 %v3086_v54 }
0x2645   :  { %v4871_v4 = vpop.permute.xlu2 %3298  ;;  %3176 = vmatpush.msra.mxu2 %v3085_v57 }
0x2647   :  { %3177 = vmatpush.msra.mxu2 %v3084_v59 }
0x264d   :  { %v2881_v19 = vpop.permute.xlu2 %2880 }
0x264e   :  { %2883 = vst.msk [vmem:[#allocation8] sm:$0x3] %vm264_vm11, %v2881_v19  ;;  %vm3208_vm11 = vcmask 7168  }
0x264f   :  { %2884 = vst.msk [vmem:[#allocation8] sm:$0x3] %vm266_vm12, %v4704_v0  ;;  %v3108_v0 = vld [vmem:[%s5097_s8 + $0x1c0] sm:$0xff] }
0x2650   :  { %3192 = vmatpush.msra.mxu3 %v3108_v0 }
0x2652   :  { %3193 = vmatpush.msra.mxu3 %v3107_v26 }
0x2654   :  { %3194 = vmatpush.msra.mxu3 %v3106_v42 }
0x2656   :  { %3195 = vmatpush.msra.mxu3 %v3105_v46 }
0x2658   :  { %3196 = vmatpush.msra.mxu3 %v3104_v10 }
0x265a   :  { %3197 = vmatpush.msra.mxu3 %v3103_v53 }
0x265c   :  { %3198 = vmatpush.msra.mxu3 %v3102_v55 }
0x265e   :  { %v2909_v39 = vpop.permute.xlu0 %2908  ;;  %3199 = vmatpush.msra.mxu3 %v3101_v58 }
0x265f   :  { %v2913_v29 = vsel %vm55_vm1, %v2901_v22, %v2909_v39  ;;  %v3782_v22 = vmov 0  }
0x2660   :  { %3455 = vmatmul.msk.f32.gmra.mxu0 %vm137_vm2, %v2913_v29  ;;  %3457 = vmatmul.msk.f32.gmra.mxu1 %vm137_vm2, %v2913_v29 }
0x2661   :  { %3459 = vmatmul.msk.f32.gmra.mxu2 %vm137_vm2, %v2913_v29  ;;  %3461 = vmatmul.msk.f32.gmra.mxu3 %vm137_vm2, %v2913_v29 }
0x2662   :  { %3200 = vmatpush.msra.mxu3 %v3100_v61  ;;  %3469 = vset.pattern.permute.xlu0 %v3782_v22 }
0x2663   :  { %3470 = vset.pattern.permute.xlu1 %v3782_v22 }
0x26bc   :  { %v2969_v63 = vpop.f32.mrf.mxu0  ;;  %v2992_v1 = vpop.f32.mrf.mxu1 }
0x26bd   :  { %3728 = vtanh.f32 %v2969_v63 }
0x26be   :  { %3730 = vtanh.f32 %v2992_v1 }
0x26c3   :  { %v3729_v2 = vpop.eup %3728  ;;  %v3015_v6 = vpop.f32.mrf.mxu2 }
0x26c4   :  { %v3038_v8 = vpop.f32.mrf.mxu3  ;;  %v3731_v9 = vpop.eup %3730  ;;  %3732 = vtanh.f32 %v3015_v6  ;;  %3132 = vmatmul.f32.vlgmr.msra.gmra.mxu0 %v3729_v2 }
0x26c5   :  { %3734 = vtanh.f32 %v3038_v8  ;;  %3155 = vmatmul.f32.vlgmr.msra.gmra.mxu1 %v3731_v9 }
0x26ca   :  { %v3733_v17 = vpop.eup %3732 }
0x26cb   :  { %v3735_v11 = vpop.eup %3734  ;;  %3178 = vmatmul.f32.vlgmr.msra.gmra.mxu2 %v3733_v17 }
0x26cc   :  { %3201 = vmatmul.f32.vlgmr.msra.gmra.mxu3 %v3735_v11 }
0x26dd   :  { %v2972_v12 = vpop.f32.mrf.mxu0  ;;  %v2995_v16 = vpop.f32.mrf.mxu1 }
0x26de   :  { %3736 = vtanh.f32 %v2972_v12 }
0x26df   :  { %3738 = vtanh.f32 %v2995_v16 }
0x26e4   :  { %v3737_v18 = vpop.eup %3736  ;;  %v3018_v3 = vpop.f32.mrf.mxu2 }
0x26e5   :  { %v3041_v62 = vpop.f32.mrf.mxu3  ;;  %v3739_v21 = vpop.eup %3738  ;;  %3740 = vtanh.f32 %v3018_v3  ;;  %3135 = vmatmul.f32.gmra.mxu0 %v3737_v18 }
0x26e6   :  { %3742 = vtanh.f32 %v3041_v62  ;;  %3158 = vmatmul.f32.gmra.mxu1 %v3739_v21 }
0x26eb   :  { %v3741_v60 = vpop.eup %3740 }
0x26ec   :  { %v3743_v7 = vpop.eup %3742  ;;  %3181 = vmatmul.f32.gmra.mxu2 %v3741_v60 }
0x26ed   :  { %3204 = vmatmul.f32.gmra.mxu3 %v3743_v7 }
0x2741   :  { %v3133_v5 = vpop.f32.mrf.mxu0 }
0x2742   :  { %v3156_v23 = vpop.f32.mrf.mxu1 }
0x2743   :  { %v3157_v24 = vadd.f32 %v3156_v23, %v3133_v5 }
0x274e   :  { %v3179_v25 = vpop.f32.mrf.mxu2 }
0x274f   :  { %v3180_v19 = vadd.f32 %v3179_v25, %v3157_v24  ;;  %v3202_v27 = vpop.f32.mrf.mxu3 }
0x2751   :  { %v3203_v28 = vadd.f32 %v3202_v27, %v3180_v19 }
0x2753   :  { %v3209_v30 = vsel %vm3208_vm11, %v3203_v28, -inf }
0x2754   :  { %v3210_v32 = vrot.slane %v3209_v30, 4 }
0x2756   :  { %v3211_v35 = vmax.f32 %v3209_v30, %v3210_v32 }
0x2758   :  { %v3212_v33 = vrot.slane %v3211_v35, 2 }
0x275a   :  { %v3213_v34 = vmax.f32 %v3211_v35, %v3212_v33  ;;  %v3324_v35 = vld [vmem:[%s5098_s9 + $0x38] sm:$0xff]  ;;  %v3323_v33 = vld [vmem:[%s5098_s9 + $0x30] sm:$0xff] }
0x275b   :  { %3340 = vmatpush.msrb.mxu0 %v3324_v35 }
0x275c   :  { %v3214_v0 = vrot.slane %v3213_v34, 1 }
0x275d   :  { %3341 = vmatpush.msrb.mxu0 %v3323_v33 }
0x275e   :  { %v3215_v14 = vmax.f32 %v3213_v34, %v3214_v0  ;;  %v3322_v34 = vld [vmem:[%s5098_s9 + $0x28] sm:$0xff]  ;;  %v3321_v0 = vld [vmem:[%s5098_s9 + $0x20] sm:$0xff] }
0x275f   :  { %3342 = vmatpush.msrb.mxu0 %v3322_v34 }
0x2760   :  { %v3216_v36 = vsub.f32 %v3203_v28, %v3215_v14  ;;  %v3319_v14 = vld [vmem:[%s5098_s9 + $0x10] sm:$0xff] }
0x2761   :  { %3343 = vmatpush.msrb.mxu0 %v3321_v0 }
0x2762   :  { %v3217_v56 = vmul.f32 1.442695, %v3216_v36  ;;  %v3136_v20 = vpop.f32.mrf.mxu0  ;;  %v3318_v36 = vld [vmem:[%s5098_s9 + $0x8] sm:$0xff] }
0x2763   :  { %v3159_v15 = vpop.f32.mrf.mxu1 }
0x2764   :  { %3744 = vpow2.f32 %v3217_v56  ;;  %v3160_v29 = vadd.f32 %v3159_v15, %v3136_v20  ;;  %v3317_v56 = vld [vmem:[%s5098_s9] sm:$0xff] }
0x2765   :  { %v3241_v20 = vld [vmem:[#allocation5] ss:$2 sm:$0xff] }
0x276a   :  { %v3745_v26 = vpop.eup %3744 }
0x276b   :  { %v3219_v37 = vsel %vm3208_vm11, %v3745_v26, 0.0 }
0x276c   :  { %v3220_v38 = vrot.slane %v3219_v37, 4 }
0x276e   :  { %v3221_v39 = vadd.f32 %v3220_v38, %v3219_v37 }
0x276f   :  { %v3182_v31 = vpop.f32.mrf.mxu2 }
0x2770   :  { %v3222_v40 = vrot.slane %v3221_v39, 2  ;;  %v3183_v41 = vadd.f32 %v3182_v31, %v3160_v29  ;;  %v3205_v42 = vpop.f32.mrf.mxu3  ;;  %v3294_v31 = vld [vmem:[#allocation5 + $0x1] ss:$2 sm:$0xff] }
0x2772   :  { %v3223_v43 = vadd.f32 %v3222_v40, %v3221_v39  ;;  %v3206_v44 = vadd.f32 %v3205_v42, %v3183_v41  ;;  %v3301_v41 = vsel %vm55_vm1, %v3294_v31, %v4871_v4  ;;  %v3471_v4 = vld [vmem:[%s5099_s10] ss:$0 sm:$0xff] }
0x2774   :  { %v3224_v45 = vrot.slane %v3223_v43, 1  ;;  %v3261_v46 = vsel %vm3208_vm11, %v3206_v44, -inf }
0x2775   :  { %v3262_v47 = vrot.slane %v3261_v46, 4 }
0x2776   :  { %v3225_v48 = vadd.f32 %v3224_v45, %v3223_v43 }
0x2777   :  { %v3263_v49 = vmax.f32 %v3261_v46, %v3262_v47 }
0x2778   :  { %3746 = vrcp.f32 %v3225_v48  ;;  %v3237_v58 = vand.u32 2147483648, %v3225_v48  ;;  %v3235_v63 = vand.u32 2147483647, %v3225_v48  ;;  %vm3231_vm5 = vweird.f32 %v3225_v48 }
0x2779   :  { %v3264_v10 = vrot.slane %v3263_v49, 2 }
0x277a   :  { %v3238_v2 = vor.u32 1.1754944e-38, %v3237_v58  ;;  %vm3236_vm7 = vcmp.eq.f32.partialorder %v3235_v63, 8.507059e+37 }
0x277b   :  { %v3265_v50 = vmax.f32 %v3263_v49, %v3264_v10 }
0x277d   :  { %v3266_v51 = vrot.slane %v3265_v50, 1 }
0x277e   :  { %v3747_v52 = vpop.eup %3746 }
0x277f   :  { %v3267_v53 = vmax.f32 %v3265_v50, %v3266_v51  ;;  %v3227_v54 = vmul.f32 %v3747_v52, %v3225_v48  ;;  %vm3232_vm4 = vweird.f32 %v3747_v52 }
0x2780   :  { %vm3233_vm6 = vmor %vm3231_vm5, %vm3232_vm4 }
0x2781   :  { %v3268_v55 = vsub.f32 %v3206_v44, %v3267_v53  ;;  %v3228_v57 = vsub.f32 1.0, %v3227_v54 }
0x2783   :  { %v3269_v59 = vmul.f32 1.442695, %v3268_v55  ;;  %v3229_v61 = vmul.f32 %v3747_v52, %v3228_v57 }
0x2785   :  { %3748 = vpow2.f32 %v3269_v59  ;;  %v3230_v1 = vadd.f32 %v3747_v52, %v3229_v61 }
0x2787   :  { %v3234_v6 = vsel %vm3233_vm6, %v3747_v52, %v3230_v1 }
0x2788   :  { %v3239_v8 = vsel %vm3236_vm7, %v3238_v2, %v3234_v6 }
0x2789   :  { %v3240_v9 = vmul.f32 %v3745_v26, %v3239_v8  ;;  %v3245_v26 = vpop.permute.xlu1 %3244 }
0x278a   :  { %v3247_v15 = vsel %vm55_vm1, %v3241_v20, %v3245_v26  ;;  %vm3352_vm1 = vcmask 33792  }
0x278b   :  { %v3749_v17 = vpop.eup %3748  ;;  %3250 = vperm.xlu0 %3469, %v3240_v9  }
0x278c   :  { %v3271_v11 = vsel %vm3208_vm11, %v3749_v17, 0.0 }
0x278d   :  { %v3272_v12 = vrot.slane %v3271_v11, 4 }
0x278f   :  { %v3273_v16 = vadd.f32 %v3272_v12, %v3271_v11 }
0x2791   :  { %v3274_v18 = vrot.slane %v3273_v16, 2 }
0x2793   :  { %v3275_v3 = vadd.f32 %v3274_v18, %v3273_v16 }
0x2795   :  { %v3276_v62 = vrot.slane %v3275_v3, 1 }
0x2797   :  { %v3277_v21 = vadd.f32 %v3276_v62, %v3275_v3 }
0x2799   :  { %3750 = vrcp.f32 %v3277_v21  ;;  %v3289_v23 = vand.u32 2147483648, %v3277_v21  ;;  %v3287_v25 = vand.u32 2147483647, %v3277_v21  ;;  %vm3283_vm9 = vweird.f32 %v3277_v21 }
0x279b   :  { %v3290_v27 = vor.u32 1.1754944e-38, %v3289_v23  ;;  %vm3288_vm13 = vcmp.eq.f32.partialorder %v3287_v25, 8.507059e+37 }
0x279f   :  { %v3751_v60 = vpop.eup %3750 }
0x27a0   :  { %v3279_v7 = vmul.f32 %v3751_v60, %v3277_v21  ;;  %vm3284_vm8 = vweird.f32 %v3751_v60 }
0x27a1   :  { %vm3285_vm10 = vmor %vm3283_vm9, %vm3284_vm8 }
0x27a2   :  { %v3280_v5 = vsub.f32 1.0, %v3279_v7 }
0x27a4   :  { %v3281_v24 = vmul.f32 %v3751_v60, %v3280_v5 }
0x27a6   :  { %v3282_v19 = vadd.f32 %v3751_v60, %v3281_v24 }
0x27a8   :  { %v3286_v28 = vsel %vm3285_vm10, %v3751_v60, %v3282_v19 }
0x27a9   :  { %v3291_v30 = vsel %vm3288_vm13, %v3290_v27, %v3286_v28 }
0x27aa   :  { %v3292_v32 = vmul.f32 %v3749_v17, %v3291_v30 }
0x27ac   :  { %3304 = vperm.xlu1 %3470, %v3292_v32  }
0x27b4   :  { %2891 = vrot.lane.b32.xlu1 %v4723_v13, %s3780_s3  ;;  %v3320_v13 = vld [vmem:[%s5098_s9 + $0x18] sm:$0xff] }
0x27b5   :  { %3344 = vmatpush.msrb.mxu0 %v3320_v13 }
0x27b7   :  { %3345 = vmatpush.msrb.mxu0 %v3319_v14 }
0x27b9   :  { %3346 = vmatpush.msrb.mxu0 %v3318_v36 }
0x27bb   :  { %3347 = vmatpush.msrb.mxu0 %v3317_v56 }
0x27fd   :  { %v3251_v37 = vpop.permute.xlu0 %3250 }
0x27fe   :  { %v3253_v38 = vmul.f32 %v3251_v37, %v3247_v15 }
0x2800   :  { %v3254_v22 = vsel %vm137_vm2, %v3253_v38, 0.0 }
0x2801   :  { %v3255_v39 = vrot.slane %v3254_v22, 4 }
0x2803   :  { %v3256_v29 = vadd.f32 %v3255_v39, %v3254_v22 }
0x2805   :  { %v3257_v43 = vrot.slane %v3256_v29, 2 }
0x2807   :  { %v3258_v46 = vadd.f32 %v3257_v43, %v3256_v29 }
0x2809   :  { %v3259_v10 = vrot.slane %v3258_v46, 1 }
0x280b   :  { %v3260_v52 = vadd.f32 %v3259_v10, %v3258_v46 }
0x281e   :  { %v3305_v40 = vpop.permute.xlu1 %3304 }
0x281f   :  { %v3307_v42 = vmul.f32 %v3305_v40, %v3301_v41 }
0x2821   :  { %v3308_v44 = vsel %vm137_vm2, %v3307_v42, 0.0 }
0x2822   :  { %v3309_v45 = vrot.slane %v3308_v44, 4 }
0x2824   :  { %v3310_v47 = vadd.f32 %v3309_v45, %v3308_v44 }
0x2826   :  { %v3311_v48 = vrot.slane %v3310_v47, 2  ;;  %v2892_v49 = vpop.permute.xlu1 %2891 }
0x2827   :  { %2894 = vst.msk [vmem:[#allocation7] sm:$0x3] %vm266_vm12, %v2892_v49 }
0x2828   :  { %v3312_v50 = vadd.f32 %v3311_v48, %v3310_v47 }
0x282a   :  { %v3313_v51 = vrot.slane %v3312_v50, 1 }
0x282c   :  { %v3314_v53 = vadd.f32 %v3313_v51, %v3312_v50 }
0x282e   :  { %v3316_v54 = vsel %vm3315_vm0, %v3260_v52, %v3314_v53 }
0x282f   :  { %3462 = vmatmul.msk.f32.vlgmr.msrb.gmra.mxu0 %vm137_vm2, %v3316_v54 }
0x28ac   :  { %v3349_v55 = vpop.f32.mrf.mxu0 }
0x28ad   :  { %v3350_v57 = vadd.f32 %v3471_v4, %v3349_v55 }
0x28af   :  { %3353 = vst.msk [vmem:[#allocation9] sm:$0x3] %vm3352_vm1, %v3350_v57 }
0x28b0   :  { %3364 = dma.vmem_to_hbm [thread:$0]  %s3360_s4, 32, %s3362_s2, [#allocation10]  }
0x28b1   :  { %3776 = dma.done.wait [#allocation10], 32  }
0x28b2   :  { %3777 = vsyncadd [#allocation10], 4294967264 }
0x28b3   :  { %3369 = vsyncpa [#allocation10], 1 }

</bundles_post_ra>
